<compile_context>
chip_gen: v5e
topology: v5e:2x2
jax: 0.10.0
libtpu: 0.0.40
codegen_flags: <defaults>
</compile_context>

<pallas_src>
import numpy as np
import jax
import jax.numpy as jnp
from jax import lax
from jax.experimental import pallas as pl
from jax.experimental.pallas import tpu as pltpu

# ---- fixed network geometry: Conv2d(3,16,3) -> pool -> Conv2d(16,32,3) -> pool -> Linear(1152,5)
H0, W0, C0 = 30, 30, 3          # input (NCHW -> NHWC -> planar (30, 90))
H1, W1, C1 = 28, 28, 16         # conv1 output
HP1, WP1 = 14, 14               # pool1 output
H2, W2, C2 = 12, 12, 32         # conv2 output
HP2, WP2 = 6, 6                 # pool2 output
NCLS = 5


# ----------------------------------------------------------------------------
# Fused kernel: one image per grid step, everything resident in VMEM.
# ----------------------------------------------------------------------------
def _fused_cnn_kernel(x_ref, wb1_ref, b1_ref, sel1_ref, wb2_ref, b2_ref, sel2_ref,
                      wf_ref, bf_ref, o_ref, p1_ref, p2_ref):
    f32 = jnp.float32
    x = x_ref[0]                                                    # (30, 90) planar image

    # ---- conv1 + bias + ReLU: 3 banded matmuls, K=90, N=448 (lane-dense) ----
    acc = jnp.dot(x[0:H1, :], wb1_ref[0], preferred_element_type=f32)
    acc = acc + jnp.dot(x[1:H1 + 1, :], wb1_ref[1], preferred_element_type=f32)
    acc = acc + jnp.dot(x[2:H1 + 2, :], wb1_ref[2], preferred_element_type=f32)
    c1 = jnp.maximum(acc + b1_ref[...], 0.0)                        # (28, 448)

    # ---- pool1: width via exact selector matmuls, height via VPU max ----
    cm = jnp.maximum(jnp.dot(c1, sel1_ref[0], preferred_element_type=f32),
                     jnp.dot(c1, sel1_ref[1], preferred_element_type=f32))   # (28, 224)
    for r in range(HP1):
        p1_ref[pl.ds(r, 1), :] = jnp.maximum(cm[2 * r:2 * r + 1, :],
                                             cm[2 * r + 1:2 * r + 2, :])     # (14, 224)

    # ---- conv2 + bias + ReLU: 3 banded matmuls, K=224, N=384 ----
    acc = jnp.dot(p1_ref[pl.ds(0, H2), :], wb2_ref[0], preferred_element_type=f32)
    acc = acc + jnp.dot(p1_ref[pl.ds(1, H2), :], wb2_ref[1], preferred_element_type=f32)
    acc = acc + jnp.dot(p1_ref[pl.ds(2, H2), :], wb2_ref[2], preferred_element_type=f32)
    c2 = jnp.maximum(acc + b2_ref[...], 0.0)                        # (12, 384)

    # ---- pool2 ----
    cm = jnp.maximum(jnp.dot(c2, sel2_ref[0], preferred_element_type=f32),
                     jnp.dot(c2, sel2_ref[1], preferred_element_type=f32))   # (12, 192)
    for r in range(HP2):
        p2_ref[pl.ds(r, 1), :] = jnp.maximum(cm[2 * r:2 * r + 1, :],
                                             cm[2 * r + 1:2 * r + 2, :])     # (6, 192)

    # ---- fused FC: weight pre-permuted on host, so no NCHW transpose is needed ----
    out = bf_ref[...]                                               # (1, 5)
    for h in range(HP2):
        out = out + jnp.dot(p2_ref[pl.ds(h, 1), :], wf_ref[h],
                            preferred_element_type=f32)
    o_ref[0] = out


# ----------------------------------------------------------------------------
# One-time host-side parameter repacking (pure numpy, done once at setup).
# ----------------------------------------------------------------------------
def _band_conv_weights(w, width):
    """w: (3,3,Cin,Cout) HWIO.  Returns (3, width*Cin, (width-2)*Cout) so that, in planar
    (H, W*C) layout, the conv is  Y = sum_dy  X[dy:dy+Ho, :] @ wb[dy]  (exact, banded zeros)."""
    kh, kw, cin, cout = w.shape
    wo = width - kw + 1
    wb = np.zeros((kh, width * cin, wo * cout), np.float32)
    for dy in range(kh):
        for dx in range(kw):
            for j in range(wo):
                wb[dy, (j + dx) * cin:(j + dx + 1) * cin,
                   j * cout:(j + 1) * cout] = w[dy, dx]
    return wb


def _pool_col_selectors(width, c):
    """Exact 0/1 selectors for width pooling in planar layout: (2, width*c, (width//2)*c)."""
    wp = width // 2
    sel = np.zeros((2, width * c, wp * c), np.float32)
    for j in range(wp):
        for ch in range(c):
            sel[0, (2 * j) * c + ch, j * c + ch] = 1.0
            sel[1, (2 * j + 1) * c + ch, j * c + ch] = 1.0
    return sel


def _fc_weight_slab(wf):
    """wf: (1152, 5) in torch NCHW-flatten order (c*36 + h*6 + w).
    Returns (6, 192, 5) indexed (h, w*32 + c) to match the kernel's planar layout."""
    idx = np.zeros((HP2, WP2 * C2), np.int64)
    for h in range(HP2):
        for w_ in range(WP2):
            for c in range(C2):
                idx[h, w_ * C2 + c] = c * (HP2 * WP2) + h * WP2 + w_
    return np.asarray(wf)[idx]


def prepare_params(params):
    w1, b1, w2, b2, wf, bf = (np.asarray(p, np.float32) for p in params)
    wb1 = _band_conv_weights(w1, W0)                      # (3,  90, 448)
    wb2 = _band_conv_weights(w2, WP1)                     # (3, 224, 384)
    b1row = np.tile(b1.reshape(-1), W1)[None, :]          # (1, 448)
    b2row = np.tile(b2.reshape(-1), W2)[None, :]          # (1, 384)
    sel1 = _pool_col_selectors(W1, C1)                    # (2, 448, 224)
    sel2 = _pool_col_selectors(W2, C2)                    # (2, 384, 192)
    wf_slab = _fc_weight_slab(wf)                         # (6, 192, 5)
    bfr = bf.reshape(1, NCLS)                             # (1, 5)
    return tuple(jnp.asarray(a, jnp.float32)
                 for a in (wb1, b1row, sel1, wb2, b2row, sel2, wf_slab, bfr))


# ----------------------------------------------------------------------------
# Forward pass: one XLA transpose/reshape for the input, then a single pallas_call.
# ----------------------------------------------------------------------------
def cnn_forward_pallas(x_nchw, prepared):
    wb1, b1row, sel1, wb2, b2row, sel2, wf_slab, bfr = prepared
    n = x_nchw.shape[0]
    x2 = jnp.transpose(x_nchw, (0, 2, 3, 1)).reshape(n, H0, W0 * C0)   # planar NHWC rows

    grid_spec = pltpu.PrefetchScalarGridSpec(
        num_scalar_prefetch=0,
        grid=(n,),
        in_specs=[
            pl.BlockSpec((1, H0, W0 * C0), lambda i: (i, 0, 0)),          # image i
            pl.BlockSpec((3, W0 * C0, W1 * C1), lambda i: (0, 0, 0)),     # conv1 banded weights
            pl.BlockSpec((1, W1 * C1), lambda i: (0, 0)),                 # conv1 bias row
            pl.BlockSpec((2, W1 * C1, WP1 * C1), lambda i: (0, 0, 0)),    # pool1 selectors
            pl.BlockSpec((3, WP1 * C1, W2 * C2), lambda i: (0, 0, 0)),    # conv2 banded weights
            pl.BlockSpec((1, W2 * C2), lambda i: (0, 0)),                 # conv2 bias row
            pl.BlockSpec((2, W2 * C2, WP2 * C2), lambda i: (0, 0, 0)),    # pool2 selectors
            pl.BlockSpec((HP2, WP2 * C2, NCLS), lambda i: (0, 0, 0)),     # fc weight slab
            pl.BlockSpec((1, NCLS), lambda i: (0, 0)),                    # fc bias
        ],
        out_specs=pl.BlockSpec((1, 1, NCLS), lambda i: (i, 0, 0)),
        scratch_shapes=[pltpu.VMEM((HP1, WP1 * C1), jnp.float32),         # pool1 output
                        pltpu.VMEM((HP2, WP2 * C2), jnp.float32)],        # pool2 output
    )
    out = pl.pallas_call(
        _fused_cnn_kernel,
        out_shape=jax.ShapeDtypeStruct((n, 1, NCLS), jnp.float32),
        grid_spec=grid_spec,
        compiler_params=pltpu.CompilerParams(dimension_semantics=("parallel",)),
    )(x2, wb1, b1row, sel1, wb2, b2row, sel2, wf_slab, bfr)
    return out[:, 0, :]


# ----------------------------------------------------------------------------
# Pure-JAX reference (matches the PyTorch module) and parameter init.
# ----------------------------------------------------------------------------
def cnn_forward_reference(x_nchw, params):
    w1, b1, w2, b2, wf, bf = params
    dn = ("NCHW", "OIHW", "NCHW")

    def conv(x, w, b):
        w_oihw = jnp.transpose(w, (3, 2, 0, 1))
        y = lax.conv_general_dilated(x, w_oihw, (1, 1), "VALID", dimension_numbers=dn)
        return jnp.maximum(y + b.reshape(1, -1, 1, 1), 0.0)

    def pool(x):
        return lax.reduce_window(x, -jnp.inf, lax.max, (1, 1, 2, 2), (1, 1, 2, 2), "VALID")

    y = pool(conv(x_nchw, w1, b1))
    y = pool(conv(y, w2, b2))
    y = y.reshape(y.shape[0], C2 * HP2 * WP2)
    return jnp.dot(y, wf) + bf


def init_params(key):
    def uinit(k, shape, fan_in):
        bound = 1.0 / (fan_in ** 0.5)
        return jax.random.uniform(k, shape, jnp.float32, -bound, bound)

    k1, k2, k3, k4, k5, k6 = jax.random.split(key, 6)
    w1 = uinit(k1, (3, 3, 3, 16), 3 * 3 * 3)
    b1 = uinit(k2, (1, 16), 3 * 3 * 3)
    w2 = uinit(k3, (3, 3, 16, 32), 16 * 3 * 3)
    b2 = uinit(k4, (1, 32), 16 * 3 * 3)
    wf = uinit(k5, (C2 * HP2 * WP2, NCLS), C2 * HP2 * WP2)
    bf = uinit(k6, (1, NCLS), C2 * HP2 * WP2)
    return (w1, b1, w2, b2, wf, bf)


if __name__ == "__main__":
    key = jax.random.PRNGKey(0)
    kp, kx = jax.random.split(key)
    params = init_params(kp)
    # input must be 30x30 so the flatten matches 32*6*6 (as the module implies)
    x = jax.random.normal(kx, (2, 3, 30, 30), dtype=jnp.float32)

    prepared = prepare_params(params)              # one-time host-side weight repack
    out = cnn_forward_pallas(x, prepared)
    out = jax.block_until_ready(out)

    ref = cnn_forward_reference(x, params)
    assert out.shape == (2, 5)
    assert bool(jnp.allclose(out, ref, atol=2e-3, rtol=2e-3)), "mismatch vs pure-JAX reference"

    print("KERNEL_OK")
</pallas_src>

<mosaic_0001>
module attributes {stable_mosaic.version = 11 : i64} {
  func.func @_fused_cnn_kernel(%arg0: i32, %arg1: memref<1x30x90xf32, #tpu.memory_space<vmem>>, %arg2: memref<3x90x448xf32, #tpu.memory_space<vmem>>, %arg3: memref<1x448xf32, #tpu.memory_space<vmem>>, %arg4: memref<2x448x224xf32, #tpu.memory_space<vmem>>, %arg5: memref<3x224x384xf32, #tpu.memory_space<vmem>>, %arg6: memref<1x384xf32, #tpu.memory_space<vmem>>, %arg7: memref<2x384x192xf32, #tpu.memory_space<vmem>>, %arg8: memref<6x192x5xf32, #tpu.memory_space<vmem>>, %arg9: memref<1x5xf32, #tpu.memory_space<vmem>>, %arg10: memref<1x1x5xf32, #tpu.memory_space<vmem>>, %arg11: memref<14x224xf32, #tpu.memory_space<vmem>>, %arg12: memref<6x192xf32, #tpu.memory_space<vmem>>) attributes {dimension_semantics = [#tpu.dimension_semantics<parallel>], iteration_bounds = array<i64: 2>, scalar_prefetch = 0 : i64, scratch_operands = 2 : i64, tpu.core_type = #tpu.core_type<tc>, window_params = [{transform_indices = @transform_0, window_bounds = array<i64: 1, 30, 90>}, {pipeline_mode = #tpu.pipeline_mode<synchronous>, transform_indices = @transform_1, window_bounds = array<i64: 3, 90, 448>}, {pipeline_mode = #tpu.pipeline_mode<synchronous>, transform_indices = @transform_2, window_bounds = array<i64: 1, 448>}, {pipeline_mode = #tpu.pipeline_mode<synchronous>, transform_indices = @transform_3, window_bounds = array<i64: 2, 448, 224>}, {pipeline_mode = #tpu.pipeline_mode<synchronous>, transform_indices = @transform_4, window_bounds = array<i64: 3, 224, 384>}, {pipeline_mode = #tpu.pipeline_mode<synchronous>, transform_indices = @transform_5, window_bounds = array<i64: 1, 384>}, {pipeline_mode = #tpu.pipeline_mode<synchronous>, transform_indices = @transform_6, window_bounds = array<i64: 2, 384, 192>}, {pipeline_mode = #tpu.pipeline_mode<synchronous>, transform_indices = @transform_7, window_bounds = array<i64: 6, 192, 5>}, {pipeline_mode = #tpu.pipeline_mode<synchronous>, transform_indices = @transform_8, window_bounds = array<i64: 1, 5>}, {transform_indices = @transform_9, window_bounds = array<i64: 1, 1, 5>}]} {
    %c0 = arith.constant 0 : index
    %c0_0 = arith.constant 0 : index
    %c0_1 = arith.constant 0 : index
    %0 = vector.load %arg1[%c0, %c0_0, %c0_1] : memref<1x30x90xf32, #tpu.memory_space<vmem>>, vector<1x30x90xf32>
    %1 = vector.shape_cast %0 : vector<1x30x90xf32> to vector<30x90xf32>
    %2 = vector.extract_strided_slice %1 {offsets = [0, 0], sizes = [28, 90], strides = [1, 1]} : vector<30x90xf32> to vector<28x90xf32>
    %c0_2 = arith.constant 0 : index
    %c0_3 = arith.constant 0 : index
    %c0_4 = arith.constant 0 : index
    %3 = vector.load %arg2[%c0_2, %c0_3, %c0_4] : memref<3x90x448xf32, #tpu.memory_space<vmem>>, vector<1x90x448xf32>
    %4 = vector.shape_cast %3 : vector<1x90x448xf32> to vector<90x448xf32>
    %cst = arith.constant dense<0.000000e+00> : vector<28x448xf32>
    %5 = tpu.matmul %2, %4, %cst {dimension_numbers = #tpu.dot_dimension_numbers<[1], [0], [0], [1], [0, 0, 1, 1], [], []>} : vector<28x90xf32>, vector<90x448xf32>, vector<28x448xf32> -> vector<28x448xf32>
    %6 = vector.extract_strided_slice %1 {offsets = [1, 0], sizes = [28, 90], strides = [1, 1]} : vector<30x90xf32> to vector<28x90xf32>
    %c1 = arith.constant 1 : index
    %c0_5 = arith.constant 0 : index
    %c0_6 = arith.constant 0 : index
    %7 = vector.load %arg2[%c1, %c0_5, %c0_6] : memref<3x90x448xf32, #tpu.memory_space<vmem>>, vector<1x90x448xf32>
    %8 = vector.shape_cast %7 : vector<1x90x448xf32> to vector<90x448xf32>
    %cst_7 = arith.constant dense<0.000000e+00> : vector<28x448xf32>
    %9 = tpu.matmul %6, %8, %cst_7 {dimension_numbers = #tpu.dot_dimension_numbers<[1], [0], [0], [1], [0, 0, 1, 1], [], []>} : vector<28x90xf32>, vector<90x448xf32>, vector<28x448xf32> -> vector<28x448xf32>
    %10 = arith.addf %5, %9 : vector<28x448xf32>
    %11 = vector.extract_strided_slice %1 {offsets = [2, 0], sizes = [28, 90], strides = [1, 1]} : vector<30x90xf32> to vector<28x90xf32>
    %c2 = arith.constant 2 : index
    %c0_8 = arith.constant 0 : index
    %c0_9 = arith.constant 0 : index
    %12 = vector.load %arg2[%c2, %c0_8, %c0_9] : memref<3x90x448xf32, #tpu.memory_space<vmem>>, vector<1x90x448xf32>
    %13 = vector.shape_cast %12 : vector<1x90x448xf32> to vector<90x448xf32>
    %cst_10 = arith.constant dense<0.000000e+00> : vector<28x448xf32>
    %14 = tpu.matmul %11, %13, %cst_10 {dimension_numbers = #tpu.dot_dimension_numbers<[1], [0], [0], [1], [0, 0, 1, 1], [], []>} : vector<28x90xf32>, vector<90x448xf32>, vector<28x448xf32> -> vector<28x448xf32>
    %15 = arith.addf %10, %14 : vector<28x448xf32>
    %c0_11 = arith.constant 0 : index
    %c0_12 = arith.constant 0 : index
    %16 = vector.load %arg3[%c0_11, %c0_12] : memref<1x448xf32, #tpu.memory_space<vmem>>, vector<1x448xf32>
    %17 = vector.broadcast %16 : vector<1x448xf32> to vector<28x448xf32>
    %18 = arith.addf %15, %17 : vector<28x448xf32>
    %cst_13 = arith.constant 0.000000e+00 : f32
    %19 = vector.broadcast %cst_13 : f32 to vector<28x448xf32>
    %20 = arith.maximumf %18, %19 : vector<28x448xf32>
    %c0_14 = arith.constant 0 : index
    %c0_15 = arith.constant 0 : index
    %c0_16 = arith.constant 0 : index
    %21 = vector.load %arg4[%c0_14, %c0_15, %c0_16] : memref<2x448x224xf32, #tpu.memory_space<vmem>>, vector<1x448x224xf32>
    %22 = vector.shape_cast %21 : vector<1x448x224xf32> to vector<448x224xf32>
    %cst_17 = arith.constant dense<0.000000e+00> : vector<28x224xf32>
    %23 = tpu.matmul %20, %22, %cst_17 {dimension_numbers = #tpu.dot_dimension_numbers<[1], [0], [0], [1], [0, 0, 1, 1], [], []>} : vector<28x448xf32>, vector<448x224xf32>, vector<28x224xf32> -> vector<28x224xf32>
    %c1_18 = arith.constant 1 : index
    %c0_19 = arith.constant 0 : index
    %c0_20 = arith.constant 0 : index
    %24 = vector.load %arg4[%c1_18, %c0_19, %c0_20] : memref<2x448x224xf32, #tpu.memory_space<vmem>>, vector<1x448x224xf32>
    %25 = vector.shape_cast %24 : vector<1x448x224xf32> to vector<448x224xf32>
    %cst_21 = arith.constant dense<0.000000e+00> : vector<28x224xf32>
    %26 = tpu.matmul %20, %25, %cst_21 {dimension_numbers = #tpu.dot_dimension_numbers<[1], [0], [0], [1], [0, 0, 1, 1], [], []>} : vector<28x448xf32>, vector<448x224xf32>, vector<28x224xf32> -> vector<28x224xf32>
    %27 = arith.maximumf %23, %26 : vector<28x224xf32>
    %28 = vector.extract_strided_slice %27 {offsets = [0, 0], sizes = [1, 224], strides = [1, 1]} : vector<28x224xf32> to vector<1x224xf32>
    %29 = vector.extract_strided_slice %27 {offsets = [1, 0], sizes = [1, 224], strides = [1, 1]} : vector<28x224xf32> to vector<1x224xf32>
    %30 = arith.maximumf %28, %29 : vector<1x224xf32>
    %c0_22 = arith.constant 0 : index
    %c0_23 = arith.constant 0 : index
    %31 = vector.load %arg11[%c0_22, %c0_23] : memref<14x224xf32, #tpu.memory_space<vmem>>, vector<1x224xf32>
    tpu.vector_store %arg11[%c0_22, %c0_23], %30 {strides = array<i32>} : memref<14x224xf32, #tpu.memory_space<vmem>>, vector<1x224xf32>,
    %32 = vector.extract_strided_slice %27 {offsets = [2, 0], sizes = [1, 224], strides = [1, 1]} : vector<28x224xf32> to vector<1x224xf32>
    %33 = vector.extract_strided_slice %27 {offsets = [3, 0], sizes = [1, 224], strides = [1, 1]} : vector<28x224xf32> to vector<1x224xf32>
    %34 = arith.maximumf %32, %33 : vector<1x224xf32>
    %c1_24 = arith.constant 1 : index
    %c0_25 = arith.constant 0 : index
    %35 = vector.load %arg11[%c1_24, %c0_25] : memref<14x224xf32, #tpu.memory_space<vmem>>, vector<1x224xf32>
    tpu.vector_store %arg11[%c1_24, %c0_25], %34 {strides = array<i32>} : memref<14x224xf32, #tpu.memory_space<vmem>>, vector<1x224xf32>,
    %36 = vector.extract_strided_slice %27 {offsets = [4, 0], sizes = [1, 224], strides = [1, 1]} : vector<28x224xf32> to vector<1x224xf32>
    %37 = vector.extract_strided_slice %27 {offsets = [5, 0], sizes = [1, 224], strides = [1, 1]} : vector<28x224xf32> to vector<1x224xf32>
    %38 = arith.maximumf %36, %37 : vector<1x224xf32>
    %c2_26 = arith.constant 2 : index
    %c0_27 = arith.constant 0 : index
    %39 = vector.load %arg11[%c2_26, %c0_27] : memref<14x224xf32, #tpu.memory_space<vmem>>, vector<1x224xf32>
    tpu.vector_store %arg11[%c2_26, %c0_27], %38 {strides = array<i32>} : memref<14x224xf32, #tpu.memory_space<vmem>>, vector<1x224xf32>,
    %40 = vector.extract_strided_slice %27 {offsets = [6, 0], sizes = [1, 224], strides = [1, 1]} : vector<28x224xf32> to vector<1x224xf32>
    %41 = vector.extract_strided_slice %27 {offsets = [7, 0], sizes = [1, 224], strides = [1, 1]} : vector<28x224xf32> to vector<1x224xf32>
    %42 = arith.maximumf %40, %41 : vector<1x224xf32>
    %c3 = arith.constant 3 : index
    %c0_28 = arith.constant 0 : index
    %43 = vector.load %arg11[%c3, %c0_28] : memref<14x224xf32, #tpu.memory_space<vmem>>, vector<1x224xf32>
    tpu.vector_store %arg11[%c3, %c0_28], %42 {strides = array<i32>} : memref<14x224xf32, #tpu.memory_space<vmem>>, vector<1x224xf32>,
    %44 = vector.extract_strided_slice %27 {offsets = [8, 0], sizes = [1, 224], strides = [1, 1]} : vector<28x224xf32> to vector<1x224xf32>
    %45 = vector.extract_strided_slice %27 {offsets = [9, 0], sizes = [1, 224], strides = [1, 1]} : vector<28x224xf32> to vector<1x224xf32>
    %46 = arith.maximumf %44, %45 : vector<1x224xf32>
    %c4 = arith.constant 4 : index
    %c0_29 = arith.constant 0 : index
    %47 = vector.load %arg11[%c4, %c0_29] : memref<14x224xf32, #tpu.memory_space<vmem>>, vector<1x224xf32>
    tpu.vector_store %arg11[%c4, %c0_29], %46 {strides = array<i32>} : memref<14x224xf32, #tpu.memory_space<vmem>>, vector<1x224xf32>,
    %48 = vector.extract_strided_slice %27 {offsets = [10, 0], sizes = [1, 224], strides = [1, 1]} : vector<28x224xf32> to vector<1x224xf32>
    %49 = vector.extract_strided_slice %27 {offsets = [11, 0], sizes = [1, 224], strides = [1, 1]} : vector<28x224xf32> to vector<1x224xf32>
    %50 = arith.maximumf %48, %49 : vector<1x224xf32>
    %c5 = arith.constant 5 : index
    %c0_30 = arith.constant 0 : index
    %51 = vector.load %arg11[%c5, %c0_30] : memref<14x224xf32, #tpu.memory_space<vmem>>, vector<1x224xf32>
    tpu.vector_store %arg11[%c5, %c0_30], %50 {strides = array<i32>} : memref<14x224xf32, #tpu.memory_space<vmem>>, vector<1x224xf32>,
    %52 = vector.extract_strided_slice %27 {offsets = [12, 0], sizes = [1, 224], strides = [1, 1]} : vector<28x224xf32> to vector<1x224xf32>
    %53 = vector.extract_strided_slice %27 {offsets = [13, 0], sizes = [1, 224], strides = [1, 1]} : vector<28x224xf32> to vector<1x224xf32>
    %54 = arith.maximumf %52, %53 : vector<1x224xf32>
    %c6 = arith.constant 6 : index
    %c0_31 = arith.constant 0 : index
    %55 = vector.load %arg11[%c6, %c0_31] : memref<14x224xf32, #tpu.memory_space<vmem>>, vector<1x224xf32>
    tpu.vector_store %arg11[%c6, %c0_31], %54 {strides = array<i32>} : memref<14x224xf32, #tpu.memory_space<vmem>>, vector<1x224xf32>,
    %56 = vector.extract_strided_slice %27 {offsets = [14, 0], sizes = [1, 224], strides = [1, 1]} : vector<28x224xf32> to vector<1x224xf32>
    %57 = vector.extract_strided_slice %27 {offsets = [15, 0], sizes = [1, 224], strides = [1, 1]} : vector<28x224xf32> to vector<1x224xf32>
    %58 = arith.maximumf %56, %57 : vector<1x224xf32>
    %c7 = arith.constant 7 : index
    %c0_32 = arith.constant 0 : index
    %59 = vector.load %arg11[%c7, %c0_32] : memref<14x224xf32, #tpu.memory_space<vmem>>, vector<1x224xf32>
    tpu.vector_store %arg11[%c7, %c0_32], %58 {strides = array<i32>} : memref<14x224xf32, #tpu.memory_space<vmem>>, vector<1x224xf32>,
    %60 = vector.extract_strided_slice %27 {offsets = [16, 0], sizes = [1, 224], strides = [1, 1]} : vector<28x224xf32> to vector<1x224xf32>
    %61 = vector.extract_strided_slice %27 {offsets = [17, 0], sizes = [1, 224], strides = [1, 1]} : vector<28x224xf32> to vector<1x224xf32>
    %62 = arith.maximumf %60, %61 : vector<1x224xf32>
    %c8 = arith.constant 8 : index
    %c0_33 = arith.constant 0 : index
    %63 = vector.load %arg11[%c8, %c0_33] : memref<14x224xf32, #tpu.memory_space<vmem>>, vector<1x224xf32>
    tpu.vector_store %arg11[%c8, %c0_33], %62 {strides = array<i32>} : memref<14x224xf32, #tpu.memory_space<vmem>>, vector<1x224xf32>,
    %64 = vector.extract_strided_slice %27 {offsets = [18, 0], sizes = [1, 224], strides = [1, 1]} : vector<28x224xf32> to vector<1x224xf32>
    %65 = vector.extract_strided_slice %27 {offsets = [19, 0], sizes = [1, 224], strides = [1, 1]} : vector<28x224xf32> to vector<1x224xf32>
    %66 = arith.maximumf %64, %65 : vector<1x224xf32>
    %c9 = arith.constant 9 : index
    %c0_34 = arith.constant 0 : index
    %67 = vector.load %arg11[%c9, %c0_34] : memref<14x224xf32, #tpu.memory_space<vmem>>, vector<1x224xf32>
    tpu.vector_store %arg11[%c9, %c0_34], %66 {strides = array<i32>} : memref<14x224xf32, #tpu.memory_space<vmem>>, vector<1x224xf32>,
    %68 = vector.extract_strided_slice %27 {offsets = [20, 0], sizes = [1, 224], strides = [1, 1]} : vector<28x224xf32> to vector<1x224xf32>
    %69 = vector.extract_strided_slice %27 {offsets = [21, 0], sizes = [1, 224], strides = [1, 1]} : vector<28x224xf32> to vector<1x224xf32>
    %70 = arith.maximumf %68, %69 : vector<1x224xf32>
    %c10 = arith.constant 10 : index
    %c0_35 = arith.constant 0 : index
    %71 = vector.load %arg11[%c10, %c0_35] : memref<14x224xf32, #tpu.memory_space<vmem>>, vector<1x224xf32>
    tpu.vector_store %arg11[%c10, %c0_35], %70 {strides = array<i32>} : memref<14x224xf32, #tpu.memory_space<vmem>>, vector<1x224xf32>,
    %72 = vector.extract_strided_slice %27 {offsets = [22, 0], sizes = [1, 224], strides = [1, 1]} : vector<28x224xf32> to vector<1x224xf32>
    %73 = vector.extract_strided_slice %27 {offsets = [23, 0], sizes = [1, 224], strides = [1, 1]} : vector<28x224xf32> to vector<1x224xf32>
    %74 = arith.maximumf %72, %73 : vector<1x224xf32>
    %c11 = arith.constant 11 : index
    %c0_36 = arith.constant 0 : index
    %75 = vector.load %arg11[%c11, %c0_36] : memref<14x224xf32, #tpu.memory_space<vmem>>, vector<1x224xf32>
    tpu.vector_store %arg11[%c11, %c0_36], %74 {strides = array<i32>} : memref<14x224xf32, #tpu.memory_space<vmem>>, vector<1x224xf32>,
    %76 = vector.extract_strided_slice %27 {offsets = [24, 0], sizes = [1, 224], strides = [1, 1]} : vector<28x224xf32> to vector<1x224xf32>
    %77 = vector.extract_strided_slice %27 {offsets = [25, 0], sizes = [1, 224], strides = [1, 1]} : vector<28x224xf32> to vector<1x224xf32>
    %78 = arith.maximumf %76, %77 : vector<1x224xf32>
    %c12 = arith.constant 12 : index
    %c0_37 = arith.constant 0 : index
    %79 = vector.load %arg11[%c12, %c0_37] : memref<14x224xf32, #tpu.memory_space<vmem>>, vector<1x224xf32>
    tpu.vector_store %arg11[%c12, %c0_37], %78 {strides = array<i32>} : memref<14x224xf32, #tpu.memory_space<vmem>>, vector<1x224xf32>,
    %80 = vector.extract_strided_slice %27 {offsets = [26, 0], sizes = [1, 224], strides = [1, 1]} : vector<28x224xf32> to vector<1x224xf32>
    %81 = vector.extract_strided_slice %27 {offsets = [27, 0], sizes = [1, 224], strides = [1, 1]} : vector<28x224xf32> to vector<1x224xf32>
    %82 = arith.maximumf %80, %81 : vector<1x224xf32>
    %c13 = arith.constant 13 : index
    %c0_38 = arith.constant 0 : index
    %83 = vector.load %arg11[%c13, %c0_38] : memref<14x224xf32, #tpu.memory_space<vmem>>, vector<1x224xf32>
    tpu.vector_store %arg11[%c13, %c0_38], %82 {strides = array<i32>} : memref<14x224xf32, #tpu.memory_space<vmem>>, vector<1x224xf32>,
    %c0_39 = arith.constant 0 : index
    %c0_40 = arith.constant 0 : index
    %84 = vector.load %arg11[%c0_39, %c0_40] : memref<14x224xf32, #tpu.memory_space<vmem>>, vector<12x224xf32>
    %c0_41 = arith.constant 0 : index
    %c0_42 = arith.constant 0 : index
    %c0_43 = arith.constant 0 : index
    %85 = vector.load %arg5[%c0_41, %c0_42, %c0_43] : memref<3x224x384xf32, #tpu.memory_space<vmem>>, vector<1x224x384xf32>
    %86 = vector.shape_cast %85 : vector<1x224x384xf32> to vector<224x384xf32>
    %cst_44 = arith.constant dense<0.000000e+00> : vector<12x384xf32>
    %87 = tpu.matmul %84, %86, %cst_44 {dimension_numbers = #tpu.dot_dimension_numbers<[1], [0], [0], [1], [0, 0, 1, 1], [], []>} : vector<12x224xf32>, vector<224x384xf32>, vector<12x384xf32> -> vector<12x384xf32>
    %c1_45 = arith.constant 1 : index
    %c0_46 = arith.constant 0 : index
    %88 = vector.load %arg11[%c1_45, %c0_46] : memref<14x224xf32, #tpu.memory_space<vmem>>, vector<12x224xf32>
    %c1_47 = arith.constant 1 : index
    %c0_48 = arith.constant 0 : index
    %c0_49 = arith.constant 0 : index
    %89 = vector.load %arg5[%c1_47, %c0_48, %c0_49] : memref<3x224x384xf32, #tpu.memory_space<vmem>>, vector<1x224x384xf32>
    %90 = vector.shape_cast %89 : vector<1x224x384xf32> to vector<224x384xf32>
    %cst_50 = arith.constant dense<0.000000e+00> : vector<12x384xf32>
    %91 = tpu.matmul %88, %90, %cst_50 {dimension_numbers = #tpu.dot_dimension_numbers<[1], [0], [0], [1], [0, 0, 1, 1], [], []>} : vector<12x224xf32>, vector<224x384xf32>, vector<12x384xf32> -> vector<12x384xf32>
    %92 = arith.addf %87, %91 : vector<12x384xf32>
    %c2_51 = arith.constant 2 : index
    %c0_52 = arith.constant 0 : index
    %93 = vector.load %arg11[%c2_51, %c0_52] : memref<14x224xf32, #tpu.memory_space<vmem>>, vector<12x224xf32>
    %c2_53 = arith.constant 2 : index
    %c0_54 = arith.constant 0 : index
    %c0_55 = arith.constant 0 : index
    %94 = vector.load %arg5[%c2_53, %c0_54, %c0_55] : memref<3x224x384xf32, #tpu.memory_space<vmem>>, vector<1x224x384xf32>
    %95 = vector.shape_cast %94 : vector<1x224x384xf32> to vector<224x384xf32>
    %cst_56 = arith.constant dense<0.000000e+00> : vector<12x384xf32>
    %96 = tpu.matmul %93, %95, %cst_56 {dimension_numbers = #tpu.dot_dimension_numbers<[1], [0], [0], [1], [0, 0, 1, 1], [], []>} : vector<12x224xf32>, vector<224x384xf32>, vector<12x384xf32> -> vector<12x384xf32>
    %97 = arith.addf %92, %96 : vector<12x384xf32>
    %c0_57 = arith.constant 0 : index
    %c0_58 = arith.constant 0 : index
    %98 = vector.load %arg6[%c0_57, %c0_58] : memref<1x384xf32, #tpu.memory_space<vmem>>, vector<1x384xf32>
    %99 = vector.broadcast %98 : vector<1x384xf32> to vector<12x384xf32>
    %100 = arith.addf %97, %99 : vector<12x384xf32>
    %cst_59 = arith.constant 0.000000e+00 : f32
    %101 = vector.broadcast %cst_59 : f32 to vector<12x384xf32>
    %102 = arith.maximumf %100, %101 : vector<12x384xf32>
    %c0_60 = arith.constant 0 : index
    %c0_61 = arith.constant 0 : index
    %c0_62 = arith.constant 0 : index
    %103 = vector.load %arg7[%c0_60, %c0_61, %c0_62] : memref<2x384x192xf32, #tpu.memory_space<vmem>>, vector<1x384x192xf32>
    %104 = vector.shape_cast %103 : vector<1x384x192xf32> to vector<384x192xf32>
    %cst_63 = arith.constant dense<0.000000e+00> : vector<12x192xf32>
    %105 = tpu.matmul %102, %104, %cst_63 {dimension_numbers = #tpu.dot_dimension_numbers<[1], [0], [0], [1], [0, 0, 1, 1], [], []>} : vector<12x384xf32>, vector<384x192xf32>, vector<12x192xf32> -> vector<12x192xf32>
    %c1_64 = arith.constant 1 : index
    %c0_65 = arith.constant 0 : index
    %c0_66 = arith.constant 0 : index
    %106 = vector.load %arg7[%c1_64, %c0_65, %c0_66] : memref<2x384x192xf32, #tpu.memory_space<vmem>>, vector<1x384x192xf32>
    %107 = vector.shape_cast %106 : vector<1x384x192xf32> to vector<384x192xf32>
    %cst_67 = arith.constant dense<0.000000e+00> : vector<12x192xf32>
    %108 = tpu.matmul %102, %107, %cst_67 {dimension_numbers = #tpu.dot_dimension_numbers<[1], [0], [0], [1], [0, 0, 1, 1], [], []>} : vector<12x384xf32>, vector<384x192xf32>, vector<12x192xf32> -> vector<12x192xf32>
    %109 = arith.maximumf %105, %108 : vector<12x192xf32>
    %110 = vector.extract_strided_slice %109 {offsets = [0, 0], sizes = [1, 192], strides = [1, 1]} : vector<12x192xf32> to vector<1x192xf32>
    %111 = vector.extract_strided_slice %109 {offsets = [1, 0], sizes = [1, 192], strides = [1, 1]} : vector<12x192xf32> to vector<1x192xf32>
    %112 = arith.maximumf %110, %111 : vector<1x192xf32>
    %c0_68 = arith.constant 0 : index
    %c0_69 = arith.constant 0 : index
    %113 = vector.load %arg12[%c0_68, %c0_69] : memref<6x192xf32, #tpu.memory_space<vmem>>, vector<1x192xf32>
    tpu.vector_store %arg12[%c0_68, %c0_69], %112 {strides = array<i32>} : memref<6x192xf32, #tpu.memory_space<vmem>>, vector<1x192xf32>,
    %114 = vector.extract_strided_slice %109 {offsets = [2, 0], sizes = [1, 192], strides = [1, 1]} : vector<12x192xf32> to vector<1x192xf32>
    %115 = vector.extract_strided_slice %109 {offsets = [3, 0], sizes = [1, 192], strides = [1, 1]} : vector<12x192xf32> to vector<1x192xf32>
    %116 = arith.maximumf %114, %115 : vector<1x192xf32>
    %c1_70 = arith.constant 1 : index
    %c0_71 = arith.constant 0 : index
    %117 = vector.load %arg12[%c1_70, %c0_71] : memref<6x192xf32, #tpu.memory_space<vmem>>, vector<1x192xf32>
    tpu.vector_store %arg12[%c1_70, %c0_71], %116 {strides = array<i32>} : memref<6x192xf32, #tpu.memory_space<vmem>>, vector<1x192xf32>,
    %118 = vector.extract_strided_slice %109 {offsets = [4, 0], sizes = [1, 192], strides = [1, 1]} : vector<12x192xf32> to vector<1x192xf32>
    %119 = vector.extract_strided_slice %109 {offsets = [5, 0], sizes = [1, 192], strides = [1, 1]} : vector<12x192xf32> to vector<1x192xf32>
    %120 = arith.maximumf %118, %119 : vector<1x192xf32>
    %c2_72 = arith.constant 2 : index
    %c0_73 = arith.constant 0 : index
    %121 = vector.load %arg12[%c2_72, %c0_73] : memref<6x192xf32, #tpu.memory_space<vmem>>, vector<1x192xf32>
    tpu.vector_store %arg12[%c2_72, %c0_73], %120 {strides = array<i32>} : memref<6x192xf32, #tpu.memory_space<vmem>>, vector<1x192xf32>,
    %122 = vector.extract_strided_slice %109 {offsets = [6, 0], sizes = [1, 192], strides = [1, 1]} : vector<12x192xf32> to vector<1x192xf32>
    %123 = vector.extract_strided_slice %109 {offsets = [7, 0], sizes = [1, 192], strides = [1, 1]} : vector<12x192xf32> to vector<1x192xf32>
    %124 = arith.maximumf %122, %123 : vector<1x192xf32>
    %c3_74 = arith.constant 3 : index
    %c0_75 = arith.constant 0 : index
    %125 = vector.load %arg12[%c3_74, %c0_75] : memref<6x192xf32, #tpu.memory_space<vmem>>, vector<1x192xf32>
    tpu.vector_store %arg12[%c3_74, %c0_75], %124 {strides = array<i32>} : memref<6x192xf32, #tpu.memory_space<vmem>>, vector<1x192xf32>,
    %126 = vector.extract_strided_slice %109 {offsets = [8, 0], sizes = [1, 192], strides = [1, 1]} : vector<12x192xf32> to vector<1x192xf32>
    %127 = vector.extract_strided_slice %109 {offsets = [9, 0], sizes = [1, 192], strides = [1, 1]} : vector<12x192xf32> to vector<1x192xf32>
    %128 = arith.maximumf %126, %127 : vector<1x192xf32>
    %c4_76 = arith.constant 4 : index
    %c0_77 = arith.constant 0 : index
    %129 = vector.load %arg12[%c4_76, %c0_77] : memref<6x192xf32, #tpu.memory_space<vmem>>, vector<1x192xf32>
    tpu.vector_store %arg12[%c4_76, %c0_77], %128 {strides = array<i32>} : memref<6x192xf32, #tpu.memory_space<vmem>>, vector<1x192xf32>,
    %130 = vector.extract_strided_slice %109 {offsets = [10, 0], sizes = [1, 192], strides = [1, 1]} : vector<12x192xf32> to vector<1x192xf32>
    %131 = vector.extract_strided_slice %109 {offsets = [11, 0], sizes = [1, 192], strides = [1, 1]} : vector<12x192xf32> to vector<1x192xf32>
    %132 = arith.maximumf %130, %131 : vector<1x192xf32>
    %c5_78 = arith.constant 5 : index
    %c0_79 = arith.constant 0 : index
    %133 = vector.load %arg12[%c5_78, %c0_79] : memref<6x192xf32, #tpu.memory_space<vmem>>, vector<1x192xf32>
    tpu.vector_store %arg12[%c5_78, %c0_79], %132 {strides = array<i32>} : memref<6x192xf32, #tpu.memory_space<vmem>>, vector<1x192xf32>,
    %c0_80 = arith.constant 0 : index
    %c0_81 = arith.constant 0 : index
    %134 = vector.load %arg9[%c0_80, %c0_81] : memref<1x5xf32, #tpu.memory_space<vmem>>, vector<1x5xf32>
    %c0_82 = arith.constant 0 : index
    %c0_83 = arith.constant 0 : index
    %135 = vector.load %arg12[%c0_82, %c0_83] : memref<6x192xf32, #tpu.memory_space<vmem>>, vector<1x192xf32>
    %c0_84 = arith.constant 0 : index
    %c0_85 = arith.constant 0 : index
    %c0_86 = arith.constant 0 : index
    %136 = vector.load %arg8[%c0_84, %c0_85, %c0_86] : memref<6x192x5xf32, #tpu.memory_space<vmem>>, vector<1x192x5xf32>
    %137 = vector.shape_cast %136 : vector<1x192x5xf32> to vector<192x5xf32>
    %cst_87 = arith.constant dense<0.000000e+00> : vector<1x5xf32>
    %138 = tpu.matmul %135, %137, %cst_87 {dimension_numbers = #tpu.dot_dimension_numbers<[1], [0], [0], [1], [0, 0, 1, 1], [], []>} : vector<1x192xf32>, vector<192x5xf32>, vector<1x5xf32> -> vector<1x5xf32>
    %139 = arith.addf %134, %138 : vector<1x5xf32>
    %c1_88 = arith.constant 1 : index
    %c0_89 = arith.constant 0 : index
    %140 = vector.load %arg12[%c1_88, %c0_89] : memref<6x192xf32, #tpu.memory_space<vmem>>, vector<1x192xf32>
    %c1_90 = arith.constant 1 : index
    %c0_91 = arith.constant 0 : index
    %c0_92 = arith.constant 0 : index
    %141 = vector.load %arg8[%c1_90, %c0_91, %c0_92] : memref<6x192x5xf32, #tpu.memory_space<vmem>>, vector<1x192x5xf32>
    %142 = vector.shape_cast %141 : vector<1x192x5xf32> to vector<192x5xf32>
    %cst_93 = arith.constant dense<0.000000e+00> : vector<1x5xf32>
    %143 = tpu.matmul %140, %142, %cst_93 {dimension_numbers = #tpu.dot_dimension_numbers<[1], [0], [0], [1], [0, 0, 1, 1], [], []>} : vector<1x192xf32>, vector<192x5xf32>, vector<1x5xf32> -> vector<1x5xf32>
    %144 = arith.addf %139, %143 : vector<1x5xf32>
    %c2_94 = arith.constant 2 : index
    %c0_95 = arith.constant 0 : index
    %145 = vector.load %arg12[%c2_94, %c0_95] : memref<6x192xf32, #tpu.memory_space<vmem>>, vector<1x192xf32>
    %c2_96 = arith.constant 2 : index
    %c0_97 = arith.constant 0 : index
    %c0_98 = arith.constant 0 : index
    %146 = vector.load %arg8[%c2_96, %c0_97, %c0_98] : memref<6x192x5xf32, #tpu.memory_space<vmem>>, vector<1x192x5xf32>
    %147 = vector.shape_cast %146 : vector<1x192x5xf32> to vector<192x5xf32>
    %cst_99 = arith.constant dense<0.000000e+00> : vector<1x5xf32>
    %148 = tpu.matmul %145, %147, %cst_99 {dimension_numbers = #tpu.dot_dimension_numbers<[1], [0], [0], [1], [0, 0, 1, 1], [], []>} : vector<1x192xf32>, vector<192x5xf32>, vector<1x5xf32> -> vector<1x5xf32>
    %149 = arith.addf %144, %148 : vector<1x5xf32>
    %c3_100 = arith.constant 3 : index
    %c0_101 = arith.constant 0 : index
    %150 = vector.load %arg12[%c3_100, %c0_101] : memref<6x192xf32, #tpu.memory_space<vmem>>, vector<1x192xf32>
    %c3_102 = arith.constant 3 : index
    %c0_103 = arith.constant 0 : index
    %c0_104 = arith.constant 0 : index
    %151 = vector.load %arg8[%c3_102, %c0_103, %c0_104] : memref<6x192x5xf32, #tpu.memory_space<vmem>>, vector<1x192x5xf32>
    %152 = vector.shape_cast %151 : vector<1x192x5xf32> to vector<192x5xf32>
    %cst_105 = arith.constant dense<0.000000e+00> : vector<1x5xf32>
    %153 = tpu.matmul %150, %152, %cst_105 {dimension_numbers = #tpu.dot_dimension_numbers<[1], [0], [0], [1], [0, 0, 1, 1], [], []>} : vector<1x192xf32>, vector<192x5xf32>, vector<1x5xf32> -> vector<1x5xf32>
    %154 = arith.addf %149, %153 : vector<1x5xf32>
    %c4_106 = arith.constant 4 : index
    %c0_107 = arith.constant 0 : index
    %155 = vector.load %arg12[%c4_106, %c0_107] : memref<6x192xf32, #tpu.memory_space<vmem>>, vector<1x192xf32>
    %c4_108 = arith.constant 4 : index
    %c0_109 = arith.constant 0 : index
    %c0_110 = arith.constant 0 : index
    %156 = vector.load %arg8[%c4_108, %c0_109, %c0_110] : memref<6x192x5xf32, #tpu.memory_space<vmem>>, vector<1x192x5xf32>
    %157 = vector.shape_cast %156 : vector<1x192x5xf32> to vector<192x5xf32>
    %cst_111 = arith.constant dense<0.000000e+00> : vector<1x5xf32>
    %158 = tpu.matmul %155, %157, %cst_111 {dimension_numbers = #tpu.dot_dimension_numbers<[1], [0], [0], [1], [0, 0, 1, 1], [], []>} : vector<1x192xf32>, vector<192x5xf32>, vector<1x5xf32> -> vector<1x5xf32>
    %159 = arith.addf %154, %158 : vector<1x5xf32>
    %c5_112 = arith.constant 5 : index
    %c0_113 = arith.constant 0 : index
    %160 = vector.load %arg12[%c5_112, %c0_113] : memref<6x192xf32, #tpu.memory_space<vmem>>, vector<1x192xf32>
    %c5_114 = arith.constant 5 : index
    %c0_115 = arith.constant 0 : index
    %c0_116 = arith.constant 0 : index
    %161 = vector.load %arg8[%c5_114, %c0_115, %c0_116] : memref<6x192x5xf32, #tpu.memory_space<vmem>>, vector<1x192x5xf32>
    %162 = vector.shape_cast %161 : vector<1x192x5xf32> to vector<192x5xf32>
    %cst_117 = arith.constant dense<0.000000e+00> : vector<1x5xf32>
    %163 = tpu.matmul %160, %162, %cst_117 {dimension_numbers = #tpu.dot_dimension_numbers<[1], [0], [0], [1], [0, 0, 1, 1], [], []>} : vector<1x192xf32>, vector<192x5xf32>, vector<1x5xf32> -> vector<1x5xf32>
    %164 = arith.addf %159, %163 : vector<1x5xf32>
    %c0_118 = arith.constant 0 : index
    %c0_119 = arith.constant 0 : index
    %c0_120 = arith.constant 0 : index
    %165 = vector.load %arg10[%c0_118, %c0_119, %c0_120] : memref<1x1x5xf32, #tpu.memory_space<vmem>>, vector<1x1x5xf32>
    %166 = vector.shape_cast %165 : vector<1x1x5xf32> to vector<1x5xf32>
    %167 = vector.shape_cast %164 : vector<1x5xf32> to vector<1x1x5xf32>
    tpu.vector_store %arg10[%c0_118, %c0_119, %c0_120], %167 {strides = array<i32>} : memref<1x1x5xf32, #tpu.memory_space<vmem>>, vector<1x1x5xf32>,
    return
  }
  func.func @transform_0(%arg0: i32) -> (i32, i32, i32) {
    %c0_i32 = arith.constant 0 : i32
    %c0_i32_0 = arith.constant 0 : i32
    %c0_i32_1 = arith.constant 0 : i32
    return %arg0, %c0_i32, %c0_i32_0 : i32, i32, i32
  }
  func.func @transform_1(%arg0: i32) -> (i32, i32, i32) {
    %c0_i32 = arith.constant 0 : i32
    %c0_i32_0 = arith.constant 0 : i32
    %c0_i32_1 = arith.constant 0 : i32
    %c0_i32_2 = arith.constant 0 : i32
    return %c0_i32, %c0_i32_0, %c0_i32_1 : i32, i32, i32
  }
  func.func @transform_2(%arg0: i32) -> (i32, i32) {
    %c0_i32 = arith.constant 0 : i32
    %c0_i32_0 = arith.constant 0 : i32
    %c0_i32_1 = arith.constant 0 : i32
    return %c0_i32, %c0_i32_0 : i32, i32
  }
  func.func @transform_3(%arg0: i32) -> (i32, i32, i32) {
    %c0_i32 = arith.constant 0 : i32
    %c0_i32_0 = arith.constant 0 : i32
    %c0_i32_1 = arith.constant 0 : i32
    %c0_i32_2 = arith.constant 0 : i32
    return %c0_i32, %c0_i32_0, %c0_i32_1 : i32, i32, i32
  }
  func.func @transform_4(%arg0: i32) -> (i32, i32, i32) {
    %c0_i32 = arith.constant 0 : i32
    %c0_i32_0 = arith.constant 0 : i32
    %c0_i32_1 = arith.constant 0 : i32
    %c0_i32_2 = arith.constant 0 : i32
    return %c0_i32, %c0_i32_0, %c0_i32_1 : i32, i32, i32
  }
  func.func @transform_5(%arg0: i32) -> (i32, i32) {
    %c0_i32 = arith.constant 0 : i32
    %c0_i32_0 = arith.constant 0 : i32
    %c0_i32_1 = arith.constant 0 : i32
    return %c0_i32, %c0_i32_0 : i32, i32
  }
  func.func @transform_6(%arg0: i32) -> (i32, i32, i32) {
    %c0_i32 = arith.constant 0 : i32
    %c0_i32_0 = arith.constant 0 : i32
    %c0_i32_1 = arith.constant 0 : i32
    %c0_i32_2 = arith.constant 0 : i32
    return %c0_i32, %c0_i32_0, %c0_i32_1 : i32, i32, i32
  }
  func.func @transform_7(%arg0: i32) -> (i32, i32, i32) {
    %c0_i32 = arith.constant 0 : i32
    %c0_i32_0 = arith.constant 0 : i32
    %c0_i32_1 = arith.constant 0 : i32
    %c0_i32_2 = arith.constant 0 : i32
    return %c0_i32, %c0_i32_0, %c0_i32_1 : i32, i32, i32
  }
  func.func @transform_8(%arg0: i32) -> (i32, i32) {
    %c0_i32 = arith.constant 0 : i32
    %c0_i32_0 = arith.constant 0 : i32
    %c0_i32_1 = arith.constant 0 : i32
    return %c0_i32, %c0_i32_0 : i32, i32
  }
  func.func @transform_9(%arg0: i32) -> (i32, i32, i32) {
    %c0_i32 = arith.constant 0 : i32
    %c0_i32_0 = arith.constant 0 : i32
    %c0_i32_1 = arith.constant 0 : i32
    return %arg0, %c0_i32, %c0_i32_0 : i32, i32, i32
  }
}

</mosaic_0001>

<bundles_post_ra>
// kernel: tpu_custom_call.1
= control target key start
LH: loop header
LB: loop body
LE: loop exit
PB: predicated region body
PF: predicated region fallthrough
CT: control target
= control target key end

     0   :  { %s7072_s0 = inlined_call_operand.vmem [shape: f32[2,30,90], index: 0, kind: input, shape index: {}]   ;;  %s7073_s1 = inlined_call_operand.hbm [shape: f32[3,90,448], index: 1, kind: input, shape index: {}]   ;;  %s7074_s2 = inlined_call_operand.vmem [shape: f32[1,448], index: 2, kind: input, shape index: {}]   ;;  %s7075_s3 = inlined_call_operand.hbm [shape: f32[2,448,224], index: 3, kind: input, shape index: {}]   ;;  %s7076_s4 = inlined_call_operand.vmem [shape: f32[3,224,384], index: 4, kind: input, shape index: {}]   ;;  %s7077_s5 = inlined_call_operand.vmem [shape: f32[1,384], index: 5, kind: input, shape index: {}]   ;;  %s7078_s6 = inlined_call_operand.vmem [shape: f32[2,384,192], index: 6, kind: input, shape index: {}]   ;;  %s7079_s7 = inlined_call_operand.vmem [shape: f32[6,192,5], index: 7, kind: input, shape index: {}]   ;;  %s7080_s8 = inlined_call_operand.vmem [shape: f32[1,5], index: 8, kind: input, shape index: {}]   ;;  %s7081_s9 = inlined_call_operand.hbm [shape: f32[2,1,5], index: 9, kind: output, shape index: {}]  }
   0x1   :  { %7082 = sst [smem:[#allocation13_spill]] %s7073_s1 }
   0x2   :  { %14 = vsyncpa [#allocation5], 0 }
   0x3   :  { %15 = vsyncpa [#allocation8], 0 }
   0x4   :  { %16 = vsyncpa [#allocation6], 0 }
   0x5   :  { %18 = vsyncpa [#allocation6 + $0x1], 0  ;;  %s4422_s30 = smov 0   ;;  %s4424_s10 = smov 0  }
   0x6   :  { %s4426_s11 = smov 0   ;;  %s4428_s12 = smov 0  }
   0x7 LB: > { %s4443_s13 = sadd.s32 4294967295, %s4364_s12   ;;  %s3673_s14 = sadd.s32 4294967294, %s4364_s12   ;;  %s4364_s12 = sphi %s4428_s12, %s7094_s12   ;;  %s4360_s11 = sphi %s4426_s11, %s7093_s11   ;;  %s4356_s10 = sphi %s4424_s10, %s7092_s10   ;;  %s4352_s30 = sphi %s4422_s30, %s7091_s30  }
   0x8   : > { %s4447_s15 = sadd.s32 1, %s4364_s12   ;;  %s225_s16 = sadd.s32 1, %s4360_s11 }
   0x9   : > { %s222_s17 = ssub.s32 %s4364_s12, %s4447_s15  ;;  %p235_p0 = scmp.ne.s32.totalorder %s4360_s11, %s4356_s10 }
   0xa   : > { %p223_p1 = scmp.eq.s32.totalorder %s222_s17, 0  ;;  %p236_p2 = scmp.eq.s32.totalorder %s4443_s13, 1 }
   0xb   : > { %p241_p3 = scmp.ne.s32.totalorder %s4356_s10, %s4352_s30  ;;  %p242_p4 = scmp.eq.s32.totalorder %s3673_s14, 1 }
   0xc   : > { %s4458_s18 = scalar_select %p223_p1, %s4360_s11, %s225_s16  }
   0xd   : > { %p4460_p5 = por %p236_p2, %p235_p0  ;;  %p4464_p6 = por %p242_p4, %p241_p3 }
   0xe   : > { %p3674_p7 = scmp.ge.s32.totalorder %s4364_s12, 1  ;;  %p249_p8 = scmp.lt.s32.totalorder %s4364_s12, 3 }
   0xf   : > { %p4191_p9 = scmp.eq.s32.totalorder %s4443_s13, 0  ;;  %s7086_s1 = sld [smem:[#allocation13_spill]] }
  0x10   : > { %p4471_p10 = pnand %p3674_p7, %p249_p8  ;;  %s4366_s25 = smov [#allocation4]  }
  0x11   : > { %s262_s26 = sshll.u32 %s4366_s25, 4  ;;  %s277_s29 = sshll.u32 %s7075_s3, 4  ;;  %s263_s26 = int_to_ptr.vmem [resolvable:$true] %s262_s26  ;;  %s278_s29 = int_to_ptr.hbm [resolvable:$true] %s277_s29 }
  0x12   : > { %p4180_p11 = pneg %p4471_p10  ;;  %s4367_s14 = smov 512  }
  0x13   : > { %s4368_s16 = smov 32   ;;  %s4369_s17 = smov [#allocation7]  }
  0x14   : > { %p4181_p12 = pnand %p4191_p9, %p4180_p11  ;;  %s279_s22 = sshll.u32 %s4369_s17, 4  ;;  %s280_s22 = int_to_ptr.vmem [resolvable:$true] %s279_s22 }
  0x15   : > { %s260_s24 = sshll.u32 %s7086_s1, 4  ;;  %s4370_s23 = smov 256   ;;  %s261_s24 = int_to_ptr.hbm [resolvable:$true] %s260_s24 }
  0x16   : > { %4183 = dma.hbm_to_vmem [thread:$0]  (!%p4181_p12), %s261_s24, 18432, %s263_s26, [#allocation5], %s4367_s14, %s4367_s14, %s4368_s16  }
  0x17   : > { %s4371_s1 = smov 16   ;;  %318 = sbr.rel (%p4471_p10) target bundleno = 1188 (0x4a4), region = 56 }
  0x18   : > { %4186 = dma.hbm_to_vmem [thread:$0]  (!%p4181_p12), %s278_s29, 28672, %s280_s22, [#allocation8], %s4370_s23, %s4370_s23, %s4371_s1  }
  0x1c   : > { %4339 = dma.done.wait (%p4191_p9), [#allocation5], 18432  }
  0x1d   : > { %4341 = vsyncadd (%p4191_p9), [#allocation5], 4294948864 }
  0x1e   : > { %4343 = dma.done.wait (%p4191_p9), [#allocation8], 28672  }
  0x1f   : > { %4345 = vsyncadd (%p4191_p9), [#allocation8], 4294938624  ;;  %vm486_vm0 = vcmask 1041408   ;;  %v461_v0 = vld [vmem:[#allocation4 + $0x2e0] sm:$0x3]  ;;  %v458_v5 = vld [vmem:[#allocation4 + $0x2c8] sm:$0xff]  ;;  %s3592_s29 = scalar_lea.hbm %s7081_s9, %s4443_s13 }
  0x20   : > { %v462_v1 = vld [vmem:[#allocation4 + $0x2e8] sm:$0x3]  ;;  %v463_v2 = vld [vmem:[#allocation4 + $0x2f0] sm:$0x3]  ;;  %3683 = vmatpush.msk.msra.mxu0 %vm486_vm0, %v461_v0  ;;  %v464_v3 = vld [vmem:[#allocation4 + $0x2f8] sm:$0x3] }
  0x21   : > { %3688 = vmatpush.msk.msra.mxu1 %vm486_vm0, %v462_v1  ;;  %v457_v4 = vld [vmem:[#allocation4 + $0x2c0] sm:$0xff]  ;;  %3693 = vmatpush.msk.msra.mxu2 %vm486_vm0, %v463_v2  ;;  %v459_v6 = vld [vmem:[#allocation4 + $0x2d0] sm:$0xff]  ;;  %v460_v7 = vld [vmem:[#allocation4 + $0x2d8] sm:$0xff]  ;;  %p359_p13 = scmp.lt.s32.totalorder %s4443_s13, 1  ;;  %vm469_vm1 = vcmask 1046528   ;;  %vm477_vm2 = vcmask 736256  }
  0x22   : > { %3698 = vmatpush.msk.msra.mxu3 %vm486_vm0, %v464_v3  ;;  %v453_v8 = vld [vmem:[#allocation4 + $0x2a0] sm:$0xff]  ;;  %504 = vmatpush.msra.mxu0 %v457_v4  ;;  %v454_v9 = vld [vmem:[#allocation4 + $0x2a8] sm:$0xff]  ;;  %v455_v10 = vld [vmem:[#allocation4 + $0x2b0] sm:$0xff]  ;;  %vm800_vm3 = vcmask 1045504   ;;  %vm1114_vm4 = vcmask 523264   ;;  %vm1723_vm5 = vcmask 1040384  }
  0x23   : > { %533 = vmatpush.msra.mxu1 %v458_v5  ;;  %v456_v11 = vld [vmem:[#allocation4 + $0x2b8] sm:$0xff]  ;;  %562 = vmatpush.msra.mxu2 %v459_v6  ;;  %v449_v12 = vld [vmem:[#allocation4 + $0x280] sm:$0xff]  ;;  %v450_v13 = vld [vmem:[#allocation4 + $0x288] sm:$0xff]  ;;  %s4503_s1 = scalar_select %p359_p13, %s4443_s13, 1  ;;  %vm2049_vm7 = vcmask 785408   ;;  %vm3581_vm9 = vcmask 32768  }
  0x24   : > { %591 = vmatpush.msra.mxu3 %v460_v7  ;;  %505 = vmatpush.msra.mxu0 %v453_v8  ;;  %v451_v14 = vld [vmem:[#allocation4 + $0x290] sm:$0xff]  ;;  %v452_v15 = vld [vmem:[#allocation4 + $0x298] sm:$0xff]  ;;  %v445_v16 = vld [vmem:[#allocation4 + $0x260] sm:$0xff]  ;;  %s3596_s17 = sshll.u32 %s3592_s29, 4  ;;  %s4314_s24 = scalar_lea.hbm %s7081_s9, 2  ;;  %s3597_s17 = int_to_ptr.hbm [resolvable:$true] %s3596_s17 }
  0x25   : > { %534 = vmatpush.msra.mxu1 %v454_v9  ;;  %563 = vmatpush.msra.mxu2 %v455_v10  ;;  %v446_v17 = vld [vmem:[#allocation4 + $0x268] sm:$0xff]  ;;  %v447_v18 = vld [vmem:[#allocation4 + $0x270] sm:$0xff]  ;;  %v448_v19 = vld [vmem:[#allocation4 + $0x278] sm:$0xff]  ;;  %s4169_s21 = sshll.u32 %s4503_s1, 5  ;;  %s4308_s23 = sshra.s32 %s3597_s17, 4  ;;  %s4309_s23 = int_to_ptr.hbm [resolvable:$true] %s4308_s23 }
  0x26   : > { %592 = vmatpush.msra.mxu3 %v456_v11  ;;  %506 = vmatpush.msra.mxu0 %v449_v12  ;;  %v441_v20 = vld [vmem:[#allocation4 + $0x240] sm:$0xff]  ;;  %v442_v21 = vld [vmem:[#allocation4 + $0x248] sm:$0xff]  ;;  %v443_v22 = vld [vmem:[#allocation4 + $0x250] sm:$0xff]  ;;  %s4509_s26 = scalar_lea.vmem %s7072_s0, %s4169_s21  ;;  %s4310_s13 = scalar_lea.hbm %s4309_s23, 1 }
  0x27   : > { %535 = vmatpush.msra.mxu1 %v450_v13  ;;  %564 = vmatpush.msra.mxu2 %v451_v14  ;;  %v444_v23 = vld [vmem:[#allocation4 + $0x258] sm:$0xff]  ;;  %v437_v24 = vld [vmem:[#allocation4 + $0x220] sm:$0xff]  ;;  %v438_v25 = vld [vmem:[#allocation4 + $0x228] sm:$0xff]  ;;  %p4311_p0 = scmp.ne.s32.totalorder %s4309_s23, %s4310_s13  ;;  %p4315_p3 = scmp.lt.s32.totalorder %s4309_s23, %s7081_s9 }
  0x28   : > { %593 = vmatpush.msra.mxu3 %v452_v15  ;;  %507 = vmatpush.msra.mxu0 %v445_v16  ;;  %v439_v26 = vld [vmem:[#allocation4 + $0x230] sm:$0xff]  ;;  %v440_v27 = vld [vmem:[#allocation4 + $0x238] sm:$0xff]  ;;  %v433_v28 = vld [vmem:[#allocation4 + $0x200] sm:$0xff]  ;;  %p4316_p4 = scmp.lt.s32.totalorder %s4314_s24, %s4310_s13 }
  0x29   : > { %536 = vmatpush.msra.mxu1 %v446_v17  ;;  %565 = vmatpush.msra.mxu2 %v447_v18  ;;  %v434_v29 = vld [vmem:[#allocation4 + $0x208] sm:$0xff]  ;;  %v435_v30 = vld [vmem:[#allocation4 + $0x210] sm:$0xff]  ;;  %v436_v31 = vld [vmem:[#allocation4 + $0x218] sm:$0xff]  ;;  %p4312_p1 = pnand %p4311_p0, %p4460_p5 }
  0x2a   : > { %594 = vmatpush.msra.mxu3 %v448_v19  ;;  %508 = vmatpush.msra.mxu0 %v441_v20  ;;  %v429_v32 = vld [vmem:[#allocation4 + $0x1e0] sm:$0xff]  ;;  %v430_v33 = vld [vmem:[#allocation4 + $0x1e8] sm:$0xff]  ;;  %v431_v34 = vld [vmem:[#allocation4 + $0x1f0] sm:$0xff]  ;;  %p4317_p7 = por %p4316_p4, %p4315_p3 }
  0x2b   : > { %537 = vmatpush.msra.mxu1 %v442_v21  ;;  %566 = vmatpush.msra.mxu2 %v443_v22  ;;  %v432_v35 = vld [vmem:[#allocation4 + $0x1f8] sm:$0xff]  ;;  %v425_v36 = vld [vmem:[#allocation4 + $0x1c0] sm:$0xff]  ;;  %v426_v37 = vld [vmem:[#allocation4 + $0x1c8] sm:$0xff]  ;;  %p4313_p2 = pneg %p4312_p1 }
  0x2c   : > { %595 = vmatpush.msra.mxu3 %v444_v23  ;;  %509 = vmatpush.msra.mxu0 %v437_v24  ;;  %v4512_v38 = vld [vmem:[%s4509_s26] sm:$0xff]  ;;  %v4515_v39 = vld [vmem:[%s4509_s26 + $0x8] sm:$0xff]  ;;  %v428_v41 = vld [vmem:[#allocation4 + $0x1d8] sm:$0xff] }
  0x2d   : > { %538 = vmatpush.msra.mxu1 %v438_v25  ;;  %567 = vmatpush.msra.mxu2 %v439_v26  ;;  %v427_v40 = vld [vmem:[#allocation4 + $0x1d0] sm:$0xff]  ;;  %v421_v42 = vld [vmem:[#allocation4 + $0x1a0] sm:$0xff]  ;;  %v422_v43 = vld [vmem:[#allocation4 + $0x1a8] sm:$0xff]  ;;  %v470_v44 = vrot.slane %v4512_v38, 1  ;;  %v471_v45 = vrot.slane %v4515_v39, 1  ;;  %p4318_p8 = pnand %p4317_p7, %p4313_p2 }
  0x2e   : > { %596 = vmatpush.msra.mxu3 %v440_v27  ;;  %510 = vmatpush.msra.mxu0 %v433_v28  ;;  %v423_v46 = vld [vmem:[#allocation4 + $0x1b0] sm:$0xff]  ;;  %v424_v47 = vld [vmem:[#allocation4 + $0x1b8] sm:$0xff]  ;;  %v417_v48 = vld [vmem:[#allocation4 + $0x180] sm:$0xff] }
  0x2f   : > { %539 = vmatpush.msra.mxu1 %v434_v29  ;;  %568 = vmatpush.msra.mxu2 %v435_v30  ;;  %v418_v49 = vld [vmem:[#allocation4 + $0x188] sm:$0xff]  ;;  %v419_v50 = vld [vmem:[#allocation4 + $0x190] sm:$0xff]  ;;  %v420_v51 = vld [vmem:[#allocation4 + $0x198] sm:$0xff]  ;;  %v472_v52 = vsel %vm469_vm1, %v470_v44, %v471_v45 }
  0x30   : > { %597 = vmatpush.msra.mxu3 %v436_v31  ;;  %511 = vmatpush.msra.mxu0 %v429_v32  ;;  %v4521_v53 = vld [vmem:[%s4509_s26 + $0x10] sm:$0xff]  ;;  %v412_v54 = vld [vmem:[#allocation4 + $0x160] sm:$0x3]  ;;  %v413_v55 = vld [vmem:[#allocation4 + $0x168] sm:$0x3] }
  0x31   : > { %540 = vmatpush.msra.mxu1 %v430_v33  ;;  %569 = vmatpush.msra.mxu2 %v431_v34  ;;  %v414_v56 = vld [vmem:[#allocation4 + $0x170] sm:$0x3]  ;;  %v415_v57 = vld [vmem:[#allocation4 + $0x178] sm:$0x3]  ;;  %v473_v58 = vrot.slane %v4521_v53, 1  ;;  %v408_v59 = vld [vmem:[#allocation4 + $0x140] sm:$0xff] }
  0x32   : > { %598 = vmatpush.msra.mxu3 %v432_v35  ;;  %512 = vmatpush.msra.mxu0 %v425_v36  ;;  %v409_v60 = vld [vmem:[#allocation4 + $0x148] sm:$0xff]  ;;  %v410_v61 = vld [vmem:[#allocation4 + $0x150] sm:$0xff]  ;;  %v411_v62 = vld [vmem:[#allocation4 + $0x158] sm:$0xff] }
  0x33   : > { %541 = vmatpush.msra.mxu1 %v426_v37  ;;  %570 = vmatpush.msra.mxu2 %v427_v40  ;;  %v404_v63 = vld [vmem:[#allocation4 + $0x120] sm:$0xff]  ;;  %v405_v0 = vld [vmem:[#allocation4 + $0x128] sm:$0xff]  ;;  %v406_v1 = vld [vmem:[#allocation4 + $0x130] sm:$0xff]  ;;  %v474_v3 = vsel %vm469_vm1, %v471_v45, %v473_v58  ;;  %v801_v45 = vrot.slane %v4512_v38, 2 }
  0x34   : > { %599 = vmatpush.msra.mxu3 %v428_v41  ;;  %513 = vmatpush.msra.mxu0 %v421_v42  ;;  %v407_v2 = vld [vmem:[#allocation4 + $0x138] sm:$0xff]  ;;  %v4534_v4 = vld [vmem:[%s4509_s26 + $0x18] sm:$0x3f]  ;;  %v401_v6 = vld [vmem:[#allocation4 + $0x108] sm:$0xff]  ;;  %s357_s26 = sand.u32 1, %s4356_s10  }
  0x35   : > { %542 = vmatpush.msra.mxu1 %v422_v43  ;;  %571 = vmatpush.msra.mxu2 %v423_v46  ;;  %v400_v5 = vld [vmem:[#allocation4 + $0x100] sm:$0xff]  ;;  %v402_v7 = vld [vmem:[#allocation4 + $0x110] sm:$0xff]  ;;  %v403_v8 = vld [vmem:[#allocation4 + $0x118] sm:$0xff]  ;;  %v475_v9 = vrot.slane %v4534_v4, 1  ;;  %v802_v46 = vrot.slane %v4515_v39, 2  ;;  %s358_s14 = scalar_lea.vmem [#allocation9], %s357_s26 }
  0x36   : > { %600 = vmatpush.msra.mxu3 %v424_v47  ;;  %514 = vmatpush.msra.mxu0 %v417_v48  ;;  %v396_v10 = vld [vmem:[#allocation4 + $0xe0] sm:$0xff]  ;;  %v397_v11 = vld [vmem:[#allocation4 + $0xe8] sm:$0xff]  ;;  %v398_v12 = vld [vmem:[#allocation4 + $0xf0] sm:$0xff]  ;;  %s3594_s16 = sshll.u32 %s358_s14, 4  ;;  %s3584_s22 = scalar_lea.sflag [#allocation6], %s357_s26  ;;  %s3595_s16 = int_to_ptr.vmem [resolvable:$true] %s3594_s16 }
  0x37   : > { %543 = vmatpush.msra.mxu1 %v418_v49  ;;  %572 = vmatpush.msra.mxu2 %v419_v50  ;;  %v399_v13 = vld [vmem:[#allocation4 + $0xf8] sm:$0xff]  ;;  %v392_v14 = vld [vmem:[#allocation4 + $0xc0] sm:$0xff]  ;;  %v393_v15 = vld [vmem:[#allocation4 + $0xc8] sm:$0xff]  ;;  %v476_v18 = vsel %vm469_vm1, %v473_v58, %v475_v9 }
  0x38   : > { %601 = vmatpush.msra.mxu3 %v420_v51  ;;  %3684 = vmatmul.msk.f32.vlgmr.msra.gmra.mxu0 %vm477_vm2, %v472_v52  ;;  %v394_v16 = vld [vmem:[#allocation4 + $0xd0] sm:$0xff]  ;;  %v395_v17 = vld [vmem:[#allocation4 + $0xd8] sm:$0xff]  ;;  %v388_v19 = vld [vmem:[#allocation4 + $0xa0] sm:$0xff]  ;;  %v4557_v51 = vsel %vm800_vm3, %v801_v45, %v802_v46 }
  0x39   : > { %3689 = vmatmul.msk.f32.vlgmr.msra.gmra.mxu1 %vm477_vm2, %v472_v52  ;;  %3694 = vmatmul.msk.f32.vlgmr.msra.gmra.mxu2 %vm477_vm2, %v472_v52  ;;  %v389_v20 = vld [vmem:[#allocation4 + $0xa8] sm:$0xff]  ;;  %v390_v21 = vld [vmem:[#allocation4 + $0xb0] sm:$0xff]  ;;  %v391_v22 = vld [vmem:[#allocation4 + $0xb8] sm:$0xff] }
  0x3a   : > { %3699 = vmatmul.msk.f32.vlgmr.msra.gmra.mxu3 %vm477_vm2, %v472_v52  ;;  %3703 = vmatpush.msk.msrb.mxu0 %vm486_vm0, %v412_v54  ;;  %v384_v23 = vld [vmem:[#allocation4 + $0x80] sm:$0xff]  ;;  %v385_v24 = vld [vmem:[#allocation4 + $0x88] sm:$0xff]  ;;  %v386_v25 = vld [vmem:[#allocation4 + $0x90] sm:$0xff] }
  0x3b   : > { %3708 = vmatpush.msk.msrb.mxu1 %vm486_vm0, %v413_v55  ;;  %3713 = vmatpush.msk.msrb.mxu2 %vm486_vm0, %v414_v56  ;;  %v387_v26 = vld [vmem:[#allocation4 + $0x98] sm:$0xff]  ;;  %v380_v27 = vld [vmem:[#allocation4 + $0x60] sm:$0xff]  ;;  %v381_v28 = vld [vmem:[#allocation4 + $0x68] sm:$0xff]  ;;  %v804_v55 = vrot.slane %v4521_v53, 2 }
  0x3c   : > { %3718 = vmatpush.msk.msrb.mxu3 %vm486_vm0, %v415_v57  ;;  %640 = vmatpush.msrb.mxu0 %v408_v59  ;;  %v382_v29 = vld [vmem:[#allocation4 + $0x70] sm:$0xff]  ;;  %v383_v30 = vld [vmem:[#allocation4 + $0x78] sm:$0xff]  ;;  %v376_v31 = vld [vmem:[#allocation4 + $0x40] sm:$0xff] }
  0x3d   : > { %669 = vmatpush.msrb.mxu1 %v409_v60  ;;  %698 = vmatpush.msrb.mxu2 %v410_v61  ;;  %v377_v32 = vld [vmem:[#allocation4 + $0x48] sm:$0xff]  ;;  %v378_v33 = vld [vmem:[#allocation4 + $0x50] sm:$0xff]  ;;  %v379_v34 = vld [vmem:[#allocation4 + $0x58] sm:$0xff]  ;;  %v4569_v60 = vsel %vm800_vm3, %v802_v46, %v804_v55 }
  0x3e   : > { %727 = vmatpush.msrb.mxu3 %v411_v62  ;;  %641 = vmatpush.msrb.mxu0 %v404_v63  ;;  %v372_v35 = vld [vmem:[#allocation4 + $0x20] sm:$0xff]  ;;  %v373_v36 = vld [vmem:[#allocation4 + $0x28] sm:$0xff]  ;;  %v374_v37 = vld [vmem:[#allocation4 + $0x30] sm:$0xff] }
  0x3f   : > { %670 = vmatpush.msrb.mxu1 %v405_v0  ;;  %699 = vmatpush.msrb.mxu2 %v406_v1  ;;  %v375_v40 = vld [vmem:[#allocation4 + $0x38] sm:$0xff]  ;;  %v368_v41 = vld [vmem:[#allocation4] sm:$0xff]  ;;  %v369_v42 = vld [vmem:[#allocation4 + $0x8] sm:$0xff] }
  0x40   : > { %728 = vmatpush.msrb.mxu3 %v407_v2  ;;  %3685 = vmatmul.msk.f32.gmra.mxu0 %vm477_vm2, %v474_v3  ;;  %v370_v43 = vld [vmem:[#allocation4 + $0x10] sm:$0xff]  ;;  %v371_v44 = vld [vmem:[#allocation4 + $0x18] sm:$0xff]  ;;  %v796_v47 = vld [vmem:[#allocation4 + $0x460] sm:$0x3] }
  0x41   : > { %3690 = vmatmul.msk.f32.gmra.mxu1 %vm477_vm2, %v474_v3  ;;  %3695 = vmatmul.msk.f32.gmra.mxu2 %vm477_vm2, %v474_v3  ;;  %v797_v48 = vld [vmem:[#allocation4 + $0x468] sm:$0x3]  ;;  %v798_v49 = vld [vmem:[#allocation4 + $0x470] sm:$0x3]  ;;  %v799_v50 = vld [vmem:[#allocation4 + $0x478] sm:$0x3] }
  0x42   : > { %3700 = vmatmul.msk.f32.gmra.mxu3 %vm477_vm2, %v474_v3  ;;  %642 = vmatpush.msrb.mxu0 %v400_v5  ;;  %v792_v52 = vld [vmem:[#allocation4 + $0x440] sm:$0xff]  ;;  %v793_v54 = vld [vmem:[#allocation4 + $0x448] sm:$0xff]  ;;  %v794_v56 = vld [vmem:[#allocation4 + $0x450] sm:$0xff]  ;;  %v4580_v5 = vrot.slane %v4534_v4, 2 }
  0x43   : > { %671 = vmatpush.msrb.mxu1 %v401_v6  ;;  %700 = vmatpush.msrb.mxu2 %v402_v7  ;;  %v795_v57 = vld [vmem:[#allocation4 + $0x458] sm:$0xff]  ;;  %v788_v58 = vld [vmem:[#allocation4 + $0x420] sm:$0xff]  ;;  %v789_v59 = vld [vmem:[#allocation4 + $0x428] sm:$0xff] }
  0x44   : > { %729 = vmatpush.msrb.mxu3 %v403_v8  ;;  %643 = vmatpush.msrb.mxu0 %v396_v10  ;;  %v791_v61 = vld [vmem:[#allocation4 + $0x438] sm:$0xff]  ;;  %v784_v62 = vld [vmem:[#allocation4 + $0x400] sm:$0xff]  ;;  %v785_v63 = vld [vmem:[#allocation4 + $0x408] sm:$0xff]  ;;  %v4584_v10 = vsel %vm800_vm3, %v804_v55, %v4580_v5 }
  0x45   : > { %672 = vmatpush.msrb.mxu1 %v397_v11  ;;  %701 = vmatpush.msrb.mxu2 %v398_v12  ;;  %v786_v0 = vld [vmem:[#allocation4 + $0x410] sm:$0xff]  ;;  %v787_v1 = vld [vmem:[#allocation4 + $0x418] sm:$0xff]  ;;  %v780_v2 = vld [vmem:[#allocation4 + $0x3e0] sm:$0xff] }
  0x46   : > { %730 = vmatpush.msrb.mxu3 %v399_v13  ;;  %644 = vmatpush.msrb.mxu0 %v392_v14  ;;  %v781_v3 = vld [vmem:[#allocation4 + $0x3e8] sm:$0xff]  ;;  %v782_v6 = vld [vmem:[#allocation4 + $0x3f0] sm:$0xff]  ;;  %v783_v7 = vld [vmem:[#allocation4 + $0x3f8] sm:$0xff] }
  0x47   : > { %673 = vmatpush.msrb.mxu1 %v393_v15  ;;  %702 = vmatpush.msrb.mxu2 %v394_v16  ;;  %v776_v8 = vld [vmem:[#allocation4 + $0x3c0] sm:$0xff]  ;;  %v779_v11 = vld [vmem:[#allocation4 + $0x3d8] sm:$0xff]  ;;  %v773_v13 = vld [vmem:[#allocation4 + $0x3a8] sm:$0xff] }
  0x48   : > { %731 = vmatpush.msrb.mxu3 %v395_v17  ;;  %3686 = vmatmul.msk.f32.gmra.mxu0 %vm477_vm2, %v476_v18  ;;  %v772_v12 = vld [vmem:[#allocation4 + $0x3a0] sm:$0xff]  ;;  %v774_v14 = vld [vmem:[#allocation4 + $0x3b0] sm:$0xff]  ;;  %v775_v15 = vld [vmem:[#allocation4 + $0x3b8] sm:$0xff] }
  0x49   : > { %3691 = vmatmul.msk.f32.gmra.mxu1 %vm477_vm2, %v476_v18  ;;  %3696 = vmatmul.msk.f32.gmra.mxu2 %vm477_vm2, %v476_v18  ;;  %v768_v16 = vld [vmem:[#allocation4 + $0x380] sm:$0xff]  ;;  %v769_v17 = vld [vmem:[#allocation4 + $0x388] sm:$0xff]  ;;  %v1028_v46 = vld [vmem:[#allocation7 + $0xd0] sm:$0xff] }
  0x4a   : > { %3701 = vmatmul.msk.f32.gmra.mxu3 %vm477_vm2, %v476_v18  ;;  %645 = vmatpush.msrb.mxu0 %v388_v19  ;;  %v770_v18 = vld [vmem:[#allocation4 + $0x390] sm:$0xff]  ;;  %v771_v19 = vld [vmem:[#allocation4 + $0x398] sm:$0xff]  ;;  %v1062_v45 = vld [vmem:[#allocation7 + $0x1e0] sm:$0xff] }
  0x4b   : > { %674 = vmatpush.msrb.mxu1 %v389_v20  ;;  %703 = vmatpush.msrb.mxu2 %v390_v21  ;;  %v764_v20 = vld [vmem:[#allocation4 + $0x360] sm:$0xff]  ;;  %v765_v21 = vld [vmem:[#allocation4 + $0x368] sm:$0xff] }
  0x4c   : > { %732 = vmatpush.msrb.mxu3 %v391_v22  ;;  %646 = vmatpush.msrb.mxu0 %v384_v23  ;;  %v766_v22 = vld [vmem:[#allocation4 + $0x370] sm:$0xff]  ;;  %v767_v23 = vld [vmem:[#allocation4 + $0x378] sm:$0xff] }
  0x4d   : > { %675 = vmatpush.msrb.mxu1 %v385_v24  ;;  %704 = vmatpush.msrb.mxu2 %v386_v25  ;;  %v761_v24 = vld [vmem:[#allocation4 + $0x348] sm:$0xff]  ;;  %v762_v25 = vld [vmem:[#allocation4 + $0x350] sm:$0xff] }
  0x4e   : > { %733 = vmatpush.msrb.mxu3 %v387_v26  ;;  %647 = vmatpush.msrb.mxu0 %v380_v27  ;;  %v763_v26 = vld [vmem:[#allocation4 + $0x358] sm:$0xff]  ;;  %v756_v27 = vld [vmem:[#allocation4 + $0x320] sm:$0xff] }
  0x4f   : > { %676 = vmatpush.msrb.mxu1 %v381_v28  ;;  %705 = vmatpush.msrb.mxu2 %v382_v29  ;;  %v757_v28 = vld [vmem:[#allocation4 + $0x328] sm:$0xff]  ;;  %v758_v29 = vld [vmem:[#allocation4 + $0x330] sm:$0xff] }
  0x50   : > { %734 = vmatpush.msrb.mxu3 %v383_v30  ;;  %3687 = vmatmul.msk.f32.gmra.mxu0 %vm477_vm2, %v475_v9  ;;  %v759_v30 = vld [vmem:[#allocation4 + $0x338] sm:$0xff] }
  0x51   : > { %3692 = vmatmul.msk.f32.gmra.mxu1 %vm477_vm2, %v475_v9  ;;  %3697 = vmatmul.msk.f32.gmra.mxu2 %vm477_vm2, %v475_v9 }
  0x52   : > { %3702 = vmatmul.msk.f32.gmra.mxu3 %vm477_vm2, %v475_v9  ;;  %648 = vmatpush.msrb.mxu0 %v376_v31  ;;  %v777_v9 = vld [vmem:[#allocation4 + $0x3c8] sm:$0xff]  ;;  %v752_v31 = vld [vmem:[#allocation4 + $0x300] sm:$0xff] }
  0x53   : > { %677 = vmatpush.msrb.mxu1 %v377_v32  ;;  %706 = vmatpush.msrb.mxu2 %v378_v33  ;;  %v753_v32 = vld [vmem:[#allocation4 + $0x308] sm:$0xff]  ;;  %v754_v33 = vld [vmem:[#allocation4 + $0x310] sm:$0xff] }
  0x54   : > { %735 = vmatpush.msrb.mxu3 %v379_v34  ;;  %649 = vmatpush.msrb.mxu0 %v372_v35  ;;  %v755_v34 = vld [vmem:[#allocation4 + $0x318] sm:$0xff] }
  0x55   : > { %678 = vmatpush.msrb.mxu1 %v373_v36  ;;  %707 = vmatpush.msrb.mxu2 %v374_v37 }
  0x56   : > { %736 = vmatpush.msrb.mxu3 %v375_v40  ;;  %650 = vmatpush.msrb.mxu0 %v368_v41 }
  0x57   : > { %679 = vmatpush.msrb.mxu1 %v369_v42  ;;  %708 = vmatpush.msrb.mxu2 %v370_v43  ;;  %v1032_v42 = vld [vmem:[#allocation7 + $0xf0] sm:$0xff] }
  0x58   : > { %737 = vmatpush.msrb.mxu3 %v371_v44  ;;  %3704 = vmatmul.msk.f32.vlgmr.msrb.gmra.mxu0 %vm477_vm2, %v4512_v38  ;;  %v1064_v43 = vld [vmem:[#allocation7 + $0x1f0] sm:$0xff]  ;;  %v1030_v44 = vld [vmem:[#allocation7 + $0xe0] sm:$0xff] }
  0x59   : > { %3709 = vmatmul.msk.f32.vlgmr.msrb.gmra.mxu1 %vm477_vm2, %v4512_v38  ;;  %3714 = vmatmul.msk.f32.vlgmr.msrb.gmra.mxu2 %vm477_vm2, %v4512_v38 }
  0x5a   : > { %3719 = vmatmul.msk.f32.vlgmr.msrb.gmra.mxu3 %vm477_vm2, %v4512_v38  ;;  %3723 = vmatpush.msk.msra.mxu0 %vm486_vm0, %v796_v47  ;;  %v790_v38 = vld [vmem:[#allocation4 + $0x430] sm:$0xff] }
  0x5b   : > { %3728 = vmatpush.msk.msra.mxu1 %vm486_vm0, %v797_v48  ;;  %3733 = vmatpush.msk.msra.mxu2 %vm486_vm0, %v798_v49  ;;  %v1060_v47 = vld [vmem:[#allocation7 + $0x1d0] sm:$0xff]  ;;  %v1026_v48 = vld [vmem:[#allocation7 + $0xc0] sm:$0xff] }
  0x5c   : > { %3738 = vmatpush.msk.msra.mxu3 %vm486_vm0, %v799_v50  ;;  %833 = vmatpush.msra.mxu0 %v792_v52  ;;  %v1058_v49 = vld [vmem:[#allocation7 + $0x1c0] sm:$0xff]  ;;  %v1096_v50 = vld [vmem:[#allocation7 + $0x2f0] sm:$0xff] }
  0x5d   : > { %862 = vmatpush.msra.mxu1 %v793_v54  ;;  %891 = vmatpush.msra.mxu2 %v794_v56  ;;  %v1024_v56 = vld [vmem:[#allocation7 + $0xb0] sm:$0xff] }
  0x5e   : > { %920 = vmatpush.msra.mxu3 %v795_v57  ;;  %834 = vmatpush.msra.mxu0 %v788_v58  ;;  %v1056_v57 = vld [vmem:[#allocation7 + $0x1b0] sm:$0xff]  ;;  %v1094_v58 = vld [vmem:[#allocation7 + $0x2e0] sm:$0xff] }
  0x5f   : > { %863 = vmatpush.msra.mxu1 %v789_v59  ;;  %892 = vmatpush.msra.mxu2 %v790_v38  ;;  %v1022_v59 = vld [vmem:[#allocation7 + $0xa0] sm:$0xff]  ;;  %v1092_v38 = vld [vmem:[#allocation7 + $0x2d0] sm:$0xff] }
  0x60   : > { %921 = vmatpush.msra.mxu3 %v791_v61  ;;  %3705 = vmatmul.msk.f32.gmra.mxu0 %vm477_vm2, %v4515_v39  ;;  %v1020_v61 = vld [vmem:[#allocation7 + $0x90] sm:$0xff] }
  0x61   : > { %3710 = vmatmul.msk.f32.gmra.mxu1 %vm477_vm2, %v4515_v39  ;;  %3715 = vmatmul.msk.f32.gmra.mxu2 %vm477_vm2, %v4515_v39 }
  0x62   : > { %3720 = vmatmul.msk.f32.gmra.mxu3 %vm477_vm2, %v4515_v39  ;;  %835 = vmatpush.msra.mxu0 %v784_v62  ;;  %v778_v39 = vld [vmem:[#allocation4 + $0x3d0] sm:$0xff] }
  0x63   : > { %864 = vmatpush.msra.mxu1 %v785_v63  ;;  %893 = vmatpush.msra.mxu2 %v786_v0  ;;  %v1052_v62 = vld [vmem:[#allocation7 + $0x190] sm:$0xff]  ;;  %v1090_v63 = vld [vmem:[#allocation7 + $0x2c0] sm:$0xff] }
  0x64   : > { %922 = vmatpush.msra.mxu3 %v787_v1  ;;  %836 = vmatpush.msra.mxu0 %v780_v2  ;;  %v1018_v0 = vld [vmem:[#allocation7 + $0x80] sm:$0xff]  ;;  %v1088_v2 = vld [vmem:[#allocation7 + $0x2b0] sm:$0xff] }
  0x65   : > { %865 = vmatpush.msra.mxu1 %v781_v3  ;;  %894 = vmatpush.msra.mxu2 %v782_v6  ;;  %v1050_v1 = vld [vmem:[#allocation7 + $0x180] sm:$0xff] }
  0x66   : > { %923 = vmatpush.msra.mxu3 %v783_v7  ;;  %837 = vmatpush.msra.mxu0 %v776_v8  ;;  %v1016_v8 = vld [vmem:[#allocation7 + $0x70] sm:$0xff] }
  0x67   : > { %866 = vmatpush.msra.mxu1 %v777_v9  ;;  %895 = vmatpush.msra.mxu2 %v778_v39  ;;  %v1048_v9 = vld [vmem:[#allocation7 + $0x170] sm:$0xff]  ;;  %v1014_v39 = vld [vmem:[#allocation7 + $0x60] sm:$0xff] }
  0x68   : > { %924 = vmatpush.msra.mxu3 %v779_v11  ;;  %3706 = vmatmul.msk.f32.gmra.mxu0 %vm477_vm2, %v4521_v53  ;;  %v1046_v11 = vld [vmem:[#allocation7 + $0x160] sm:$0xff] }
  0x69   : > { %3711 = vmatmul.msk.f32.gmra.mxu1 %vm477_vm2, %v4521_v53  ;;  %3716 = vmatmul.msk.f32.gmra.mxu2 %vm477_vm2, %v4521_v53 }
  0x6a   : > { %3721 = vmatmul.msk.f32.gmra.mxu3 %vm477_vm2, %v4521_v53  ;;  %838 = vmatpush.msra.mxu0 %v772_v12  ;;  %v760_v53 = vld [vmem:[#allocation4 + $0x340] sm:$0xff]  ;;  %v1084_v12 = vld [vmem:[#allocation7 + $0x290] sm:$0xff] }
  0x6b   : > { %867 = vmatpush.msra.mxu1 %v773_v13  ;;  %896 = vmatpush.msra.mxu2 %v774_v14  ;;  %v1012_v13 = vld [vmem:[#allocation7 + $0x50] sm:$0xff] }
  0x6c   : > { %925 = vmatpush.msra.mxu3 %v775_v15  ;;  %839 = vmatpush.msra.mxu0 %v768_v16  ;;  %v1044_v14 = vld [vmem:[#allocation7 + $0x150] sm:$0xff]  ;;  %v1082_v15 = vld [vmem:[#allocation7 + $0x280] sm:$0xff] }
  0x6d   : > { %868 = vmatpush.msra.mxu1 %v769_v17  ;;  %897 = vmatpush.msra.mxu2 %v770_v18  ;;  %v1010_v16 = vld [vmem:[#allocation7 + $0x40] sm:$0xff]  ;;  %v1080_v18 = vld [vmem:[#allocation7 + $0x270] sm:$0xff] }
  0x6e   : > { %926 = vmatpush.msra.mxu3 %v771_v19  ;;  %840 = vmatpush.msra.mxu0 %v764_v20  ;;  %v1042_v17 = vld [vmem:[#allocation7 + $0x140] sm:$0xff] }
  0x6f   : > { %869 = vmatpush.msra.mxu1 %v765_v21  ;;  %898 = vmatpush.msra.mxu2 %v766_v22  ;;  %v1112_v21 = vld [vmem:[#allocation7 + $0x370] sm:$0xff] }
  0x70   : > { %927 = vmatpush.msra.mxu3 %v767_v23  ;;  %3707 = vmatmul.msk.f32.gmra.mxu0 %vm477_vm2, %v4534_v4 }
  0x71   : > { %3712 = vmatmul.msk.f32.gmra.mxu1 %vm477_vm2, %v4534_v4  ;;  %3717 = vmatmul.msk.f32.gmra.mxu2 %vm477_vm2, %v4534_v4 }
  0x72   : > { %3722 = vmatmul.msk.f32.gmra.mxu3 %vm477_vm2, %v4534_v4  ;;  %841 = vmatpush.msra.mxu0 %v760_v53  ;;  %v1008_v53 = vld [vmem:[#allocation7 + $0x30] sm:$0xff] }
  0x73   : > { %870 = vmatpush.msra.mxu1 %v761_v24  ;;  %899 = vmatpush.msra.mxu2 %v762_v25  ;;  %v1040_v24 = vld [vmem:[#allocation7 + $0x130] sm:$0xff]  ;;  %v1078_v25 = vld [vmem:[#allocation7 + $0x260] sm:$0xff] }
  0x74   : > { %928 = vmatpush.msra.mxu3 %v763_v26  ;;  %842 = vmatpush.msra.mxu0 %v756_v27  ;;  %v1110_v26 = vld [vmem:[#allocation7 + $0x360] sm:$0xff] }
  0x75   : > { %871 = vmatpush.msra.mxu1 %v757_v28  ;;  %900 = vmatpush.msra.mxu2 %v758_v29  ;;  %v1006_v27 = vld [vmem:[#allocation7 + $0x20] sm:$0xff]  ;;  %v1076_v29 = vld [vmem:[#allocation7 + $0x250] sm:$0xff] }
  0x76   : > { %929 = vmatpush.msra.mxu3 %v759_v30  ;;  %843 = vmatpush.msra.mxu0 %v752_v31  ;;  %v1038_v28 = vld [vmem:[#allocation7 + $0x120] sm:$0xff]  ;;  %v1108_v30 = vld [vmem:[#allocation7 + $0x350] sm:$0xff] }
  0x77   : > { %872 = vmatpush.msra.mxu1 %v753_v32  ;;  %901 = vmatpush.msra.mxu2 %v754_v33  ;;  %v1004_v31 = vld [vmem:[#allocation7 + $0x10] sm:$0xff]  ;;  %v1074_v33 = vld [vmem:[#allocation7 + $0x240] sm:$0xff] }
  0x78   : > { %930 = vmatpush.msra.mxu3 %v755_v34  ;;  %3724 = vmatmul.msk.f32.vlgmr.msra.gmra.mxu0 %vm477_vm2, %v4557_v51  ;;  %v1036_v32 = vld [vmem:[#allocation7 + $0x110] sm:$0xff]  ;;  %v1106_v34 = vld [vmem:[#allocation7 + $0x340] sm:$0xff] }
  0x79   : > { %3729 = vmatmul.msk.f32.vlgmr.msra.gmra.mxu1 %vm477_vm2, %v4557_v51  ;;  %3734 = vmatmul.msk.f32.vlgmr.msra.gmra.mxu2 %vm477_vm2, %v4557_v51 }
  0x7a   : > { %3739 = vmatmul.msk.f32.vlgmr.msra.gmra.mxu3 %vm477_vm2, %v4557_v51  ;;  %1127 = vmatpush.msrb.mxu0 %v1032_v42  ;;  %v1002_v42 = vld [vmem:[#allocation7] sm:$0xff] }
  0x7b   : > { %1156 = vmatpush.msrb.mxu1 %v1064_v43  ;;  %1185 = vmatpush.msrb.mxu2 %v1096_v50  ;;  %v1034_v43 = vld [vmem:[#allocation7 + $0x100] sm:$0xff] }
  0x7c   : > { %1128 = vmatpush.msrb.mxu0 %v1030_v44  ;;  %1222 = vmatpush.msrb.mxu3 %v1112_v21  ;;  %v1072_v44 = vld [vmem:[#allocation7 + $0x230] sm:$0xff]  ;;  %v1070_v50 = vld [vmem:[#allocation7 + $0x220] sm:$0xff]  ;;  %v1021_v21 = vld [vmem:[#allocation7 + $0x98] sm:$0xff] }
  0x7d   : > { %1157 = vmatpush.msrb.mxu1 %v1062_v45  ;;  %1186 = vmatpush.msrb.mxu2 %v1094_v58  ;;  %v1065_v58 = vld [vmem:[#allocation7 + $0x1f8] sm:$0xff] }
  0x7e   : > { %1129 = vmatpush.msrb.mxu0 %v1028_v46  ;;  %1223 = vmatpush.msrb.mxu3 %v1110_v26  ;;  %v1051_v26 = vld [vmem:[#allocation7 + $0x188] sm:$0xff] }
  0x7f   : > { %1158 = vmatpush.msrb.mxu1 %v1060_v47  ;;  %1187 = vmatpush.msrb.mxu2 %v1092_v38  ;;  %v1104_v47 = vld [vmem:[#allocation7 + $0x330] sm:$0xff]  ;;  %v1031_v38 = vld [vmem:[#allocation7 + $0xe8] sm:$0xff] }
  0x80   : > { %3725 = vmatmul.msk.f32.gmra.mxu0 %vm477_vm2, %v4569_v60  ;;  %1224 = vmatpush.msrb.mxu3 %v1108_v30 }
  0x81   : > { %3730 = vmatmul.msk.f32.gmra.mxu1 %vm477_vm2, %v4569_v60  ;;  %3735 = vmatmul.msk.f32.gmra.mxu2 %vm477_vm2, %v4569_v60 }
  0x82   : > { %3740 = vmatmul.msk.f32.gmra.mxu3 %vm477_vm2, %v4569_v60  ;;  %1130 = vmatpush.msrb.mxu0 %v1026_v48  ;;  %v1054_v60 = vld [vmem:[#allocation7 + $0x1a0] sm:$0xff] }
  0x83   : > { %1159 = vmatpush.msrb.mxu1 %v1058_v49  ;;  %1188 = vmatpush.msrb.mxu2 %v1090_v63  ;;  %v1098_v63 = vld [vmem:[#allocation7 + $0x300] sm:$0xff] }
  0x84   : > { %1131 = vmatpush.msrb.mxu0 %v1024_v56  ;;  %1225 = vmatpush.msrb.mxu3 %v1106_v34  ;;  %v1102_v56 = vld [vmem:[#allocation7 + $0x320] sm:$0xff]  ;;  %v1087_v34 = vld [vmem:[#allocation7 + $0x2a8] sm:$0xff] }
  0x85   : > { %1160 = vmatpush.msrb.mxu1 %v1056_v57  ;;  %1189 = vmatpush.msrb.mxu2 %v1088_v2  ;;  %v1033_v57 = vld [vmem:[#allocation7 + $0xf8] sm:$0xff]  ;;  %v1027_v2 = vld [vmem:[#allocation7 + $0xc8] sm:$0xff] }
  0x86   : > { %1132 = vmatpush.msrb.mxu0 %v1022_v59  ;;  %1226 = vmatpush.msrb.mxu3 %v1104_v47  ;;  %v1068_v59 = vld [vmem:[#allocation7 + $0x210] sm:$0xff]  ;;  %v960_v47 = vld [vmem:[%s7074_s2] sm:$0xf] }
  0x87   : > { %1161 = vmatpush.msrb.mxu1 %v1054_v60  ;;  %v1100_v60 = vld [vmem:[#allocation7 + $0x310] sm:$0xff] }
  0x88   : > { %3726 = vmatmul.msk.f32.gmra.mxu0 %vm477_vm2, %v4584_v10  ;;  %1227 = vmatpush.msrb.mxu3 %v1102_v56  ;;  %v1045_v56 = vld [vmem:[#allocation7 + $0x158] sm:$0xff] }
  0x89   : > { %3731 = vmatmul.msk.f32.gmra.mxu1 %vm477_vm2, %v4584_v10  ;;  %3736 = vmatmul.msk.f32.gmra.mxu2 %vm477_vm2, %v4584_v10 }
  0x8a   : > { %3741 = vmatmul.msk.f32.gmra.mxu3 %vm477_vm2, %v4584_v10  ;;  %1133 = vmatpush.msrb.mxu0 %v1020_v61  ;;  %v1086_v10 = vld [vmem:[#allocation7 + $0x2a0] sm:$0xff]  ;;  %v1063_v61 = vld [vmem:[#allocation7 + $0x1e8] sm:$0xff] }
  0x8b   : > { %1162 = vmatpush.msrb.mxu1 %v1052_v62  ;;  %1190 = vmatpush.msrb.mxu2 %v1086_v10  ;;  %v1066_v62 = vld [vmem:[#allocation7 + $0x200] sm:$0xff] }
  0x8c   : > { %1134 = vmatpush.msrb.mxu0 %v1018_v0  ;;  %1228 = vmatpush.msrb.mxu3 %v1100_v60  ;;  %v1029_v0 = vld [vmem:[#allocation7 + $0xd8] sm:$0xff] }
  0x8d   : > { %1163 = vmatpush.msrb.mxu1 %v1050_v1  ;;  %1191 = vmatpush.msrb.mxu2 %v1084_v12  ;;  %v1061_v1 = vld [vmem:[#allocation7 + $0x1d8] sm:$0xff] }
  0x8e   : > { %1135 = vmatpush.msrb.mxu0 %v1016_v8  ;;  %1229 = vmatpush.msrb.mxu3 %v1098_v63  ;;  %v1059_v8 = vld [vmem:[#allocation7 + $0x1c8] sm:$0xff]  ;;  %v1081_v60 = vld [vmem:[#allocation7 + $0x278] sm:$0xff] }
  0x8f   : > { %1164 = vmatpush.msrb.mxu1 %v1048_v9  ;;  %1192 = vmatpush.msrb.mxu2 %v1082_v15  ;;  %v1097_v9 = vld [vmem:[#allocation7 + $0x2f8] sm:$0xff]  ;;  %v1095_v15 = vld [vmem:[#allocation7 + $0x2e8] sm:$0xff] }
  0x90   : > { %3727 = vmatmul.msk.f32.gmra.mxu0 %vm477_vm2, %v4580_v5 }
  0x91   : > { %3732 = vmatmul.msk.f32.gmra.mxu1 %vm477_vm2, %v4580_v5  ;;  %3737 = vmatmul.msk.f32.gmra.mxu2 %vm477_vm2, %v4580_v5 }
  0x92   : > { %3742 = vmatmul.msk.f32.gmra.mxu3 %vm477_vm2, %v4580_v5  ;;  %1136 = vmatpush.msrb.mxu0 %v1014_v39 }
  0x93   : > { %1165 = vmatpush.msrb.mxu1 %v1046_v11  ;;  %1193 = vmatpush.msrb.mxu2 %v1080_v18  ;;  %v1093_v18 = vld [vmem:[#allocation7 + $0x2d8] sm:$0xff] }
  0x94   : > { %1137 = vmatpush.msrb.mxu0 %v1012_v13  ;;  %v1025_v13 = vld [vmem:[#allocation7 + $0xb8] sm:$0xff] }
  0x95   : > { %1166 = vmatpush.msrb.mxu1 %v1044_v14  ;;  %1194 = vmatpush.msrb.mxu2 %v1078_v25  ;;  %v1057_v14 = vld [vmem:[#allocation7 + $0x1b8] sm:$0xff]  ;;  %v1019_v25 = vld [vmem:[#allocation7 + $0x88] sm:$0xff] }
  0x96   : > { %1138 = vmatpush.msrb.mxu0 %v1010_v16  ;;  %v1023_v16 = vld [vmem:[#allocation7 + $0xa8] sm:$0xff] }
  0x97   : > { %1167 = vmatpush.msrb.mxu1 %v1042_v17  ;;  %1195 = vmatpush.msrb.mxu2 %v1076_v29  ;;  %v1055_v17 = vld [vmem:[#allocation7 + $0x1a8] sm:$0xff] }
  0x98   : > { %1139 = vmatpush.msrb.mxu0 %v1008_v53  ;;  %v1053_v53 = vld [vmem:[#allocation7 + $0x198] sm:$0xff] }
  0x99   : > { %1168 = vmatpush.msrb.mxu1 %v1040_v24  ;;  %1196 = vmatpush.msrb.mxu2 %v1074_v33  ;;  %v1091_v24 = vld [vmem:[#allocation7 + $0x2c8] sm:$0xff]  ;;  %v1049_v33 = vld [vmem:[#allocation7 + $0x178] sm:$0xff] }
  0x9a   : > { %1140 = vmatpush.msrb.mxu0 %v1006_v27  ;;  %v1089_v27 = vld [vmem:[#allocation7 + $0x2b8] sm:$0xff] }
  0x9b   : > { %1169 = vmatpush.msrb.mxu1 %v1038_v28  ;;  %1197 = vmatpush.msrb.mxu2 %v1072_v44  ;;  %v1085_v44 = vld [vmem:[#allocation7 + $0x298] sm:$0xff] }
  0x9c   : > { %1141 = vmatpush.msrb.mxu0 %v1004_v31 }
  0x9d   : > { %1170 = vmatpush.msrb.mxu1 %v1036_v32  ;;  %1198 = vmatpush.msrb.mxu2 %v1070_v50  ;;  %v1017_v32 = vld [vmem:[#allocation7 + $0x78] sm:$0xff] }
  0x9e   : > { %1142 = vmatpush.msrb.mxu0 %v1002_v42  ;;  %v1015_v42 = vld [vmem:[#allocation7 + $0x68] sm:$0xff]  ;;  %v1013_v50 = vld [vmem:[#allocation7 + $0x58] sm:$0xff] }
  0x9f   : > { %1171 = vmatpush.msrb.mxu1 %v1034_v43  ;;  %1199 = vmatpush.msrb.mxu2 %v1068_v59  ;;  %v1047_v43 = vld [vmem:[#allocation7 + $0x168] sm:$0xff] }
  0xa0   : > { %1243 = vmatpush.msra.mxu0 %v1033_v57  ;;  %v1083_v57 = vld [vmem:[#allocation7 + $0x288] sm:$0xff] }
  0xa1   : > { %1272 = vmatpush.msra.mxu1 %v1065_v58  ;;  %1200 = vmatpush.msrb.mxu2 %v1066_v62  ;;  %v1011_v58 = vld [vmem:[#allocation7 + $0x48] sm:$0xff] }
  0xa2   : > { %1244 = vmatpush.msra.mxu0 %v1031_v38  ;;  %v1043_v59 = vld [vmem:[#allocation7 + $0x148] sm:$0xff] }
  0xa3   : > { %1273 = vmatpush.msra.mxu1 %v1063_v61  ;;  %1301 = vmatpush.msra.mxu2 %v1097_v9 }
  0xa4   : > { %1245 = vmatpush.msra.mxu0 %v1029_v0  ;;  %v4705_v0 = vperm.slane %v960_v47, 0 }
  0xa5   : > { %1274 = vmatpush.msra.mxu1 %v1061_v1  ;;  %1302 = vmatpush.msra.mxu2 %v1095_v15  ;;  %v4707_v1 = vperm.slane %v960_v47, 1  ;;  %v1007_v15 = vld [vmem:[#allocation7 + $0x28] sm:$0xff] }
  0xa6   : > { %1246 = vmatpush.msra.mxu0 %v1027_v2  ;;  %v1113_v2 = vld [vmem:[#allocation7 + $0x378] sm:$0xff] }
  0xa7   : > { %1275 = vmatpush.msra.mxu1 %v1059_v8  ;;  %1303 = vmatpush.msra.mxu2 %v1093_v18 }
  0xa8   : > { %1247 = vmatpush.msra.mxu0 %v1025_v13  ;;  %1338 = vmatpush.msra.mxu3 %v1113_v2  ;;  %v1009_v13 = vld [vmem:[#allocation7 + $0x38] sm:$0xff]  ;;  %v1103_v2 = vld [vmem:[#allocation7 + $0x328] sm:$0xff] }
  0xa9   : > { %1276 = vmatpush.msra.mxu1 %v1057_v14  ;;  %1304 = vmatpush.msra.mxu2 %v1091_v24  ;;  %v1005_v24 = vld [vmem:[#allocation7 + $0x18] sm:$0xff] }
  0xaa   : > { %1248 = vmatpush.msra.mxu0 %v1023_v16  ;;  %v1039_v16 = vld [vmem:[#allocation7 + $0x128] sm:$0xff] }
  0xab   : > { %1277 = vmatpush.msra.mxu1 %v1055_v17  ;;  %1305 = vmatpush.msra.mxu2 %v1089_v27  ;;  %v1077_v17 = vld [vmem:[#allocation7 + $0x258] sm:$0xff] }
  0xac   : > { %1249 = vmatpush.msra.mxu0 %v1021_v21 }
  0xad   : > { %1278 = vmatpush.msra.mxu1 %v1053_v53  ;;  %1306 = vmatpush.msra.mxu2 %v1087_v34  ;;  %v1109_v53 = vld [vmem:[#allocation7 + $0x358] sm:$0xff] }
  0xae   : > { %1250 = vmatpush.msra.mxu0 %v1019_v25  ;;  %v1075_v25 = vld [vmem:[#allocation7 + $0x248] sm:$0xff] }
  0xaf   : > { %1279 = vmatpush.msra.mxu1 %v1051_v26  ;;  %1307 = vmatpush.msra.mxu2 %v1085_v44  ;;  %v4721_v44 = vperm.slane %v960_v47, 3 }
  0xb0   : > { %1251 = vmatpush.msra.mxu0 %v1017_v32  ;;  %v1037_v32 = vld [vmem:[#allocation7 + $0x118] sm:$0xff] }
  0xb1   : > { %1280 = vmatpush.msra.mxu1 %v1049_v33  ;;  %1308 = vmatpush.msra.mxu2 %v1083_v57  ;;  %v1107_v33 = vld [vmem:[#allocation7 + $0x348] sm:$0xff] }
  0xb2   : > { %1252 = vmatpush.msra.mxu0 %v1015_v42 }
  0xb3   : > { %1281 = vmatpush.msra.mxu1 %v1047_v43  ;;  %1309 = vmatpush.msra.mxu2 %v1081_v60  ;;  %v4719_v43 = vperm.slane %v960_v47, 2 }
  0xb4   : > { %1253 = vmatpush.msra.mxu0 %v1013_v50  ;;  %v1003_v50 = vld [vmem:[#allocation7 + $0x8] sm:$0xff] }
  0xb5   : > { %v4634_v4 = vpop.f32.mrf.mxu0  ;;  %1282 = vmatpush.msra.mxu1 %v1045_v56  ;;  %v1073_v56 = vld [vmem:[#allocation7 + $0x238] sm:$0xff] }
  0xb6   : > { %v4636_v35 = vpop.f32.mrf.mxu1  ;;  %1254 = vmatpush.msra.mxu0 %v1011_v58 }
  0xb7   : > { %1283 = vmatpush.msra.mxu1 %v1043_v59 }
  0xb8   : > { %1255 = vmatpush.msra.mxu0 %v1009_v13 }
  0xba   : > { %1256 = vmatpush.msra.mxu0 %v1007_v15 }
  0xbc   : > { %v4638_v36 = vpop.f32.mrf.mxu2  ;;  %1257 = vmatpush.msra.mxu0 %v1005_v24 }
  0xbd   : > { %v4640_v37 = vpop.f32.mrf.mxu3  ;;  %v4642_v40 = vpop.f32.mrf.mxu0 }
  0xbe   : > { %v4644_v41 = vpop.f32.mrf.mxu1  ;;  %1258 = vmatpush.msra.mxu0 %v1003_v50 }
  0xc4   : > { %v4646_v51 = vpop.f32.mrf.mxu2 }
  0xc5   : > { %v4648_v52 = vpop.f32.mrf.mxu3  ;;  %v4650_v54 = vpop.f32.mrf.mxu0 }
  0xc6   : > { %v4652_v55 = vpop.f32.mrf.mxu1 }
  0xcc   : > { %v4654_v3 = vpop.f32.mrf.mxu2 }
  0xcd   : > { %v4656_v5 = vpop.f32.mrf.mxu3  ;;  %v4658_v6 = vpop.f32.mrf.mxu0 }
  0xce   : > { %v4660_v7 = vpop.f32.mrf.mxu1 }
  0xd4   : > { %v4662_v19 = vpop.f32.mrf.mxu2 }
  0xd5   : > { %v4664_v20 = vpop.f32.mrf.mxu3  ;;  %v4666_v22 = vpop.f32.mrf.mxu0 }
  0xd6   : > { %v4668_v23 = vpop.f32.mrf.mxu1  ;;  %v653_v38 = vadd.f32 %v4666_v22, %v4634_v4  ;;  %v1041_v4 = vld [vmem:[#allocation7 + $0x138] sm:$0xff]  ;;  %v1079_v22 = vld [vmem:[#allocation7 + $0x268] sm:$0xff] }
  0xd7   : > { %v682_v61 = vadd.f32 %v4668_v23, %v4636_v35  ;;  %v1111_v23 = vld [vmem:[#allocation7 + $0x368] sm:$0xff]  ;;  %1310 = vmatpush.msra.mxu2 %v1079_v22  ;;  %1284 = vmatpush.msra.mxu1 %v1041_v4  ;;  %v1069_v4 = vld [vmem:[#allocation7 + $0x218] sm:$0xff] }
  0xd8   : > { %1339 = vmatpush.msra.mxu3 %v1111_v23  ;;  %v1101_v22 = vld [vmem:[#allocation7 + $0x318] sm:$0xff] }
  0xd9   : > { %1311 = vmatpush.msra.mxu2 %v1077_v17  ;;  %1285 = vmatpush.msra.mxu1 %v1039_v16 }
  0xda   : > { %1340 = vmatpush.msra.mxu3 %v1109_v53 }
  0xdb   : > { %1312 = vmatpush.msra.mxu2 %v1075_v25  ;;  %1286 = vmatpush.msra.mxu1 %v1037_v32  ;;  %v1099_v25 = vld [vmem:[#allocation7 + $0x308] sm:$0xff]  ;;  %v1386_v32 = vld [vmem:[#allocation7 + $0x450] sm:$0xff] }
  0xdc   : > { %v4670_v45 = vpop.f32.mrf.mxu2  ;;  %1341 = vmatpush.msra.mxu3 %v1107_v33 }
  0xdd   : > { %v4672_v46 = vpop.f32.mrf.mxu3  ;;  %v4674_v48 = vpop.f32.mrf.mxu0  ;;  %v711_v34 = vadd.f32 %v4670_v45, %v4638_v36  ;;  %v1035_v36 = vld [vmem:[#allocation7 + $0x108] sm:$0xff]  ;;  %1313 = vmatpush.msra.mxu2 %v1073_v56 }
  0xde   : > { %v4676_v49 = vpop.f32.mrf.mxu1  ;;  %v740_v42 = vadd.f32 %v4672_v46, %v4640_v37  ;;  %v656_v57 = vadd.f32 %v4674_v48, %v4642_v40  ;;  %v1105_v37 = vld [vmem:[#allocation7 + $0x338] sm:$0xff]  ;;  %v1390_v40 = vld [vmem:[#allocation7 + $0x470] sm:$0xff]  ;;  %1287 = vmatpush.msra.mxu1 %v1035_v36 }
  0xdf   : > { %v685_v58 = vadd.f32 %v4676_v49, %v4644_v41  ;;  %1342 = vmatpush.msra.mxu3 %v1105_v37  ;;  %v1422_v41 = vld [vmem:[#allocation7 + $0x570] sm:$0xff]  ;;  %v1388_v49 = vld [vmem:[#allocation7 + $0x460] sm:$0xff] }
  0xe0   : > { %v1382_v36 = vld [vmem:[#allocation7 + $0x430] sm:$0xff] }
  0xe1   : > { %1343 = vmatpush.msra.mxu3 %v1103_v2  ;;  %v1414_v2 = vld [vmem:[#allocation7 + $0x530] sm:$0xff] }
  0xe3   : > { %1344 = vmatpush.msra.mxu3 %v1101_v22 }
  0xe4   : > { %v4678_v10 = vpop.f32.mrf.mxu2 }
  0xe5   : > { %v4680_v39 = vpop.f32.mrf.mxu3  ;;  %v4682_v11 = vpop.f32.mrf.mxu0  ;;  %v714_v53 = vadd.f32 %v4678_v10, %v4646_v51  ;;  %v1418_v51 = vld [vmem:[#allocation7 + $0x550] sm:$0xff]  ;;  %1345 = vmatpush.msra.mxu3 %v1099_v25 }
  0xe6   : > { %v4684_v12 = vpop.f32.mrf.mxu1  ;;  %v743_v24 = vadd.f32 %v4680_v39, %v4648_v52  ;;  %v659_v33 = vadd.f32 %v4682_v11, %v4650_v54  ;;  %v1454_v52 = vld [vmem:[#allocation7 + $0x670] sm:$0xff]  ;;  %v1452_v11 = vld [vmem:[#allocation7 + $0x660] sm:$0xff] }
  0xec   : > { %v4686_v28 = vpop.f32.mrf.mxu2 }
  0xed   : > { %v4688_v29 = vpop.f32.mrf.mxu3  ;;  %v4690_v30 = vpop.f32.mrf.mxu0 }
  0xee   : > { %v4692_v31 = vpop.f32.mrf.mxu1 }
  0xf4   : > { %v4701_v62 = vpop.f32.mrf.mxu2 }
  0xf5   : > { %v4703_v63 = vpop.f32.mrf.mxu3  ;;  %v845_v8 = vpop.f32.mrf.mxu0 }
  0xf6   : > { %v874_v9 = vpop.f32.mrf.mxu1  ;;  %v944_v14 = vadd.f32 %v845_v8, %v653_v38 }
  0xf7   : > { %v945_v35 = vadd.f32 %v874_v9, %v682_v61  ;;  %v1071_v61 = vld [vmem:[#allocation7 + $0x228] sm:$0xff] }
  0xf8   : > { %v970_v18 = vadd.f32 %v4705_v0, %v944_v14  ;;  %1314 = vmatpush.msra.mxu2 %v1071_v61 }
  0xf9   : > { %v971_v21 = vadd.f32 %v4707_v1, %v945_v35 }
  0xfa   : > { %v4711_v26 = vmax.f32 %v970_v18, 0.0  ;;  %1315 = vmatpush.msra.mxu2 %v1069_v4  ;;  %v1420_v18 = vld [vmem:[#allocation7 + $0x560] sm:$0xff] }
  0xfb   : > { %v4713_v27 = vmax.f32 %v971_v21, 0.0  ;;  %v1067_v21 = vld [vmem:[#allocation7 + $0x208] sm:$0xff] }
  0xfc   : > { %v903_v59 = vpop.f32.mrf.mxu2  ;;  %1143 = vmatmul.f32.vlgmr.msrb.gmra.mxu0 %v4711_v26  ;;  %1316 = vmatpush.msra.mxu2 %v1067_v21 }
  0xfd   : > { %v932_v60 = vpop.f32.mrf.mxu3  ;;  %1172 = vmatmul.f32.vlgmr.msrb.gmra.mxu1 %v4713_v27  ;;  %v946_v45 = vadd.f32 %v903_v59, %v711_v34  ;;  %v848_v47 = vpop.f32.mrf.mxu0  ;;  %1472 = vmatpush.msrb.mxu0 %v1390_v40  ;;  %v688_v34 = vadd.f32 %v4684_v12, %v4652_v55  ;;  %v1416_v55 = vld [vmem:[#allocation7 + $0x540] sm:$0xff] }
  0xfe   : > { %v947_v46 = vadd.f32 %v932_v60, %v740_v42  ;;  %v877_v38 = vpop.f32.mrf.mxu1  ;;  %v948_v48 = vadd.f32 %v848_v47, %v656_v57  ;;  %1501 = vmatpush.msrb.mxu1 %v1422_v41  ;;  %v1380_v40 = vld [vmem:[#allocation7 + $0x420] sm:$0xff]  ;;  %v1450_v41 = vld [vmem:[#allocation7 + $0x650] sm:$0xff] }
  0xff   : > { %v949_v8 = vadd.f32 %v877_v38, %v685_v58  ;;  %v972_v9 = vadd.f32 %v4719_v43, %v946_v45  ;;  %1473 = vmatpush.msrb.mxu0 %v1388_v49  ;;  %v1384_v58 = vld [vmem:[#allocation7 + $0x440] sm:$0xff]  ;;  %v662_v49 = vadd.f32 %v4690_v30, %v4658_v6  ;;  %v1410_v30 = vld [vmem:[#allocation7 + $0x510] sm:$0xff] }
 0x100   : > { %v973_v13 = vadd.f32 %v4721_v44, %v947_v46  ;;  %v974_v14 = vadd.f32 %v4705_v0, %v948_v48  ;;  %1502 = vmatpush.msrb.mxu1 %v1420_v18  ;;  %v717_v48 = vadd.f32 %v4686_v28, %v4654_v3  ;;  %v1412_v3 = vld [vmem:[#allocation7 + $0x520] sm:$0xff] }
 0x101   : > { %v975_v35 = vadd.f32 %v4707_v1, %v949_v8  ;;  %v4733_v23 = vmax.f32 %v972_v9, 0.0  ;;  %1474 = vmatpush.msrb.mxu0 %v1386_v32  ;;  %v746_v8 = vadd.f32 %v4688_v29, %v4656_v5  ;;  %v691_v9 = vadd.f32 %v4692_v31, %v4660_v7  ;;  %v1378_v5 = vld [vmem:[#allocation7 + $0x410] sm:$0xff]  ;;  %v1376_v7 = vld [vmem:[#allocation7 + $0x400] sm:$0xff] }
 0x102   : > { %v4735_v15 = vmax.f32 %v973_v13, 0.0  ;;  %v4737_v16 = vmax.f32 %v974_v14, 0.0  ;;  %1503 = vmatpush.msrb.mxu1 %v1418_v51  ;;  %v1374_v51 = vld [vmem:[#allocation7 + $0x3f0] sm:$0xff] }
 0x103   : > { %v4739_v17 = vmax.f32 %v975_v35, 0.0  ;;  %1201 = vmatmul.f32.vlgmr.msrb.gmra.mxu2 %v4733_v23  ;;  %1475 = vmatpush.msrb.mxu0 %v1384_v58  ;;  %v1448_v35 = vld [vmem:[#allocation7 + $0x640] sm:$0xff]  ;;  %v1470_v58 = vld [vmem:[#allocation7 + $0x6f0] sm:$0xff] }
 0x104   : > { %3743 = vmatmul.msk.f32.vlgmr.msrb.gmra.mxu3 %vm1114_vm4, %v4735_v15  ;;  %v906_v42 = vpop.f32.mrf.mxu2  ;;  %1146 = vmatmul.f32.gmra.mxu0 %v4737_v16 }
 0x105   : > { %v935_v50 = vpop.f32.mrf.mxu3  ;;  %1175 = vmatmul.f32.gmra.mxu1 %v4739_v17  ;;  %v950_v10 = vadd.f32 %v906_v42, %v714_v53  ;;  %v851_v56 = vpop.f32.mrf.mxu0  ;;  %1530 = vmatpush.msrb.mxu2 %v1454_v52  ;;  %v1446_v53 = vld [vmem:[#allocation7 + $0x630] sm:$0xff]  ;;  %v720_v52 = vadd.f32 %v4701_v62, %v4662_v19  ;;  %v1468_v62 = vld [vmem:[#allocation7 + $0x6e0] sm:$0xff] }
 0x106   : > { %v951_v39 = vadd.f32 %v935_v50, %v743_v24  ;;  %v880_v57 = vpop.f32.mrf.mxu1  ;;  %v952_v59 = vadd.f32 %v851_v56, %v659_v33  ;;  %1504 = vmatpush.msrb.mxu1 %v1416_v55  ;;  %1476 = vmatpush.msrb.mxu0 %v1382_v36  ;;  %v1408_v50 = vld [vmem:[#allocation7 + $0x500] sm:$0xff]  ;;  %v1406_v56 = vld [vmem:[#allocation7 + $0x4f0] sm:$0xff] }
 0x107   : > { %v953_v54 = vadd.f32 %v880_v57, %v688_v34  ;;  %v976_v12 = vadd.f32 %v4719_v43, %v950_v10  ;;  %1531 = vmatpush.msrb.mxu2 %v1452_v11  ;;  %v1372_v57 = vld [vmem:[#allocation7 + $0x3e0] sm:$0xff]  ;;  %1567 = vmatpush.msrb.mxu3 %v1470_v58  ;;  %v1381_v58 = vld [vmem:[#allocation7 + $0x428] sm:$0xff] }
 0x108   : > { %v977_v60 = vadd.f32 %v4721_v44, %v951_v39  ;;  %v978_v37 = vadd.f32 %v4705_v0, %v952_v59  ;;  %1505 = vmatpush.msrb.mxu1 %v1414_v2  ;;  %1477 = vmatpush.msrb.mxu0 %v1380_v40  ;;  %v1368_v2 = vld [vmem:[#allocation7 + $0x3c0] sm:$0xff] }
 0x109   : > { %v979_v45 = vadd.f32 %v4707_v1, %v953_v54  ;;  %v4758_v46 = vmax.f32 %v976_v12, 0.0  ;;  %1532 = vmatpush.msrb.mxu2 %v1450_v41  ;;  %v1370_v54 = vld [vmem:[#allocation7 + $0x3d0] sm:$0xff]  ;;  %v1440_v12 = vld [vmem:[#allocation7 + $0x600] sm:$0xff]  ;;  %1568 = vmatpush.msrb.mxu3 %v1468_v62  ;;  %v1469_v62 = vld [vmem:[#allocation7 + $0x6e8] sm:$0xff] }
 0x10a   : > { %v4760_v47 = vmax.f32 %v977_v60, 0.0  ;;  %v4762_v38 = vmax.f32 %v978_v37, 0.0  ;;  %1506 = vmatpush.msrb.mxu1 %v1412_v3  ;;  %1478 = vmatpush.msrb.mxu0 %v1378_v5  ;;  %v1466_v60 = vld [vmem:[#allocation7 + $0x6d0] sm:$0xff]  ;;  %v1400_v40 = vld [vmem:[#allocation7 + $0x4c0] sm:$0xff] }
 0x10b   : > { %v4764_v61 = vmax.f32 %v979_v45, 0.0  ;;  %1204 = vmatmul.f32.gmra.mxu2 %v4758_v46  ;;  %v1402_v45 = vld [vmem:[#allocation7 + $0x4d0] sm:$0xff]  ;;  %1569 = vmatpush.msrb.mxu3 %v1466_v60  ;;  %v1396_v3 = vld [vmem:[#allocation7 + $0x4a0] sm:$0xff]  ;;  %v1409_v60 = vld [vmem:[#allocation7 + $0x508] sm:$0xff] }
 0x10c   : > { %3744 = vmatmul.msk.f32.gmra.mxu3 %vm1114_vm4, %v4760_v47  ;;  %v909_v13 = vpop.f32.mrf.mxu2  ;;  %1149 = vmatmul.f32.gmra.mxu0 %v4762_v38  ;;  %v1462_v41 = vld [vmem:[#allocation7 + $0x6b0] sm:$0xff] }
 0x10d   : > { %v938_v4 = vpop.f32.mrf.mxu3  ;;  %1178 = vmatmul.f32.gmra.mxu1 %v4764_v61  ;;  %v954_v28 = vadd.f32 %v909_v13, %v717_v48  ;;  %v854_v22 = vpop.f32.mrf.mxu0  ;;  %1533 = vmatpush.msrb.mxu2 %v1448_v35  ;;  %v1366_v48 = vld [vmem:[#allocation7 + $0x3b0] sm:$0xff] }
 0x10e   : > { %v955_v29 = vadd.f32 %v938_v4, %v746_v8  ;;  %v883_v14 = vpop.f32.mrf.mxu1  ;;  %v956_v18 = vadd.f32 %v854_v22, %v662_v49  ;;  %1507 = vmatpush.msrb.mxu1 %v1410_v30  ;;  %1479 = vmatpush.msrb.mxu0 %v1376_v7  ;;  %v1436_v8 = vld [vmem:[#allocation7 + $0x5e0] sm:$0xff]  ;;  %v1398_v49 = vld [vmem:[#allocation7 + $0x4b0] sm:$0xff] }
 0x10f   : > { %v957_v6 = vadd.f32 %v883_v14, %v691_v9  ;;  %v980_v31 = vadd.f32 %v4719_v43, %v954_v28  ;;  %1534 = vmatpush.msrb.mxu2 %v1446_v53  ;;  %v1364_v9 = vld [vmem:[#allocation7 + $0x3a0] sm:$0xff]  ;;  %v1434_v13 = vld [vmem:[#allocation7 + $0x5d0] sm:$0xff]  ;;  %v1389_v53 = vld [vmem:[#allocation7 + $0x468] sm:$0xff] }
 0x110   : > { %v981_v21 = vadd.f32 %v4721_v44, %v955_v29  ;;  %v982_v24 = vadd.f32 %v4705_v0, %v956_v18  ;;  %v749_v0 = vadd.f32 %v4703_v63, %v4664_v20  ;;  %1508 = vmatpush.msrb.mxu1 %v1408_v50  ;;  %1480 = vmatpush.msrb.mxu0 %v1374_v51  ;;  %v1442_v20 = vld [vmem:[#allocation7 + $0x610] sm:$0xff]  ;;  %v1404_v63 = vld [vmem:[#allocation7 + $0x4e0] sm:$0xff]  ;;  %v1391_v18 = vld [vmem:[#allocation7 + $0x478] sm:$0xff] }
 0x111   : > { %v983_v25 = vadd.f32 %v4707_v1, %v957_v6  ;;  %v4783_v32 = vmax.f32 %v980_v31, 0.0  ;;  %v1444_v1 = vld [vmem:[#allocation7 + $0x620] sm:$0xff]  ;;  %v1362_v5 = vld [vmem:[#allocation7 + $0x390] sm:$0xff]  ;;  %v1423_v31 = vld [vmem:[#allocation7 + $0x578] sm:$0xff] }
 0x112   : > { %v4785_v33 = vmax.f32 %v981_v21, 0.0  ;;  %v4787_v34 = vmax.f32 %v982_v24, 0.0  ;;  %1535 = vmatpush.msrb.mxu2 %v1444_v1  ;;  %1509 = vmatpush.msrb.mxu1 %v1406_v56  ;;  %v1460_v4 = vld [vmem:[#allocation7 + $0x6a0] sm:$0xff]  ;;  %v1458_v29 = vld [vmem:[#allocation7 + $0x690] sm:$0xff]  ;;  %v1421_v24 = vld [vmem:[#allocation7 + $0x568] sm:$0xff] }
 0x113   : > { %v4789_v42 = vmax.f32 %v983_v25, 0.0  ;;  %1207 = vmatmul.f32.gmra.mxu2 %v4783_v32  ;;  %1481 = vmatpush.msrb.mxu0 %v1372_v57  ;;  %v1432_v28 = vld [vmem:[#allocation7 + $0x5c0] sm:$0xff]  ;;  %v1394_v22 = vld [vmem:[#allocation7 + $0x490] sm:$0xff]  ;;  %v1387_v50 = vld [vmem:[#allocation7 + $0x458] sm:$0xff] }
 0x114   : > { %3745 = vmatmul.msk.f32.gmra.mxu3 %vm1114_vm4, %v4785_v33  ;;  %v912_v10 = vpop.f32.mrf.mxu2  ;;  %1152 = vmatmul.f32.gmra.mxu0 %v4787_v34  ;;  %v1360_v14 = vld [vmem:[#allocation7 + $0x380] sm:$0xff]  ;;  %v1430_v35 = vld [vmem:[#allocation7 + $0x5b0] sm:$0xff]  ;;  %v1419_v51 = vld [vmem:[#allocation7 + $0x558] sm:$0xff] }
 0x115   : > { %v941_v39 = vpop.f32.mrf.mxu3  ;;  %1181 = vmatmul.f32.gmra.mxu1 %v4789_v42  ;;  %v958_v59 = vadd.f32 %v912_v10, %v720_v52  ;;  %1536 = vmatpush.msrb.mxu2 %v1442_v20  ;;  %v1392_v6 = vld [vmem:[#allocation7 + $0x480] sm:$0xff]  ;;  %v1426_v21 = vld [vmem:[#allocation7 + $0x590] sm:$0xff]  ;;  %v1455_v52 = vld [vmem:[#allocation7 + $0x678] sm:$0xff] }
 0x116   : > { %v959_v19 = vadd.f32 %v941_v39, %v749_v0  ;;  %1510 = vmatpush.msrb.mxu1 %v1404_v63  ;;  %1482 = vmatpush.msrb.mxu0 %v1370_v54  ;;  %v1456_v30 = vld [vmem:[#allocation7 + $0x680] sm:$0xff]  ;;  %v1385_v0 = vld [vmem:[#allocation7 + $0x448] sm:$0xff]  ;;  %v1383_v39 = vld [vmem:[#allocation7 + $0x438] sm:$0xff] }
 0x117   : > { %v984_v55 = vadd.f32 %v4719_v43, %v958_v59  ;;  %1537 = vmatpush.msrb.mxu2 %v1440_v12  ;;  %v1438_v43 = vld [vmem:[#allocation7 + $0x5f0] sm:$0xff]  ;;  %v1428_v7 = vld [vmem:[#allocation7 + $0x5a0] sm:$0xff]  ;;  %v1417_v1 = vld [vmem:[#allocation7 + $0x548] sm:$0xff] }
 0x118   : > { %v985_v11 = vadd.f32 %v4721_v44, %v959_v19  ;;  %v1464_v44 = vld [vmem:[#allocation7 + $0x6c0] sm:$0xff]  ;;  %1511 = vmatpush.msrb.mxu1 %v1402_v45  ;;  %1483 = vmatpush.msrb.mxu0 %v1368_v2  ;;  %v1453_v10 = vld [vmem:[#allocation7 + $0x668] sm:$0xff]  ;;  %v1415_v56 = vld [vmem:[#allocation7 + $0x538] sm:$0xff] }
 0x119   : > { %v4802_v36 = vmax.f32 %v984_v55, 0.0  ;;  %1538 = vmatpush.msrb.mxu2 %v1438_v43  ;;  %1570 = vmatpush.msrb.mxu3 %v1464_v44  ;;  %v1424_v25 = vld [vmem:[#allocation7 + $0x580] sm:$0xff]  ;;  %v1451_v57 = vld [vmem:[#allocation7 + $0x658] sm:$0xff]  ;;  %v1413_v59 = vld [vmem:[#allocation7 + $0x528] sm:$0xff] }
 0x11a   : > { %v4804_v37 = vmax.f32 %v985_v11, 0.0  ;;  %1512 = vmatpush.msrb.mxu1 %v1400_v40  ;;  %1484 = vmatpush.msrb.mxu0 %v1366_v48  ;;  %v1471_v19 = vld [vmem:[#allocation7 + $0x6f8] sm:$0xff]  ;;  %v1449_v20 = vld [vmem:[#allocation7 + $0x648] sm:$0xff] }
 0x11b   : > { %1210 = vmatmul.f32.gmra.mxu2 %v4802_v36  ;;  %1571 = vmatpush.msrb.mxu3 %v1462_v41  ;;  %v1379_v63 = vld [vmem:[#allocation7 + $0x418] sm:$0xff]  ;;  %v1377_v12 = vld [vmem:[#allocation7 + $0x408] sm:$0xff] }
 0x11c   : > { %3746 = vmatmul.msk.f32.gmra.mxu3 %vm1114_vm4, %v4804_v37  ;;  %1259 = vmatmul.f32.vlgmr.msra.gmra.mxu0 %v4711_v26  ;;  %v1411_v54 = vld [vmem:[#allocation7 + $0x518] sm:$0xff]  ;;  %v1445_v45 = vld [vmem:[#allocation7 + $0x628] sm:$0xff] }
 0x11d   : > { %1288 = vmatmul.f32.vlgmr.msra.gmra.mxu1 %v4713_v27  ;;  %1539 = vmatpush.msrb.mxu2 %v1436_v8  ;;  %v1447_v55 = vld [vmem:[#allocation7 + $0x638] sm:$0xff]  ;;  %v1465_v2 = vld [vmem:[#allocation7 + $0x6c8] sm:$0xff] }
 0x11e   : > { %1513 = vmatpush.msrb.mxu1 %v1398_v49  ;;  %1485 = vmatpush.msrb.mxu0 %v1364_v9  ;;  %v1467_v11 = vld [vmem:[#allocation7 + $0x6d8] sm:$0xff]  ;;  %v1373_v8 = vld [vmem:[#allocation7 + $0x3e8] sm:$0xff] }
 0x11f   : > { %1540 = vmatpush.msrb.mxu2 %v1434_v13  ;;  %1572 = vmatpush.msrb.mxu3 %v1460_v4  ;;  %v1375_v43 = vld [vmem:[#allocation7 + $0x3f8] sm:$0xff]  ;;  %v1405_v41 = vld [vmem:[#allocation7 + $0x4e8] sm:$0xff] }
 0x120   : > { %1514 = vmatpush.msrb.mxu1 %v1396_v3  ;;  %1486 = vmatpush.msrb.mxu0 %v1362_v5  ;;  %v1407_v44 = vld [vmem:[#allocation7 + $0x4f8] sm:$0xff]  ;;  %v1441_v49 = vld [vmem:[#allocation7 + $0x608] sm:$0xff] }
 0x121   : > { %1541 = vmatpush.msrb.mxu2 %v1432_v28  ;;  %1573 = vmatpush.msrb.mxu3 %v1458_v29  ;;  %v1443_v40 = vld [vmem:[#allocation7 + $0x618] sm:$0xff]  ;;  %v1461_v9 = vld [vmem:[#allocation7 + $0x6a8] sm:$0xff] }
 0x122   : > { %1515 = vmatpush.msrb.mxu1 %v1394_v22  ;;  %1487 = vmatpush.msrb.mxu0 %v1360_v14  ;;  %v1463_v48 = vld [vmem:[#allocation7 + $0x6b8] sm:$0xff]  ;;  %v1369_v28 = vld [vmem:[#allocation7 + $0x3c8] sm:$0xff] }
 0x123   : > { %1317 = vmatmul.f32.vlgmr.msra.gmra.mxu2 %v4733_v23  ;;  %1574 = vmatpush.msrb.mxu3 %v1456_v30  ;;  %v1371_v13 = vld [vmem:[#allocation7 + $0x3d8] sm:$0xff]  ;;  %v1401_v29 = vld [vmem:[#allocation7 + $0x4c8] sm:$0xff] }
 0x124   : > { %3747 = vmatmul.msk.f32.vlgmr.msra.gmra.mxu3 %vm1114_vm4, %v4735_v15  ;;  %1262 = vmatmul.f32.gmra.mxu0 %v4737_v16  ;;  %v1403_v4 = vld [vmem:[#allocation7 + $0x4d8] sm:$0xff]  ;;  %v1437_v22 = vld [vmem:[#allocation7 + $0x5e8] sm:$0xff] }
 0x125   : > { %1291 = vmatmul.f32.gmra.mxu1 %v4739_v17  ;;  %1542 = vmatpush.msrb.mxu2 %v1430_v35  ;;  %v1439_v3 = vld [vmem:[#allocation7 + $0x5f8] sm:$0xff]  ;;  %v1457_v14 = vld [vmem:[#allocation7 + $0x688] sm:$0xff] }
 0x126   : > { %1588 = vmatpush.msra.mxu0 %v1391_v18  ;;  %1516 = vmatpush.msrb.mxu1 %v1392_v6  ;;  %v1459_v5 = vld [vmem:[#allocation7 + $0x698] sm:$0xff]  ;;  %v1365_v30 = vld [vmem:[#allocation7 + $0x3a8] sm:$0xff] }
 0x127   : > { %1543 = vmatpush.msrb.mxu2 %v1428_v7  ;;  %1683 = vmatpush.msra.mxu3 %v1471_v19  ;;  %v1367_v35 = vld [vmem:[#allocation7 + $0x3b8] sm:$0xff]  ;;  %v1397_v7 = vld [vmem:[#allocation7 + $0x4a8] sm:$0xff] }
 0x128   : > { %1617 = vmatpush.msra.mxu1 %v1423_v31  ;;  %1589 = vmatpush.msra.mxu0 %v1389_v53  ;;  %v1399_v18 = vld [vmem:[#allocation7 + $0x4b8] sm:$0xff]  ;;  %v1433_v31 = vld [vmem:[#allocation7 + $0x5c8] sm:$0xff] }
 0x129   : > { %1544 = vmatpush.msrb.mxu2 %v1426_v21  ;;  %1684 = vmatpush.msra.mxu3 %v1469_v62  ;;  %v1435_v6 = vld [vmem:[#allocation7 + $0x5d8] sm:$0xff] }
 0x12a   : > { %1618 = vmatpush.msra.mxu1 %v1421_v24  ;;  %1590 = vmatpush.msra.mxu0 %v1387_v50  ;;  %v1363_v21 = vld [vmem:[#allocation7 + $0x398] sm:$0xff]  ;;  %v1393_v50 = vld [vmem:[#allocation7 + $0x488] sm:$0xff] }
 0x12b   : > { %1320 = vmatmul.f32.gmra.mxu2 %v4758_v46  ;;  %1685 = vmatpush.msra.mxu3 %v1467_v11  ;;  %v1395_v53 = vld [vmem:[#allocation7 + $0x498] sm:$0xff] }
 0x12c   : > { %3748 = vmatmul.msk.f32.gmra.mxu3 %vm1114_vm4, %v4760_v47  ;;  %1265 = vmatmul.f32.gmra.mxu0 %v4762_v38  ;;  %v1431_v24 = vld [vmem:[#allocation7 + $0x5b8] sm:$0xff] }
 0x12d   : > { %1294 = vmatmul.f32.gmra.mxu1 %v4764_v61  ;;  %1545 = vmatpush.msrb.mxu2 %v1424_v25  ;;  %v1361_v25 = vld [vmem:[#allocation7 + $0x388] sm:$0xff] }
 0x12e   : > { %1619 = vmatpush.msra.mxu1 %v1419_v51  ;;  %1591 = vmatpush.msra.mxu0 %v1385_v0  ;;  %v1429_v51 = vld [vmem:[#allocation7 + $0x5a8] sm:$0xff] }
 0x12f   : > { %1646 = vmatpush.msra.mxu2 %v1455_v52  ;;  %1686 = vmatpush.msra.mxu3 %v1465_v2  ;;  %v1427_v52 = vld [vmem:[#allocation7 + $0x598] sm:$0xff]  ;;  %v1425_v0 = vld [vmem:[#allocation7 + $0x588] sm:$0xff] }
 0x130   : > { %1620 = vmatpush.msra.mxu1 %v1417_v1  ;;  %1592 = vmatpush.msra.mxu0 %v1383_v39 }
 0x131   : > { %1647 = vmatpush.msra.mxu2 %v1453_v10  ;;  %1687 = vmatpush.msra.mxu3 %v1463_v48 }
 0x132   : > { %1621 = vmatpush.msra.mxu1 %v1415_v56  ;;  %1593 = vmatpush.msra.mxu0 %v1381_v58 }
 0x133   : > { %1323 = vmatmul.f32.gmra.mxu2 %v4783_v32  ;;  %1688 = vmatpush.msra.mxu3 %v1461_v9 }
 0x134   : > { %3749 = vmatmul.msk.f32.gmra.mxu3 %vm1114_vm4, %v4785_v33  ;;  %1268 = vmatmul.f32.gmra.mxu0 %v4787_v34 }
 0x135   : > { %1297 = vmatmul.f32.gmra.mxu1 %v4789_v42  ;;  %1648 = vmatpush.msra.mxu2 %v1451_v57 }
 0x136   : > { %1622 = vmatpush.msra.mxu1 %v1413_v59  ;;  %1594 = vmatpush.msra.mxu0 %v1379_v63 }
 0x137   : > { %1649 = vmatpush.msra.mxu2 %v1449_v20  ;;  %1689 = vmatpush.msra.mxu3 %v1459_v5 }
 0x138   : > { %1623 = vmatpush.msra.mxu1 %v1411_v54  ;;  %1595 = vmatpush.msra.mxu0 %v1377_v12 }
 0x139   : > { %1650 = vmatpush.msra.mxu2 %v1447_v55  ;;  %1690 = vmatpush.msra.mxu3 %v1457_v14 }
 0x13a   : > { %1624 = vmatpush.msra.mxu1 %v1409_v60  ;;  %1596 = vmatpush.msra.mxu0 %v1375_v43 }
 0x13b   : > { %1326 = vmatmul.f32.gmra.mxu2 %v4802_v36 }
 0x13c   : > { %3750 = vmatmul.msk.f32.gmra.mxu3 %vm1114_vm4, %v4804_v37  ;;  %1488 = vmatmul.f32.vlgmr.msrb.gmra.mxu0 %v4711_v26 }
 0x13d   : > { %1517 = vmatmul.f32.vlgmr.msrb.gmra.mxu1 %v4713_v27  ;;  %1651 = vmatpush.msra.mxu2 %v1445_v45 }
 0x13e   : > { %1625 = vmatpush.msra.mxu1 %v1407_v44  ;;  %1597 = vmatpush.msra.mxu0 %v1373_v8 }
 0x13f   : > { %1652 = vmatpush.msra.mxu2 %v1443_v40 }
 0x140   : > { %1626 = vmatpush.msra.mxu1 %v1405_v41  ;;  %1598 = vmatpush.msra.mxu0 %v1371_v13 }
 0x141   : > { %1653 = vmatpush.msra.mxu2 %v1441_v49 }
 0x142   : > { %1627 = vmatpush.msra.mxu1 %v1403_v4  ;;  %1599 = vmatpush.msra.mxu0 %v1369_v28 }
 0x143   : > { %1546 = vmatmul.f32.vlgmr.msrb.gmra.mxu2 %v4733_v23 }
 0x144   : > { %3751 = vmatmul.msk.f32.vlgmr.msrb.gmra.mxu3 %vm1114_vm4, %v4735_v15  ;;  %1491 = vmatmul.f32.gmra.mxu0 %v4737_v16 }
 0x145   : > { %1520 = vmatmul.f32.gmra.mxu1 %v4739_v17  ;;  %1654 = vmatpush.msra.mxu2 %v1439_v3 }
 0x146   : > { %1628 = vmatpush.msra.mxu1 %v1401_v29  ;;  %1600 = vmatpush.msra.mxu0 %v1367_v35 }
 0x147   : > { %1655 = vmatpush.msra.mxu2 %v1437_v22 }
 0x148   : > { %1629 = vmatpush.msra.mxu1 %v1399_v18  ;;  %1601 = vmatpush.msra.mxu0 %v1365_v30 }
 0x149   : > { %1656 = vmatpush.msra.mxu2 %v1435_v6 }
 0x14a   : > { %1630 = vmatpush.msra.mxu1 %v1397_v7  ;;  %1602 = vmatpush.msra.mxu0 %v1363_v21 }
 0x14b   : > { %1549 = vmatmul.f32.gmra.mxu2 %v4758_v46 }
 0x14c   : > { %3752 = vmatmul.msk.f32.gmra.mxu3 %vm1114_vm4, %v4760_v47  ;;  %1494 = vmatmul.f32.gmra.mxu0 %v4762_v38 }
 0x14d   : > { %1523 = vmatmul.f32.gmra.mxu1 %v4764_v61  ;;  %1657 = vmatpush.msra.mxu2 %v1433_v31 }
 0x14e   : > { %1631 = vmatpush.msra.mxu1 %v1395_v53  ;;  %1603 = vmatpush.msra.mxu0 %v1361_v25 }
 0x14f   : > { %1658 = vmatpush.msra.mxu2 %v1431_v24 }
 0x150   : > { %1632 = vmatpush.msra.mxu1 %v1393_v50 }
 0x151   : > { %1659 = vmatpush.msra.mxu2 %v1429_v51 }
 0x153   : > { %1552 = vmatmul.f32.gmra.mxu2 %v4783_v32 }
 0x154   : > { %3753 = vmatmul.msk.f32.gmra.mxu3 %vm1114_vm4, %v4785_v33  ;;  %1497 = vmatmul.f32.gmra.mxu0 %v4787_v34 }
 0x155   : > { %1526 = vmatmul.f32.gmra.mxu1 %v4789_v42  ;;  %1660 = vmatpush.msra.mxu2 %v1427_v52 }
 0x157   : > { %1661 = vmatpush.msra.mxu2 %v1425_v0 }
 0x15b   : > { %1555 = vmatmul.f32.gmra.mxu2 %v4802_v36 }
 0x15c   : > { %3754 = vmatmul.msk.f32.gmra.mxu3 %vm1114_vm4, %v4804_v37  ;;  %1604 = vmatmul.f32.vlgmr.msra.gmra.mxu0 %v4711_v26 }
 0x15d   : > { %1633 = vmatmul.f32.vlgmr.msra.gmra.mxu1 %v4713_v27 }
 0x163   : > { %1662 = vmatmul.f32.vlgmr.msra.gmra.mxu2 %v4733_v23 }
 0x164   : > { %3755 = vmatmul.msk.f32.vlgmr.msra.gmra.mxu3 %vm1114_vm4, %v4735_v15  ;;  %1607 = vmatmul.f32.gmra.mxu0 %v4737_v16 }
 0x165   : > { %1636 = vmatmul.f32.gmra.mxu1 %v4739_v17 }
 0x16b   : > { %1665 = vmatmul.f32.gmra.mxu2 %v4758_v46 }
 0x16c   : > { %3756 = vmatmul.msk.f32.gmra.mxu3 %vm1114_vm4, %v4760_v47  ;;  %1610 = vmatmul.f32.gmra.mxu0 %v4762_v38 }
 0x16d   : > { %1639 = vmatmul.f32.gmra.mxu1 %v4764_v61 }
 0x173   : > { %1668 = vmatmul.f32.gmra.mxu2 %v4783_v32 }
 0x174   : > { %3757 = vmatmul.msk.f32.gmra.mxu3 %vm1114_vm4, %v4785_v33  ;;  %1613 = vmatmul.f32.gmra.mxu0 %v4787_v34 }
 0x175   : > { %1642 = vmatmul.f32.gmra.mxu1 %v4789_v42 }
 0x179   : > { %v1144_v26 = vpop.f32.mrf.mxu0 }
 0x17a   : > { %v1173_v27 = vpop.f32.mrf.mxu1 }
 0x17b   : > { %1671 = vmatmul.f32.gmra.mxu2 %v4802_v36  ;;  %v1174_v40 = vadd.f32 %v1173_v27, %v1144_v26 }
 0x17c   : > { %3758 = vmatmul.msk.f32.gmra.mxu3 %vm1114_vm4, %v4804_v37 }
 0x181   : > { %v4869_v23 = vpop.f32.mrf.mxu0 }
 0x182   : > { %v4871_v15 = vpop.f32.mrf.mxu1 }
 0x186   : > { %v1202_v16 = vpop.f32.mrf.mxu2 }
 0x187   : > { %v1231_v17 = vpop.f32.mrf.mxu3  ;;  %v1203_v48 = vadd.f32 %v1202_v16, %v1174_v40 }
 0x189   : > { %v4873_v46 = vpop.f32.mrf.mxu0  ;;  %v1232_v13 = vadd.f32 %v1231_v17, %v1203_v48 }
 0x18a   : > { %v4875_v47 = vpop.f32.mrf.mxu1 }
 0x18e   : > { %v4877_v38 = vpop.f32.mrf.mxu2 }
 0x18f   : > { %v4879_v61 = vpop.f32.mrf.mxu3 }
 0x191   : > { %v4881_v32 = vpop.f32.mrf.mxu0 }
 0x192   : > { %v4883_v33 = vpop.f32.mrf.mxu1 }
 0x196   : > { %v4885_v34 = vpop.f32.mrf.mxu2 }
 0x197   : > { %v4887_v42 = vpop.f32.mrf.mxu3 }
 0x199   : > { %v1260_v36 = vpop.f32.mrf.mxu0 }
 0x19a   : > { %v1289_v37 = vpop.f32.mrf.mxu1 }
 0x19b   : > { %v1290_v25 = vadd.f32 %v1289_v37, %v1260_v36 }
 0x19e   : > { %v4889_v1 = vpop.f32.mrf.mxu2 }
 0x19f   : > { %v4891_v10 = vpop.f32.mrf.mxu3 }
 0x1a1   : > { %v1263_v39 = vpop.f32.mrf.mxu0 }
 0x1a2   : > { %v1292_v56 = vpop.f32.mrf.mxu1 }
 0x1a6   : > { %v1318_v57 = vpop.f32.mrf.mxu2 }
 0x1a7   : > { %v1347_v58 = vpop.f32.mrf.mxu3  ;;  %v1319_v50 = vadd.f32 %v1318_v57, %v1290_v25 }
 0x1a9   : > { %v4893_v59 = vpop.f32.mrf.mxu0  ;;  %v1348_v40 = vadd.f32 %v1347_v58, %v1319_v50 }
 0x1aa   : > { %v4895_v19 = vpop.f32.mrf.mxu1 }
 0x1ae   : > { %v1321_v20 = vpop.f32.mrf.mxu2 }
 0x1af   : > { %v4897_v62 = vpop.f32.mrf.mxu3 }
 0x1b1   : > { %v4899_v63 = vpop.f32.mrf.mxu0 }
 0x1b2   : > { %v4901_v54 = vpop.f32.mrf.mxu1 }
 0x1b6   : > { %v4903_v55 = vpop.f32.mrf.mxu2 }
 0x1b7   : > { %v4905_v11 = vpop.f32.mrf.mxu3 }
 0x1b9   : > { %v1489_v12 = vpop.f32.mrf.mxu0 }
 0x1ba   : > { %v1518_v60 = vpop.f32.mrf.mxu1 }
 0x1bb   : > { %v1519_v8 = vadd.f32 %v1518_v60, %v1489_v12  ;;  %v1177_v12 = vadd.f32 %v4871_v15, %v4869_v23  ;;  %v1180_v15 = vadd.f32 %v4875_v47, %v4873_v46  ;;  %v1908_v46 = vld [vmem:[%s7076_s4 + $0x160] sm:$0xff] }
 0x1be   : > { %v4907_v45 = vpop.f32.mrf.mxu2 }
 0x1bf   : > { %v4909_v2 = vpop.f32.mrf.mxu3 }
 0x1c1   : > { %v1492_v43 = vpop.f32.mrf.mxu0 }
 0x1c2   : > { %v1521_v44 = vpop.f32.mrf.mxu1 }
 0x1c3   : > { %v1522_v26 = vadd.f32 %v1521_v44, %v1492_v43 }
 0x1c6   : > { %v1547_v41 = vpop.f32.mrf.mxu2 }
 0x1c7   : > { %v1576_v49 = vpop.f32.mrf.mxu3  ;;  %v1548_v9 = vadd.f32 %v1547_v41, %v1519_v8  ;;  %v1206_v8 = vadd.f32 %v4877_v38, %v1177_v12  ;;  %v1293_v41 = vadd.f32 %v1292_v56, %v1263_v39 }
 0x1c9   : > { %v1577_v4 = vadd.f32 %v1576_v49, %v1548_v9  ;;  %v1495_v3 = vpop.f32.mrf.mxu0  ;;  %v1322_v36 = vadd.f32 %v1321_v20, %v1293_v41  ;;  %v1235_v43 = vadd.f32 %v4879_v61, %v1206_v8  ;;  %v3804_v20 = vld [vmem:[%s7076_s4 + $0x408] sm:$0xff]  ;;  %v3805_v61 = vld [vmem:[%s7076_s4 + $0x410] sm:$0xff] }
 0x1ca   : > { %v1524_v5 = vpop.f32.mrf.mxu1  ;;  %2054 = vmatpush.msrb.mxu0 %v3804_v20  ;;  %2100 = vmatpush.msrb.mxu2 %v3805_v61  ;;  %v3792_v41 = vld [vmem:[%s7076_s4 + $0x3a8] sm:$0xff] }
 0x1cb   : > { %v1704_v28 = vmax.f32 %v1232_v13, %v1577_v4  ;;  %v1726_v13 = vlaneseq  ;;  %v1525_v44 = vadd.f32 %v1524_v5, %v1495_v3  ;;  %v1351_v3 = vadd.f32 %v4897_v62, %v1322_v36  ;;  %v3801_v62 = vld [vmem:[%s7076_s4 + $0x3f0] sm:$0xff]  ;;  %v3780_v61 = vld [vmem:[%s7076_s4 + $0x348] sm:$0xff] }
 0x1cc   : > { %2055 = vmatpush.msrb.mxu0 %v3801_v62  ;;  %v3789_v36 = vld [vmem:[%s7076_s4 + $0x390] sm:$0xff] }
 0x1cd   : > { %v1714_v29 = vrot.slane %v1704_v28, 1  ;;  %vm4939_vm6 = vcmp.lt.s32.totalorder %v1726_v13, 224  ;;  %v3841_v62 = vld [vmem:[%s7076_s4 + $0x530] sm:$0xff]  ;;  %vm6858_vm8 = vcmp.lt.s32.totalorder %v1726_v13, 192 }
 0x1ce   : > { %v1550_v22 = vpop.f32.mrf.mxu2  ;;  %2127 = vmatpush.msrb.mxu3 %v3841_v62  ;;  %v1945_v62 = vld [vmem:[%s7076_s4 + $0x288] sm:$0xff] }
 0x1cf   : > { %v1579_v14 = vpop.f32.mrf.mxu3  ;;  %v4911_v35 = vmax.f32 %v1704_v28, %v1714_v29  ;;  %v1551_v60 = vadd.f32 %v1550_v22, %v1522_v26  ;;  %v1209_v22 = vadd.f32 %v4885_v34, %v1180_v15 }
 0x1d1   : > { %1732 = vst [vmem:[#allocation1] sm:$0xff] %v4911_v35  ;;  %v4914_v18 = vpop.f32.mrf.mxu0  ;;  %v1580_v9 = vadd.f32 %v1579_v14, %v1551_v60  ;;  %v1296_v14 = vadd.f32 %v4895_v19, %v4893_v59  ;;  %v3798_v59 = vld [vmem:[%s7076_s4 + $0x3d8] sm:$0xff]  ;;  %v3799_v19 = vld [vmem:[%s7076_s4 + $0x3e0] sm:$0xff] }
 0x1d2   : > { %v4916_v6 = vpop.f32.mrf.mxu1  ;;  %2056 = vmatpush.msrb.mxu0 %v3798_v59  ;;  %v3775_v59 = vld [vmem:[%s7076_s4 + $0x320] sm:$0xff] }
 0x1d3   : > { %v1706_v58 = vmax.f32 %v1235_v43, %v1580_v9  ;;  %v1325_v25 = vadd.f32 %v4903_v55, %v1296_v14  ;;  %v3786_v43 = vld [vmem:[%s7076_s4 + $0x378] sm:$0xff] }
 0x1d5   : > { %v1758_v34 = vrot.slane %v1706_v58, 1  ;;  %v1354_v60 = vadd.f32 %v4905_v11, %v1325_v25  ;;  %v1299_v11 = vadd.f32 %v4901_v54, %v4899_v63 }
 0x1d6   : > { %v1553_v30 = vpop.f32.mrf.mxu2 }
 0x1d7   : > { %v1582_v7 = vpop.f32.mrf.mxu3  ;;  %v1554_v38 = vadd.f32 %v1553_v30, %v1525_v44  ;;  %v3802_v30 = vld [vmem:[%s7076_s4 + $0x3f8] sm:$0xff] }
 0x1d8   : > { %2101 = vmatpush.msrb.mxu2 %v3802_v30  ;;  %v3777_v30 = vld [vmem:[%s7076_s4 + $0x330] sm:$0xff] }
 0x1d9   : > { %v1605_v31 = vpop.f32.mrf.mxu0  ;;  %v1583_v50 = vadd.f32 %v1582_v7, %v1554_v38  ;;  %v3795_v7 = vld [vmem:[%s7076_s4 + $0x3c0] sm:$0xff] }
 0x1da   : > { %v1634_v21 = vpop.f32.mrf.mxu1  ;;  %2102 = vmatpush.msrb.mxu2 %v3799_v19  ;;  %2057 = vmatpush.msrb.mxu0 %v3795_v7 }
 0x1db   : > { %v1635_v51 = vadd.f32 %v1634_v21, %v1605_v31 }
 0x1dc   : > { %2058 = vmatpush.msrb.mxu0 %v3792_v41 }
 0x1de   : > { %v4918_v53 = vpop.f32.mrf.mxu2  ;;  %2059 = vmatpush.msrb.mxu0 %v3789_v36  ;;  %v3763_v36 = vld [vmem:[%s7076_s4 + $0x2c0] sm:$0xff] }
 0x1df   : > { %v4920_v24 = vpop.f32.mrf.mxu3 }
 0x1e0   : > { %2060 = vmatpush.msrb.mxu0 %v3786_v43  ;;  %v3806_v43 = vld [vmem:[%s7076_s4 + $0x418] sm:$0xff] }
 0x1e1   : > { %v1608_v52 = vpop.f32.mrf.mxu0 }
 0x1e2   : > { %v1637_v0 = vpop.f32.mrf.mxu1 }
 0x1e3   : > { %v1638_v37 = vadd.f32 %v1637_v0, %v1608_v52  ;;  %v1238_v0 = vadd.f32 %v4887_v42, %v1209_v22  ;;  %v1183_v42 = vadd.f32 %v4883_v33, %v4881_v32 }
 0x1e6   : > { %v1663_v27 = vpop.f32.mrf.mxu2 }
 0x1e7   : > { %v1692_v16 = vpop.f32.mrf.mxu3  ;;  %v1664_v17 = vadd.f32 %v1663_v27, %v1635_v51  ;;  %v3796_v27 = vld [vmem:[%s7076_s4 + $0x3c8] sm:$0xff] }
 0x1e8   : > { %2103 = vmatpush.msrb.mxu2 %v3796_v27  ;;  %v3832_v27 = vld [vmem:[%s7076_s4 + $0x4e8] sm:$0xff] }
 0x1e9   : > { %v1693_v48 = vadd.f32 %v1692_v16, %v1664_v17  ;;  %v1611_v39 = vpop.f32.mrf.mxu0  ;;  %v1528_v16 = vadd.f32 %v4916_v6, %v4914_v18  ;;  %v3793_v18 = vld [vmem:[%s7076_s4 + $0x3b0] sm:$0xff] }
 0x1ea   : > { %v1640_v56 = vpop.f32.mrf.mxu1  ;;  %2104 = vmatpush.msrb.mxu2 %v3793_v18  ;;  %v3765_v18 = vld [vmem:[%s7076_s4 + $0x2d0] sm:$0xff] }
 0x1eb   : > { %v1705_v49 = vmax.f32 %v1348_v40, %v1693_v48  ;;  %v1641_v51 = vadd.f32 %v1640_v56, %v1611_v39  ;;  %v4978_v40 = vmax.f32 %v1706_v58, %v1758_v34  ;;  %v1708_v48 = vmax.f32 %v1238_v0, %v1583_v50  ;;  %v3784_v58 = vld [vmem:[%s7076_s4 + $0x368] sm:$0xff]  ;;  %v3838_v34 = vld [vmem:[%s7076_s4 + $0x518] sm:$0xff]  ;;  %v3771_v0 = vld [vmem:[%s7076_s4 + $0x300] sm:$0xff] }
 0x1ec   : > { %v1557_v6 = vadd.f32 %v4918_v53, %v1528_v16  ;;  %v3790_v53 = vld [vmem:[%s7076_s4 + $0x398] sm:$0xff]  ;;  %2128 = vmatpush.msrb.mxu3 %v3838_v34  ;;  %v3768_v16 = vld [vmem:[%s7076_s4 + $0x2e8] sm:$0xff] }
 0x1ed   : > { %v1715_v57 = vrot.slane %v1705_v49, 1  ;;  %2105 = vmatpush.msrb.mxu2 %v3790_v53  ;;  %v1798_v44 = vrot.slane %v1708_v48, 1  ;;  %v3774_v50 = vld [vmem:[%s7076_s4 + $0x318] sm:$0xff]  ;;  %v3823_v53 = vld [vmem:[%s7076_s4 + $0x4a0] sm:$0xff]  ;;  %v3836_v34 = vld [vmem:[%s7076_s4 + $0x508] sm:$0xff] }
 0x1ee   : > { %v1666_v4 = vpop.f32.mrf.mxu2 }
 0x1ef   : > { %v1695_v28 = vpop.f32.mrf.mxu3  ;;  %v4926_v29 = vmax.f32 %v1705_v49, %v1715_v57  ;;  %v1667_v23 = vadd.f32 %v1666_v4, %v1638_v37  ;;  %v1212_v37 = vadd.f32 %v4889_v1, %v1183_v42  ;;  %v1328_v57 = vadd.f32 %v4907_v45, %v1299_v11  ;;  %v3787_v1 = vld [vmem:[%s7076_s4 + $0x380] sm:$0xff]  ;;  %v3769_v42 = vld [vmem:[%s7076_s4 + $0x2f0] sm:$0xff]  ;;  %v3826_v11 = vld [vmem:[%s7076_s4 + $0x4b8] sm:$0xff] }
 0x1f0   : > { %v1586_v4 = vadd.f32 %v4920_v24, %v1557_v6  ;;  %2106 = vmatpush.msrb.mxu2 %v3787_v1  ;;  %v3783_v45 = vld [vmem:[%s7076_s4 + $0x360] sm:$0xff]  ;;  %v3825_v6 = vld [vmem:[%s7076_s4 + $0x4b0] sm:$0xff]  ;;  %v1909_v1 = vld [vmem:[%s7076_s4 + $0x168] sm:$0xff] }
 0x1f1   : > { %v1722_v5 = vrot.slane %v4926_v29, 7  ;;  %1733 = vst [vmem:[#allocation1 + $0x9] sm:$0xff] %v4926_v29  ;;  %v1696_v47 = vadd.f32 %v1695_v28, %v1667_v23  ;;  %v1614_v49 = vpop.f32.mrf.mxu0  ;;  %v1241_v38 = vadd.f32 %v4891_v10, %v1212_v37  ;;  %2061 = vmatpush.msrb.mxu0 %v3783_v45  ;;  %v1357_v24 = vadd.f32 %v4909_v2, %v1328_v57  ;;  %v3781_v10 = vld [vmem:[%s7076_s4 + $0x350] sm:$0xff]  ;;  %v3759_v37 = vld [vmem:[%s7076_s4 + $0x2a0] sm:$0xff]  ;;  %v3820_v57 = vld [vmem:[%s7076_s4 + $0x488] sm:$0xff] }
 0x1f2   : > { %v1643_v9 = vpop.f32.mrf.mxu1  ;;  %2107 = vmatpush.msrb.mxu2 %v3784_v58  ;;  %v3814_v45 = vld [vmem:[%s7076_s4 + $0x458] sm:$0xff]  ;;  %v3800_v58 = vld [vmem:[%s7076_s4 + $0x3e8] sm:$0xff] }
 0x1f3   : > { %v1724_v31 = vsel %vm1723_vm5, %v4911_v35, %v1722_v5  ;;  %v1707_v21 = vmax.f32 %v1351_v3, %v1696_v47  ;;  %v1644_v28 = vadd.f32 %v1643_v9, %v1614_v49  ;;  %v3840_v3 = vld [vmem:[%s7076_s4 + $0x528] sm:$0xff]  ;;  %v5032_v5 = vmax.f32 %v1708_v48, %v1798_v44  ;;  %2062 = vmatpush.msrb.mxu0 %v3780_v61  ;;  %v3762_v49 = vld [vmem:[%s7076_s4 + $0x2b8] sm:$0xff]  ;;  %v3797_v61 = vld [vmem:[%s7076_s4 + $0x3d0] sm:$0xff] }
 0x1f4   : > { %1730 = vst.msk [vmem:[#allocation2] ss:$8 sm:$0x3] %vm4939_vm6, %v1724_v31  ;;  %v1710_v47 = vmax.f32 %v1241_v38, %v1586_v4  ;;  %2081 = vmatpush.msrb.mxu1 %v3840_v3  ;;  %2108 = vmatpush.msrb.mxu2 %v3781_v10  ;;  %v3837_v31 = vld [vmem:[%s7076_s4 + $0x510] sm:$0xff]  ;;  %v3822_v9 = vld [vmem:[%s7076_s4 + $0x498] sm:$0xff]  ;;  %v3816_v44 = vld [vmem:[%s7076_s4 + $0x468] sm:$0xff] }
 0x1f5   : > { %v1759_v52 = vrot.slane %v1707_v21, 1  ;;  %2063 = vmatpush.msrb.mxu0 %v3777_v30  ;;  %v3817_v4 = vld [vmem:[%s7076_s4 + $0x470] sm:$0xff]  ;;  %v1903_v38 = vld [vmem:[%s7076_s4 + $0x138] sm:$0xff]  ;;  %v1900_v3 = vld [vmem:[%s7076_s4 + $0x120] sm:$0xff] }
 0x1f6   : > { %v1669_v55 = vpop.f32.mrf.mxu2  ;;  %2082 = vmatpush.msrb.mxu1 %v3837_v31  ;;  %v1838_v19 = vrot.slane %v1710_v47, 1  ;;  %v3807_v10 = vld [vmem:[%s7076_s4 + $0x420] sm:$0xff] }
 0x1f7   : > { %v1698_v26 = vpop.f32.mrf.mxu3  ;;  %v4973_v17 = vmax.f32 %v1707_v21, %v1759_v52  ;;  %v1670_v12 = vadd.f32 %v1669_v55, %v1641_v51  ;;  %v3778_v21 = vld [vmem:[%s7076_s4 + $0x338] sm:$0xff]  ;;  %2064 = vmatpush.msrb.mxu0 %v3774_v50  ;;  %v3835_v52 = vld [vmem:[%s7076_s4 + $0x500] sm:$0xff] }
 0x1f8   : > { %v1735_v8 = vld [vmem:[#allocation1 + $0x2] ss:$9 sm:$0xff]  ;;  %2109 = vmatpush.msrb.mxu2 %v3778_v21  ;;  %2129 = vmatpush.msrb.mxu3 %v3835_v52 }
 0x1f9   : > { %1740 = vst [vmem:[#allocation1] sm:$0xff] %v4911_v35  ;;  %v1766_v32 = vrot.slane %v4973_v17, 7  ;;  %v1699_v33 = vadd.f32 %v1698_v26, %v1670_v12  ;;  %v3831_v55 = vld [vmem:[%s7076_s4 + $0x4e0] sm:$0xff]  ;;  %v3772_v26 = vld [vmem:[%s7076_s4 + $0x308] sm:$0xff]  ;;  %2065 = vmatpush.msrb.mxu0 %v3771_v0  ;;  %v1894_v21 = vld [vmem:[%s7076_s4 + $0xf0] sm:$0xff] }
 0x1fa   : > { %1741 = vst [vmem:[#allocation1 + $0x9] sm:$0xff] %v4926_v29  ;;  %2110 = vmatpush.msrb.mxu2 %v3775_v59  ;;  %2130 = vmatpush.msrb.mxu3 %v3832_v27  ;;  %v3828_v12 = vld [vmem:[%s7076_s4 + $0x4c8] sm:$0xff]  ;;  %v3791_v30 = vld [vmem:[%s7076_s4 + $0x3a0] sm:$0xff]  ;;  %v1891_v50 = vld [vmem:[%s7076_s4 + $0xd8] sm:$0xff] }
 0x1fb   : > { %1738 = vst.msk [vmem:[#allocation2 + $0x1] ss:$8 sm:$0x3] %vm4939_vm6, %v1735_v8  ;;  %v1767_v63 = vsel %vm1723_vm5, %v4978_v40, %v1766_v32  ;;  %v1709_v54 = vmax.f32 %v1354_v60, %v1699_v33  ;;  %v5093_v60 = vmax.f32 %v1710_v47, %v1838_v19  ;;  %2066 = vmatpush.msrb.mxu0 %v3768_v16  ;;  %v3829_v8 = vld [vmem:[%s7076_s4 + $0x4d0] sm:$0xff]  ;;  %v3766_v33 = vld [vmem:[%s7076_s4 + $0x2d8] sm:$0xff]  ;;  %v3808_v47 = vld [vmem:[%s7076_s4 + $0x428] sm:$0xff] }
 0x1fc   : > { %1770 = vst.msk [vmem:[#allocation2 + $0x4] ss:$8 sm:$0x3] %vm4939_vm6, %v1767_v63  ;;  %2111 = vmatpush.msrb.mxu2 %v3772_v26  ;;  %2131 = vmatpush.msrb.mxu3 %v3829_v8  ;;  %v3819_v63 = vld [vmem:[%s7076_s4 + $0x480] sm:$0xff]  ;;  %v3785_v59 = vld [vmem:[%s7076_s4 + $0x370] sm:$0xff]  ;;  %v3830_v26 = vld [vmem:[%s7076_s4 + $0x4d8] sm:$0xff] }
 0x1fd   : > { %v1799_v23 = vrot.slane %v1709_v54, 1  ;;  %2067 = vmatpush.msrb.mxu0 %v3765_v18  ;;  %v3839_v31 = vld [vmem:[%s7076_s4 + $0x520] sm:$0xff]  ;;  %v3833_v19 = vld [vmem:[%s7076_s4 + $0x4f0] sm:$0xff]  ;;  %v1885_v27 = vld [vmem:[%s7076_s4 + $0xa8] sm:$0xff] }
 0x1fe   : > { %v1672_v15 = vpop.f32.mrf.mxu2  ;;  %2112 = vmatpush.msrb.mxu2 %v3769_v42  ;;  %2132 = vmatpush.msrb.mxu3 %v3826_v11  ;;  %v1888_v52 = vld [vmem:[%s7076_s4 + $0xc0] sm:$0xff]  ;;  %v1930_v42 = vld [vmem:[%s7076_s4 + $0x210] sm:$0xff]  ;;  %v3824_v8 = vld [vmem:[%s7076_s4 + $0x4a8] sm:$0xff] }
 0x1ff   : > { %v5020_v39 = vmax.f32 %v1709_v54, %v1799_v23  ;;  %v1673_v56 = vadd.f32 %v1672_v15, %v1644_v28  ;;  %v1701_v20 = vpop.f32.mrf.mxu3  ;;  %2068 = vmatpush.msrb.mxu0 %v3762_v49  ;;  %v3760_v54 = vld [vmem:[%s7076_s4 + $0x2a8] sm:$0xff]  ;;  %v3803_v28 = vld [vmem:[%s7076_s4 + $0x400] sm:$0xff]  ;;  %v1906_v23 = vld [vmem:[%s7076_s4 + $0x150] sm:$0xff] }
 0x200   : > { %2113 = vmatpush.msrb.mxu2 %v3766_v33  ;;  %2133 = vmatpush.msrb.mxu3 %v3823_v53  ;;  %v3813_v15 = vld [vmem:[%s7076_s4 + $0x450] sm:$0xff]  ;;  %v1936_v0 = vld [vmem:[%s7076_s4 + $0x240] sm:$0xff]  ;;  %v1927_v18 = vld [vmem:[%s7076_s4 + $0x1f8] sm:$0xff] }
 0x201   : > { %v1743_v22 = vld [vmem:[#allocation1 + $0x4] ss:$9 sm:$0xff]  ;;  %v1806_v14 = vrot.slane %v5020_v39, 7  ;;  %v1702_v2 = vadd.f32 %v1701_v20, %v1673_v56  ;;  %2069 = vmatpush.msrb.mxu0 %v3759_v37 }
 0x202   : > { %1748 = vst [vmem:[#allocation1] sm:$0xff] %v4911_v35  ;;  %2114 = vmatpush.msrb.mxu2 %v3763_v36  ;;  %2134 = vmatpush.msrb.mxu3 %v3820_v57  ;;  %v3811_v20 = vld [vmem:[%s7076_s4 + $0x440] sm:$0xff]  ;;  %v3818_v36 = vld [vmem:[%s7076_s4 + $0x478] sm:$0xff]  ;;  %v1873_v53 = vld [vmem:[%s7076_s4 + $0x48] sm:$0xff] }
 0x203   : > { %1749 = vst [vmem:[#allocation1 + $0x9] sm:$0xff] %v4926_v29  ;;  %v1807_v25 = vsel %vm1723_vm5, %v5032_v5, %v1806_v14  ;;  %v1711_v35 = vmax.f32 %v1357_v24, %v1702_v2  ;;  %v3834_v29 = vld [vmem:[%s7076_s4 + $0x4f8] sm:$0xff]  ;;  %2146 = vmatpush.msra.mxu0 %v3806_v43  ;;  %v1897_v2 = vld [vmem:[%s7076_s4 + $0x108] sm:$0xff]  ;;  %v3779_v16 = vld [vmem:[%s7076_s4 + $0x340] sm:$0xff] }
 0x204   : > { %1746 = vst.msk [vmem:[#allocation2 + $0x2] ss:$8 sm:$0x3] %vm4939_vm6, %v1743_v22  ;;  %2083 = vmatpush.msrb.mxu1 %v3834_v29  ;;  %2115 = vmatpush.msrb.mxu2 %v3760_v54  ;;  %v3810_v24 = vld [vmem:[%s7076_s4 + $0x438] sm:$0xff]  ;;  %v1876_v33 = vld [vmem:[%s7076_s4 + $0x60] sm:$0xff]  ;;  %v1921_v37 = vld [vmem:[%s7076_s4 + $0x1c8] sm:$0xff] }
 0x205   : > { %1810 = vst.msk [vmem:[#allocation2 + $0x10] ss:$8 sm:$0x3] %vm4939_vm6, %v1807_v25  ;;  %v1839_v51 = vrot.slane %v1711_v35, 1  ;;  %2135 = vmatpush.msrb.mxu3 %v3817_v4  ;;  %2147 = vmatpush.msra.mxu0 %v3803_v28  ;;  %v3794_v22 = vld [vmem:[%s7076_s4 + $0x3b8] sm:$0xff]  ;;  %v1942_v25 = vld [vmem:[%s7076_s4 + $0x270] sm:$0xff] }
 0x206   : > { %2084 = vmatpush.msrb.mxu1 %v3831_v55  ;;  %2198 = vmatpush.msra.mxu2 %v1909_v1  ;;  %v3842_v14 = vld [vmem:[%s7076_s4 + $0x538] sm:$0xff]  ;;  %v1924_v11 = vld [vmem:[%s7076_s4 + $0x1e0] sm:$0xff]  ;;  %v1870_v57 = vld [vmem:[%s7076_s4 + $0x30] sm:$0xff] }
 0x207   : > { %v5079_v7 = vmax.f32 %v1711_v35, %v1839_v51  ;;  %2136 = vmatpush.msrb.mxu3 %v3814_v45  ;;  %2148 = vmatpush.msra.mxu0 %v3800_v58  ;;  %v3788_v35 = vld [vmem:[%s7076_s4 + $0x388] sm:$0xff]  ;;  %v1939_v29 = vld [vmem:[%s7076_s4 + $0x258] sm:$0xff]  ;;  %v3815_v54 = vld [vmem:[%s7076_s4 + $0x460] sm:$0xff] }
 0x208   : > { %2085 = vmatpush.msrb.mxu1 %v3828_v12  ;;  %2199 = vmatpush.msra.mxu2 %v1906_v23  ;;  %v3782_v55 = vld [vmem:[%s7076_s4 + $0x358] sm:$0xff]  ;;  %v1882_v12 = vld [vmem:[%s7076_s4 + $0x90] sm:$0xff]  ;;  %v3764_v1 = vld [vmem:[%s7076_s4 + $0x2c8] sm:$0xff] }
 0x209   : > { %v1846_v48 = vrot.slane %v5079_v7, 7  ;;  %2137 = vmatpush.msrb.mxu3 %v3811_v20  ;;  %2149 = vmatpush.msra.mxu0 %v3797_v61  ;;  %v1918_v43 = vld [vmem:[%s7076_s4 + $0x1b0] sm:$0xff]  ;;  %v1867_v4 = vld [vmem:[%s7076_s4 + $0x18] sm:$0xff]  ;;  %v1864_v45 = vld [vmem:[%s7076_s4] sm:$0xff] }
 0x20a   : > { %v1751_v41 = vld [vmem:[#allocation1 + $0x6] ss:$9 sm:$0xff]  ;;  %2086 = vmatpush.msrb.mxu1 %v3825_v6  ;;  %2200 = vmatpush.msra.mxu2 %v1903_v38 }
 0x20b   : > { %1754 = vst.msk [vmem:[#allocation2 + $0x3] ss:$8 sm:$0x3] %vm4939_vm6, %v1751_v41  ;;  %v1847_v32 = vsel %vm1723_vm5, %v5093_v60, %v1846_v48  ;;  %2138 = vmatpush.msrb.mxu3 %v3808_v47  ;;  %2150 = vmatpush.msra.mxu0 %v3794_v22  ;;  %v3776_v48 = vld [vmem:[%s7076_s4 + $0x328] sm:$0xff]  ;;  %v1879_v41 = vld [vmem:[%s7076_s4 + $0x78] sm:$0xff]  ;;  %v3773_v6 = vld [vmem:[%s7076_s4 + $0x310] sm:$0xff] }
 0x20c   : > { %1772 = vst [vmem:[#allocation1] sm:$0xff] %v4978_v40  ;;  %2087 = vmatpush.msrb.mxu1 %v3822_v9  ;;  %2201 = vmatpush.msra.mxu2 %v1900_v3  ;;  %v3770_v9 = vld [vmem:[%s7076_s4 + $0x2f8] sm:$0xff]  ;;  %v3761_v23 = vld [vmem:[%s7076_s4 + $0x2b0] sm:$0xff]  ;;  %v1912_v58 = vld [vmem:[%s7076_s4 + $0x180] sm:$0xff] }
 0x20d   : > { %1773 = vst [vmem:[#allocation1 + $0x9] sm:$0xff] %v4973_v17  ;;  %2225 = vmatpush.msra.mxu3 %v1945_v62  ;;  %2151 = vmatpush.msra.mxu0 %v3791_v30  ;;  %v1915_v28 = vld [vmem:[%s7076_s4 + $0x198] sm:$0xff] }
 0x20e   : > { %1850 = vst.msk [vmem:[#allocation2 + $0x14] ss:$8 sm:$0x3] %vm4939_vm6, %v1847_v32  ;;  %2088 = vmatpush.msrb.mxu1 %v3819_v63  ;;  %2202 = vmatpush.msra.mxu2 %v1897_v2  ;;  %v3821_v32 = vld [vmem:[%s7076_s4 + $0x490] sm:$0xff]  ;;  %v3767_v63 = vld [vmem:[%s7076_s4 + $0x2e0] sm:$0xff]  ;;  %v1911_v30 = vld [vmem:[%s7076_s4 + $0x178] sm:$0xff] }
 0x20f   : > { %2226 = vmatpush.msra.mxu3 %v1942_v25  ;;  %2152 = vmatpush.msra.mxu0 %v3788_v35  ;;  %v1946_v2 = vld [vmem:[%s7076_s4 + $0x290] sm:$0xff]  ;;  %v1943_v25 = vld [vmem:[%s7076_s4 + $0x278] sm:$0xff]  ;;  %v1944_v35 = vld [vmem:[%s7076_s4 + $0x280] sm:$0xff] }
 0x210   : > { %2089 = vmatpush.msrb.mxu1 %v3816_v44  ;;  %2203 = vmatpush.msra.mxu2 %v1894_v21  ;;  %v3812_v44 = vld [vmem:[%s7076_s4 + $0x448] sm:$0xff]  ;;  %v1907_v21 = vld [vmem:[%s7076_s4 + $0x158] sm:$0xff] }
 0x211   : > { %2227 = vmatpush.msra.mxu3 %v1939_v29  ;;  %2153 = vmatpush.msra.mxu0 %v3785_v59  ;;  %v1905_v29 = vld [vmem:[%s7076_s4 + $0x148] sm:$0xff] }
 0x212   : > { %2090 = vmatpush.msrb.mxu1 %v3813_v15  ;;  %2204 = vmatpush.msra.mxu2 %v1891_v50  ;;  %v3809_v15 = vld [vmem:[%s7076_s4 + $0x430] sm:$0xff]  ;;  %v1940_v50 = vld [vmem:[%s7076_s4 + $0x260] sm:$0xff]  ;;  %v1941_v59 = vld [vmem:[%s7076_s4 + $0x268] sm:$0xff] }
 0x213   : > { %2228 = vmatpush.msra.mxu3 %v1936_v0  ;;  %2154 = vmatpush.msra.mxu0 %v3782_v55  ;;  %v1938_v0 = vld [vmem:[%s7076_s4 + $0x250] sm:$0xff] }
 0x214   : > { %v1775_v56 = vld [vmem:[#allocation1 + $0x2] ss:$9 sm:$0xff]  ;;  %2091 = vmatpush.msrb.mxu1 %v3810_v24  ;;  %2205 = vmatpush.msra.mxu2 %v1888_v52 }
 0x215   : > { %1780 = vst [vmem:[#allocation1] sm:$0xff] %v4978_v40  ;;  %2155 = vmatpush.msra.mxu0 %v3779_v16  ;;  %v1902_v52 = vld [vmem:[%s7076_s4 + $0x130] sm:$0xff]  ;;  %v1895_v16 = vld [vmem:[%s7076_s4 + $0xf8] sm:$0xff] }
 0x216   : > { %1781 = vst [vmem:[#allocation1 + $0x9] sm:$0xff] %v4973_v17  ;;  %2092 = vmatpush.msrb.mxu1 %v3807_v10  ;;  %2206 = vmatpush.msra.mxu2 %v1885_v27  ;;  %v1898_v55 = vld [vmem:[%s7076_s4 + $0x110] sm:$0xff]  ;;  %v1899_v27 = vld [vmem:[%s7076_s4 + $0x118] sm:$0xff] }
 0x217   : > { %1778 = vst.msk [vmem:[#allocation2 + $0x5] ss:$8 sm:$0x3] %vm4939_vm6, %v1775_v56  ;;  %2156 = vmatpush.msra.mxu0 %v3776_v48  ;;  %v1892_v48 = vld [vmem:[%s7076_s4 + $0xe0] sm:$0xff] }
 0x218   : > { %2173 = vmatpush.msra.mxu1 %v3842_v14  ;;  %2207 = vmatpush.msra.mxu2 %v1882_v12  ;;  %v1896_v12 = vld [vmem:[%s7076_s4 + $0x100] sm:$0xff] }
 0x219   : > { %2157 = vmatpush.msra.mxu0 %v3773_v6  ;;  %v1889_v6 = vld [vmem:[%s7076_s4 + $0xc8] sm:$0xff] }
 0x21a   : > { %2174 = vmatpush.msra.mxu1 %v3839_v31  ;;  %2208 = vmatpush.msra.mxu2 %v1879_v41  ;;  %v1947_v31 = vld [vmem:[%s7076_s4 + $0x298] sm:$0xff]  ;;  %v1893_v41 = vld [vmem:[%s7076_s4 + $0xe8] sm:$0xff] }
 0x21b   : > { %2158 = vmatpush.msra.mxu0 %v3770_v9  ;;  %v1886_v9 = vld [vmem:[%s7076_s4 + $0xb0] sm:$0xff] }
 0x21c   : > { %2175 = vmatpush.msra.mxu1 %v3836_v34  ;;  %2209 = vmatpush.msra.mxu2 %v1876_v33  ;;  %v1904_v34 = vld [vmem:[%s7076_s4 + $0x140] sm:$0xff]  ;;  %v1890_v33 = vld [vmem:[%s7076_s4 + $0xd0] sm:$0xff] }
 0x21d   : > { %v1783_v51 = vld [vmem:[#allocation1 + $0x4] ss:$9 sm:$0xff]  ;;  %2159 = vmatpush.msra.mxu0 %v3767_v63 }
 0x21e   : > { %1788 = vst [vmem:[#allocation1] sm:$0xff] %v4978_v40  ;;  %2176 = vmatpush.msra.mxu1 %v3833_v19  ;;  %v1933_v40 = vld [vmem:[%s7076_s4 + $0x228] sm:$0xff]  ;;  %2210 = vmatpush.msra.mxu2 %v1873_v53  ;;  %v1923_v63 = vld [vmem:[%s7076_s4 + $0x1d8] sm:$0xff] }
 0x21f   : > { %1789 = vst [vmem:[#allocation1 + $0x9] sm:$0xff] %v4973_v17  ;;  %v3827_v17 = vld [vmem:[%s7076_s4 + $0x4c0] sm:$0xff]  ;;  %2229 = vmatpush.msra.mxu3 %v1933_v40  ;;  %2160 = vmatpush.msra.mxu0 %v3764_v1  ;;  %v1901_v19 = vld [vmem:[%s7076_s4 + $0x128] sm:$0xff]  ;;  %v1935_v40 = vld [vmem:[%s7076_s4 + $0x238] sm:$0xff] }
 0x220   : > { %1786 = vst.msk [vmem:[#allocation2 + $0x6] ss:$8 sm:$0x3] %vm4939_vm6, %v1783_v51  ;;  %2177 = vmatpush.msra.mxu1 %v3830_v26  ;;  %2211 = vmatpush.msra.mxu2 %v1870_v57  ;;  %v1937_v51 = vld [vmem:[%s7076_s4 + $0x248] sm:$0xff]  ;;  %v1934_v26 = vld [vmem:[%s7076_s4 + $0x230] sm:$0xff]  ;;  %v1919_v57 = vld [vmem:[%s7076_s4 + $0x1b8] sm:$0xff] }
 0x221   : > { %2230 = vmatpush.msra.mxu3 %v1930_v42  ;;  %2161 = vmatpush.msra.mxu0 %v3761_v23  ;;  %v1932_v42 = vld [vmem:[%s7076_s4 + $0x220] sm:$0xff]  ;;  %v1917_v23 = vld [vmem:[%s7076_s4 + $0x1a8] sm:$0xff] }
 0x222   : > { %2178 = vmatpush.msra.mxu1 %v3827_v17  ;;  %2212 = vmatpush.msra.mxu2 %v1867_v4  ;;  %v1931_v17 = vld [vmem:[%s7076_s4 + $0x218] sm:$0xff]  ;;  %v1920_v1 = vld [vmem:[%s7076_s4 + $0x1c0] sm:$0xff] }
 0x223   : > { %2231 = vmatpush.msra.mxu3 %v1927_v18  ;;  %v1929_v18 = vld [vmem:[%s7076_s4 + $0x208] sm:$0xff]  ;;  %v1916_v4 = vld [vmem:[%s7076_s4 + $0x1a0] sm:$0xff] }
 0x224   : > { %2179 = vmatpush.msra.mxu1 %v3824_v8  ;;  %2213 = vmatpush.msra.mxu2 %v1864_v45  ;;  %v1928_v8 = vld [vmem:[%s7076_s4 + $0x200] sm:$0xff]  ;;  %v1913_v45 = vld [vmem:[%s7076_s4 + $0x188] sm:$0xff] }
 0x225   : > { %2232 = vmatpush.msra.mxu3 %v1924_v11  ;;  %v1926_v11 = vld [vmem:[%s7076_s4 + $0x1f0] sm:$0xff] }
 0x226   : > { %v1791_v49 = vld [vmem:[#allocation1 + $0x6] ss:$9 sm:$0xff]  ;;  %2180 = vmatpush.msra.mxu1 %v3821_v32 }
 0x227   : > { %1812 = vst [vmem:[#allocation1] sm:$0xff] %v5032_v5  ;;  %2233 = vmatpush.msra.mxu3 %v1921_v37  ;;  %v1925_v32 = vld [vmem:[%s7076_s4 + $0x1e8] sm:$0xff]  ;;  %v1887_v37 = vld [vmem:[%s7076_s4 + $0xb8] sm:$0xff] }
 0x228   : > { %1794 = vst.msk [vmem:[#allocation2 + $0x7] ss:$8 sm:$0x3] %vm4939_vm6, %v1791_v49  ;;  %2181 = vmatpush.msra.mxu1 %v3818_v36  ;;  %v1922_v36 = vld [vmem:[%s7076_s4 + $0x1d0] sm:$0xff] }
 0x229   : > { %1813 = vst [vmem:[#allocation1 + $0x9] sm:$0xff] %v5020_v39  ;;  %2234 = vmatpush.msra.mxu3 %v1918_v43  ;;  %v1884_v43 = vld [vmem:[%s7076_s4 + $0xa0] sm:$0xff] }
 0x22a   : > { %2182 = vmatpush.msra.mxu1 %v3815_v54  ;;  %v1883_v54 = vld [vmem:[%s7076_s4 + $0x98] sm:$0xff] }
 0x22b   : > { %2235 = vmatpush.msra.mxu3 %v1915_v28  ;;  %v1881_v28 = vld [vmem:[%s7076_s4 + $0x88] sm:$0xff] }
 0x22c   : > { %2183 = vmatpush.msra.mxu1 %v3812_v44  ;;  %v1880_v44 = vld [vmem:[%s7076_s4 + $0x80] sm:$0xff] }
 0x22d   : > { %2236 = vmatpush.msra.mxu3 %v1912_v58  ;;  %v1878_v58 = vld [vmem:[%s7076_s4 + $0x70] sm:$0xff] }
 0x22e   : > { %2184 = vmatpush.msra.mxu1 %v3809_v15  ;;  %v1877_v15 = vld [vmem:[%s7076_s4 + $0x68] sm:$0xff] }
 0x22f   : > { %v1948_v20 = vld [vmem:[#allocation2] sm:$0xfe]  ;;  %v1949_v61 = vld [vmem:[#allocation2 + $0x8] sm:$0xfe] }
 0x230   : > { %v1815_v38 = vld [vmem:[#allocation1 + $0x2] ss:$9 sm:$0xff]  ;;  %v2041_v47 = vrot.slane %v1948_v20, 1  ;;  %v2044_v22 = vrot.slane %v1949_v61, 1 }
 0x231   : > { %1820 = vst [vmem:[#allocation1] sm:$0xff] %v5032_v5  ;;  %v5481_v49 = vld [vmem:[#allocation2] sm:$0xff]  ;;  %v5492_v53 = vld [vmem:[#allocation2 + $0x8] sm:$0xff] }
 0x232   : > { %1821 = vst [vmem:[#allocation1 + $0x9] sm:$0xff] %v5020_v39  ;;  %v1874_v61 = vld [vmem:[%s7076_s4 + $0x50] sm:$0xff] }
 0x233   : > { %1818 = vst.msk [vmem:[#allocation2 + $0x11] ss:$8 sm:$0x3] %vm4939_vm6, %v1815_v38  ;;  %v1914_v38 = vld [vmem:[%s7076_s4 + $0x190] sm:$0xff] }
 0x239   : > { %v1823_v56 = vld [vmem:[#allocation1 + $0x4] ss:$9 sm:$0xff] }
 0x23a   : > { %1829 = vst [vmem:[#allocation1 + $0x9] sm:$0xff] %v5020_v39 }
 0x23b   : > { %1826 = vst.msk [vmem:[#allocation2 + $0x12] ss:$8 sm:$0x3] %vm4939_vm6, %v1823_v56  ;;  %v3900_v56 = vld [vmem:[%s7076_s4 + $0x6a8] sm:$0xff] }
 0x23c   : > { %1828 = vst [vmem:[#allocation1] sm:$0xff] %v5032_v5 }
 0x243   : > { %v1831_v24 = vld [vmem:[#allocation1 + $0x6] ss:$9 sm:$0xff] }
 0x244   : > { %1834 = vst.msk [vmem:[#allocation2 + $0x13] ss:$8 sm:$0x3] %vm4939_vm6, %v1831_v24  ;;  %v3901_v24 = vld [vmem:[%s7076_s4 + $0x6b0] sm:$0xff] }
 0x245   : > { %1852 = vst [vmem:[#allocation1] sm:$0xff] %v5093_v60 }
 0x246   : > { %1853 = vst [vmem:[#allocation1 + $0x9] sm:$0xff] %v5079_v7  ;;  %v1910_v7 = vld [vmem:[%s7076_s4 + $0x170] sm:$0xff] }
 0x24b   : > { %v1950_v3 = vld [vmem:[#allocation2 + $0x10] sm:$0x1f]  ;;  %v1951_v10 = vld [vmem:[#allocation2 + $0x18] sm:$0x1f] }
 0x24c   : > { %v5359_v39 = vrot.slane %v1950_v3, 1  ;;  %v5361_v14 = vrot.slane %v1951_v10, 1  ;;  %v5545_v20 = vld [vmem:[#allocation2 + $0x10] sm:$0xf]  ;;  %v5556_v10 = vld [vmem:[#allocation2 + $0x18] sm:$0xf] }
 0x24d   : > { %v1855_v62 = vld [vmem:[#allocation1 + $0x2] ss:$9 sm:$0xff] }
 0x24e   : > { %v5365_v5 = vsel %vm469_vm1, %v2041_v47, %v5359_v39  ;;  %v5369_v60 = vsel %vm469_vm1, %v2044_v22, %v5361_v14  ;;  %1858 = vst.msk [vmem:[#allocation2 + $0x15] ss:$8 sm:$0x3] %vm4939_vm6, %v1855_v62  ;;  %v1875_v3 = vld [vmem:[%s7076_s4 + $0x58] sm:$0xff]  ;;  %v3897_v47 = vld [vmem:[%s7076_s4 + $0x690] sm:$0xff]  ;;  %v3891_v62 = vld [vmem:[%s7076_s4 + $0x660] sm:$0xff] }
 0x24f   : > { %2070 = vmatmul.f32.vlgmr.msrb.gmra.mxu0 %v5365_v5  ;;  %3843 = vmatmul.msk.f32.vlgmr.msrb.gmra.mxu1 %vm2049_vm7, %v5369_v60  ;;  %v3898_v22 = vld [vmem:[%s7076_s4 + $0x698] sm:$0xff] }
 0x250   : > { %2116 = vmatmul.f32.vlgmr.msrb.gmra.mxu2 %v5365_v5  ;;  %3845 = vmatmul.msk.f32.vlgmr.msrb.gmra.mxu3 %vm2049_vm7, %v5369_v60 }
 0x251   : > { %2244 = vmatpush.msrb.mxu1 %v1910_v7  ;;  %2271 = vmatpush.msrb.mxu3 %v1946_v2  ;;  %v1868_v7 = vld [vmem:[%s7076_s4 + $0x20] sm:$0xff]  ;;  %v1869_v2 = vld [vmem:[%s7076_s4 + $0x28] sm:$0xff] }
 0x252   : > { %2290 = vmatpush.msrb.mxu0 %v1911_v30  ;;  %2317 = vmatpush.msrb.mxu2 %v1947_v31  ;;  %v3892_v30 = vld [vmem:[%s7076_s4 + $0x668] sm:$0xff] }
 0x253   : > { %2245 = vmatpush.msrb.mxu1 %v1907_v21  ;;  %2272 = vmatpush.msrb.mxu3 %v1943_v25  ;;  %v1865_v31 = vld [vmem:[%s7076_s4 + $0x8] sm:$0xff]  ;;  %v1866_v21 = vld [vmem:[%s7076_s4 + $0x10] sm:$0xff] }
 0x254   : > { %2291 = vmatpush.msrb.mxu0 %v1908_v46  ;;  %2318 = vmatpush.msrb.mxu2 %v1944_v35  ;;  %v3888_v25 = vld [vmem:[%s7076_s4 + $0x648] sm:$0xff]  ;;  %v3889_v35 = vld [vmem:[%s7076_s4 + $0x650] sm:$0xff] }
 0x255   : > { %2246 = vmatpush.msrb.mxu1 %v1904_v34  ;;  %2273 = vmatpush.msrb.mxu3 %v1940_v50  ;;  %v3936_v46 = vld [vmem:[%s7076_s4 + $0x7c8] sm:$0xff]  ;;  %v3937_v34 = vld [vmem:[%s7076_s4 + $0x7d0] sm:$0xff] }
 0x256   : > { %2292 = vmatpush.msrb.mxu0 %v1905_v29  ;;  %2319 = vmatpush.msrb.mxu2 %v1941_v59  ;;  %v3885_v50 = vld [vmem:[%s7076_s4 + $0x630] sm:$0xff]  ;;  %v3886_v59 = vld [vmem:[%s7076_s4 + $0x638] sm:$0xff] }
 0x257   : > { %2247 = vmatpush.msrb.mxu1 %v1901_v19  ;;  %2274 = vmatpush.msrb.mxu3 %v1937_v51  ;;  %v3933_v29 = vld [vmem:[%s7076_s4 + $0x7b0] sm:$0xff]  ;;  %v3934_v19 = vld [vmem:[%s7076_s4 + $0x7b8] sm:$0xff] }
 0x258   : > { %2293 = vmatpush.msrb.mxu0 %v1902_v52  ;;  %2320 = vmatpush.msrb.mxu2 %v1938_v0  ;;  %v3882_v51 = vld [vmem:[%s7076_s4 + $0x618] sm:$0xff]  ;;  %v3883_v0 = vld [vmem:[%s7076_s4 + $0x620] sm:$0xff] }
 0x259   : > { %2073 = vmatmul.f32.gmra.mxu0 %v5359_v39  ;;  %3844 = vmatmul.msk.f32.gmra.mxu1 %vm2049_vm7, %v5361_v14  ;;  %v3930_v52 = vld [vmem:[%s7076_s4 + $0x798] sm:$0xff] }
 0x25a   : > { %2119 = vmatmul.f32.gmra.mxu2 %v5359_v39  ;;  %3846 = vmatmul.msk.f32.gmra.mxu3 %vm2049_vm7, %v5361_v14 }
 0x25b   : > { %2248 = vmatpush.msrb.mxu1 %v1898_v55  ;;  %2275 = vmatpush.msrb.mxu3 %v1934_v26  ;;  %v3931_v55 = vld [vmem:[%s7076_s4 + $0x7a0] sm:$0xff] }
 0x25c   : > { %2294 = vmatpush.msrb.mxu0 %v1899_v27  ;;  %2321 = vmatpush.msrb.mxu2 %v1935_v40  ;;  %v3879_v26 = vld [vmem:[%s7076_s4 + $0x600] sm:$0xff]  ;;  %v3880_v40 = vld [vmem:[%s7076_s4 + $0x608] sm:$0xff] }
 0x25d   : > { %2249 = vmatpush.msrb.mxu1 %v1895_v16  ;;  %2276 = vmatpush.msrb.mxu3 %v1931_v17  ;;  %v3927_v27 = vld [vmem:[%s7076_s4 + $0x780] sm:$0xff]  ;;  %v3928_v16 = vld [vmem:[%s7076_s4 + $0x788] sm:$0xff] }
 0x25e   : > { %2295 = vmatpush.msrb.mxu0 %v1896_v12  ;;  %2322 = vmatpush.msrb.mxu2 %v1932_v42  ;;  %v3876_v17 = vld [vmem:[%s7076_s4 + $0x5e8] sm:$0xff]  ;;  %v3877_v42 = vld [vmem:[%s7076_s4 + $0x5f0] sm:$0xff] }
 0x25f   : > { %2250 = vmatpush.msrb.mxu1 %v1892_v48  ;;  %2277 = vmatpush.msrb.mxu3 %v1928_v8  ;;  %v3924_v12 = vld [vmem:[%s7076_s4 + $0x768] sm:$0xff]  ;;  %v3925_v48 = vld [vmem:[%s7076_s4 + $0x770] sm:$0xff] }
 0x260   : > { %2296 = vmatpush.msrb.mxu0 %v1893_v41  ;;  %2323 = vmatpush.msrb.mxu2 %v1929_v18  ;;  %v3873_v8 = vld [vmem:[%s7076_s4 + $0x5d0] sm:$0xff]  ;;  %v3874_v18 = vld [vmem:[%s7076_s4 + $0x5d8] sm:$0xff] }
 0x261   : > { %2251 = vmatpush.msrb.mxu1 %v1889_v6  ;;  %2278 = vmatpush.msrb.mxu3 %v1925_v32  ;;  %v3921_v41 = vld [vmem:[%s7076_s4 + $0x750] sm:$0xff]  ;;  %v3922_v6 = vld [vmem:[%s7076_s4 + $0x758] sm:$0xff] }
 0x262   : > { %2297 = vmatpush.msrb.mxu0 %v1890_v33  ;;  %2324 = vmatpush.msrb.mxu2 %v1926_v11  ;;  %v3870_v32 = vld [vmem:[%s7076_s4 + $0x5b8] sm:$0xff]  ;;  %v3871_v11 = vld [vmem:[%s7076_s4 + $0x5c0] sm:$0xff] }
 0x263   : > { %2162 = vmatmul.f32.vlgmr.msra.gmra.mxu0 %v5365_v5  ;;  %3847 = vmatmul.msk.f32.vlgmr.msra.gmra.mxu1 %vm2049_vm7, %v5369_v60  ;;  %v3894_v5 = vld [vmem:[%s7076_s4 + $0x678] sm:$0xff]  ;;  %v3895_v60 = vld [vmem:[%s7076_s4 + $0x680] sm:$0xff] }
 0x264   : > { %2214 = vmatmul.f32.vlgmr.msra.gmra.mxu2 %v5481_v49  ;;  %3849 = vmatmul.msk.f32.vlgmr.msra.gmra.mxu3 %vm2049_vm7, %v5492_v53  ;;  %v3918_v33 = vld [vmem:[%s7076_s4 + $0x738] sm:$0xff] }
 0x265   : > { %2252 = vmatpush.msrb.mxu1 %v1886_v9  ;;  %2279 = vmatpush.msrb.mxu3 %v1922_v36  ;;  %v3867_v9 = vld [vmem:[%s7076_s4 + $0x5a0] sm:$0xff] }
 0x266   : > { %2298 = vmatpush.msrb.mxu0 %v1887_v37  ;;  %2325 = vmatpush.msrb.mxu2 %v1923_v63  ;;  %v3915_v36 = vld [vmem:[%s7076_s4 + $0x720] sm:$0xff]  ;;  %v3916_v37 = vld [vmem:[%s7076_s4 + $0x728] sm:$0xff] }
 0x267   : > { %2253 = vmatpush.msrb.mxu1 %v1883_v54  ;;  %2280 = vmatpush.msrb.mxu3 %v1919_v57  ;;  %v3864_v63 = vld [vmem:[%s7076_s4 + $0x588] sm:$0xff]  ;;  %v3865_v57 = vld [vmem:[%s7076_s4 + $0x590] sm:$0xff] }
 0x268   : > { %2299 = vmatpush.msrb.mxu0 %v1884_v43  ;;  %2326 = vmatpush.msrb.mxu2 %v1920_v1  ;;  %v3912_v54 = vld [vmem:[%s7076_s4 + $0x708] sm:$0xff]  ;;  %v3913_v43 = vld [vmem:[%s7076_s4 + $0x710] sm:$0xff] }
 0x269   : > { %2254 = vmatpush.msrb.mxu1 %v1880_v44  ;;  %2281 = vmatpush.msrb.mxu3 %v1916_v4  ;;  %v3861_v1 = vld [vmem:[%s7076_s4 + $0x570] sm:$0xff]  ;;  %v2338_v4 = vld [vmem:[#allocation2 + $0x10] sm:$0x3f] }
 0x26a   : > { %2300 = vmatpush.msrb.mxu0 %v1881_v28  ;;  %2327 = vmatpush.msrb.mxu2 %v1917_v23  ;;  %v3909_v44 = vld [vmem:[%s7076_s4 + $0x6f0] sm:$0xff]  ;;  %v3862_v28 = vld [vmem:[%s7076_s4 + $0x578] sm:$0xff] }
 0x26b   : > { %2255 = vmatpush.msrb.mxu1 %v1877_v15  ;;  %2282 = vmatpush.msrb.mxu3 %v1913_v45  ;;  %v3910_v23 = vld [vmem:[%s7076_s4 + $0x6f8] sm:$0xff]  ;;  %v2339_v15 = vld [vmem:[#allocation2 + $0x18] sm:$0x3f] }
 0x26c   : > { %2301 = vmatpush.msrb.mxu0 %v1878_v58  ;;  %2328 = vmatpush.msrb.mxu2 %v1914_v38  ;;  %v3858_v45 = vld [vmem:[%s7076_s4 + $0x558] sm:$0xff]  ;;  %v2336_v38 = vld [vmem:[#allocation2] sm:$0xfc] }
 0x26d   : > { %2441 = vmatpush.msra.mxu3 %v3900_v56  ;;  %2165 = vmatmul.f32.gmra.mxu0 %v5359_v39  ;;  %v1871_v39 = vld [vmem:[%s7076_s4 + $0x38] sm:$0xff]  ;;  %v3859_v56 = vld [vmem:[%s7076_s4 + $0x560] sm:$0xff] }
 0x26e   : > { %2487 = vmatpush.msra.mxu2 %v3901_v24  ;;  %3848 = vmatmul.msk.f32.gmra.mxu1 %vm2049_vm7, %v5361_v14  ;;  %v1872_v14 = vld [vmem:[%s7076_s4 + $0x40] sm:$0xff]  ;;  %v3906_v58 = vld [vmem:[%s7076_s4 + $0x6d8] sm:$0xff] }
 0x26f   : > { %2217 = vmatmul.f32.gmra.mxu2 %v5545_v20  ;;  %3850 = vmatmul.msk.f32.gmra.mxu3 %vm2049_vm7, %v5556_v10  ;;  %v3907_v24 = vld [vmem:[%s7076_s4 + $0x6e0] sm:$0xff] }
 0x270   : > { %2256 = vmatpush.msrb.mxu1 %v1874_v61  ;;  %2302 = vmatpush.msrb.mxu0 %v1875_v3  ;;  %v3855_v61 = vld [vmem:[%s7076_s4 + $0x540] sm:$0xff] }
 0x271   : > { %2442 = vmatpush.msra.mxu3 %v3897_v47  ;;  %2488 = vmatpush.msra.mxu2 %v3898_v22  ;;  %v3903_v3 = vld [vmem:[%s7076_s4 + $0x6c0] sm:$0xff]  ;;  %v5749_v47 = vrot.slane %v2339_v15, 2  ;;  %v3856_v22 = vld [vmem:[%s7076_s4 + $0x548] sm:$0xff] }
 0x272   : > { %2257 = vmatpush.msrb.mxu1 %v1871_v39  ;;  %2303 = vmatpush.msrb.mxu0 %v1872_v14  ;;  %v3904_v39 = vld [vmem:[%s7076_s4 + $0x6c8] sm:$0xff]  ;;  %v2429_v14 = vrot.slane %v2336_v38, 2  ;;  %v2620_v38 = vld [vmem:[%s7078_s6 + $0x78] sm:$0xff] }
 0x273   : > { %2443 = vmatpush.msra.mxu3 %v3894_v5  ;;  %2489 = vmatpush.msra.mxu2 %v3895_v60  ;;  %v2622_v15 = vld [vmem:[%s7078_s6 + $0x88] sm:$0xff] }
 0x274   : > { %2258 = vmatpush.msrb.mxu1 %v1868_v7  ;;  %2304 = vmatpush.msrb.mxu0 %v1869_v2  ;;  %v3902_v2 = vld [vmem:[%s7076_s4 + $0x6b8] sm:$0xff] }
 0x275   : > { %2444 = vmatpush.msra.mxu3 %v3891_v62  ;;  %2490 = vmatpush.msra.mxu2 %v3892_v30  ;;  %v3938_v62 = vld [vmem:[%s7076_s4 + $0x7d8] sm:$0xff]  ;;  %v3899_v30 = vld [vmem:[%s7076_s4 + $0x6a0] sm:$0xff] }
 0x276   : > { %2259 = vmatpush.msrb.mxu1 %v1865_v31  ;;  %2305 = vmatpush.msrb.mxu0 %v1866_v21  ;;  %v3935_v31 = vld [vmem:[%s7076_s4 + $0x7c0] sm:$0xff]  ;;  %v3896_v21 = vld [vmem:[%s7076_s4 + $0x688] sm:$0xff] }
 0x277   : > { %2445 = vmatpush.msra.mxu3 %v3888_v25  ;;  %2491 = vmatpush.msra.mxu2 %v3889_v35  ;;  %v3932_v25 = vld [vmem:[%s7076_s4 + $0x7a8] sm:$0xff]  ;;  %v3929_v35 = vld [vmem:[%s7076_s4 + $0x790] sm:$0xff] }
 0x278   : > { %2468 = vmatpush.msra.mxu1 %v3936_v46  ;;  %2514 = vmatpush.msra.mxu0 %v3937_v34  ;;  %v3893_v46 = vld [vmem:[%s7076_s4 + $0x670] sm:$0xff]  ;;  %v3890_v34 = vld [vmem:[%s7076_s4 + $0x658] sm:$0xff] }
 0x279   : > { %2260 = vmatmul.f32.vlgmr.msrb.gmra.mxu1 %v5481_v49  ;;  %3851 = vmatmul.msk.f32.vlgmr.msrb.gmra.mxu3 %vm2049_vm7, %v5492_v53 }
 0x27a   : > { %2306 = vmatmul.f32.vlgmr.msrb.gmra.mxu0 %v5481_v49  ;;  %3853 = vmatmul.msk.f32.vlgmr.msrb.gmra.mxu2 %vm2049_vm7, %v5492_v53  ;;  %v3919_v49 = vld [vmem:[%s7076_s4 + $0x740] sm:$0xff]  ;;  %v3868_v53 = vld [vmem:[%s7076_s4 + $0x5a8] sm:$0xff] }
 0x27b   : > { %2446 = vmatpush.msra.mxu3 %v3885_v50  ;;  %2469 = vmatpush.msra.mxu1 %v3933_v29  ;;  %v3926_v50 = vld [vmem:[%s7076_s4 + $0x778] sm:$0xff]  ;;  %v3887_v29 = vld [vmem:[%s7076_s4 + $0x640] sm:$0xff] }
 0x27c   : > { %2492 = vmatpush.msra.mxu2 %v3886_v59  ;;  %2515 = vmatpush.msra.mxu0 %v3934_v19  ;;  %v3923_v59 = vld [vmem:[%s7076_s4 + $0x760] sm:$0xff]  ;;  %v3884_v19 = vld [vmem:[%s7076_s4 + $0x628] sm:$0xff] }
 0x27d   : > { %2447 = vmatpush.msra.mxu3 %v3882_v51  ;;  %2470 = vmatpush.msra.mxu1 %v3930_v52  ;;  %v3920_v51 = vld [vmem:[%s7076_s4 + $0x748] sm:$0xff]  ;;  %v3881_v52 = vld [vmem:[%s7076_s4 + $0x610] sm:$0xff] }
 0x27e   : > { %2493 = vmatpush.msra.mxu2 %v3883_v0  ;;  %2516 = vmatpush.msra.mxu0 %v3931_v55  ;;  %v3917_v0 = vld [vmem:[%s7076_s4 + $0x730] sm:$0xff]  ;;  %v3878_v55 = vld [vmem:[%s7076_s4 + $0x5f8] sm:$0xff] }
 0x27f   : > { %2448 = vmatpush.msra.mxu3 %v3879_v26  ;;  %2471 = vmatpush.msra.mxu1 %v3927_v27  ;;  %v3914_v26 = vld [vmem:[%s7076_s4 + $0x718] sm:$0xff]  ;;  %v3875_v27 = vld [vmem:[%s7076_s4 + $0x5e0] sm:$0xff] }
 0x280   : > { %2494 = vmatpush.msra.mxu2 %v3880_v40  ;;  %2517 = vmatpush.msra.mxu0 %v3928_v16  ;;  %v3911_v40 = vld [vmem:[%s7076_s4 + $0x700] sm:$0xff]  ;;  %v3872_v16 = vld [vmem:[%s7076_s4 + $0x5c8] sm:$0xff] }
 0x281   : > { %2449 = vmatpush.msra.mxu3 %v3876_v17  ;;  %2472 = vmatpush.msra.mxu1 %v3924_v12  ;;  %v3908_v17 = vld [vmem:[%s7076_s4 + $0x6e8] sm:$0xff]  ;;  %v3869_v12 = vld [vmem:[%s7076_s4 + $0x5b0] sm:$0xff] }
 0x282   : > { %2495 = vmatpush.msra.mxu2 %v3877_v42  ;;  %2518 = vmatpush.msra.mxu0 %v3925_v48  ;;  %v3905_v42 = vld [vmem:[%s7076_s4 + $0x6d0] sm:$0xff]  ;;  %v3866_v48 = vld [vmem:[%s7076_s4 + $0x598] sm:$0xff] }
 0x283   : > { %2263 = vmatmul.f32.gmra.mxu1 %v5545_v20  ;;  %3852 = vmatmul.msk.f32.gmra.mxu3 %vm2049_vm7, %v5556_v10 }
 0x284   : > { %2309 = vmatmul.f32.gmra.mxu0 %v5545_v20  ;;  %3854 = vmatmul.msk.f32.gmra.mxu2 %vm2049_vm7, %v5556_v10  ;;  %v2337_v20 = vld [vmem:[#allocation2 + $0x8] sm:$0xfc]  ;;  %v5747_v10 = vrot.slane %v2338_v4, 2  ;;  %v2624_v4 = vld [vmem:[%s7078_s6 + $0x98] sm:$0xff] }
 0x285   : > { %2450 = vmatpush.msra.mxu3 %v3873_v8  ;;  %2473 = vmatpush.msra.mxu1 %v3921_v41  ;;  %v2432_v5 = vrot.slane %v2337_v20, 2  ;;  %v3863_v8 = vld [vmem:[%s7076_s4 + $0x580] sm:$0xff]  ;;  %v3860_v41 = vld [vmem:[%s7076_s4 + $0x568] sm:$0xff] }
 0x286   : > { %2496 = vmatpush.msra.mxu2 %v3874_v18  ;;  %2519 = vmatpush.msra.mxu0 %v3922_v6  ;;  %v5759_v60 = vsel %vm800_vm3, %v2429_v14, %v5747_v10  ;;  %v3857_v18 = vld [vmem:[%s7076_s4 + $0x550] sm:$0xff]  ;;  %v2618_v20 = vld [vmem:[%s7078_s6 + $0x68] sm:$0xff]  ;;  %v2653_v14 = vld [vmem:[%s7078_s6 + $0x180] sm:$0xff] }
 0x287   : > { %2451 = vmatpush.msra.mxu3 %v3870_v32  ;;  %2474 = vmatpush.msra.mxu1 %v3918_v33  ;;  %v2434_v7 = vsel %vm800_vm3, %v2432_v5, %v5749_v47  ;;  %v2635_v6 = vld [vmem:[%s7078_s6 + $0xf0] sm:$0xff]  ;;  %v2636_v32 = vld [vmem:[%s7078_s6 + $0xf8] sm:$0xff]  ;;  %v2633_v33 = vld [vmem:[%s7078_s6 + $0xe0] sm:$0xff] }
 0x288   : > { %2497 = vmatpush.msra.mxu2 %v3871_v11  ;;  %2520 = vmatpush.msra.mxu0 %v3919_v49  ;;  %v2634_v11 = vld [vmem:[%s7078_s6 + $0xe8] sm:$0xff]  ;;  %v2631_v49 = vld [vmem:[%s7078_s6 + $0xd0] sm:$0xff] }
 0x289   : > { %2452 = vmatpush.msra.mxu3 %v3867_v9  ;;  %2475 = vmatpush.msra.mxu1 %v3915_v36  ;;  %v2632_v9 = vld [vmem:[%s7078_s6 + $0xd8] sm:$0xff]  ;;  %v2629_v36 = vld [vmem:[%s7078_s6 + $0xc0] sm:$0xff]  ;;  %v2611_v5 = vld [vmem:[%s7078_s6 + $0x30] sm:$0xff] }
 0x28a   : > { %2498 = vmatpush.msra.mxu2 %v3868_v53  ;;  %2521 = vmatpush.msra.mxu0 %v3916_v37  ;;  %v2630_v53 = vld [vmem:[%s7078_s6 + $0xc8] sm:$0xff]  ;;  %v2627_v37 = vld [vmem:[%s7078_s6 + $0xb0] sm:$0xff] }
 0x28b   : > { %2453 = vmatpush.msra.mxu3 %v3864_v63  ;;  %2476 = vmatpush.msra.mxu1 %v3912_v54  ;;  %v2628_v63 = vld [vmem:[%s7078_s6 + $0xb8] sm:$0xff]  ;;  %v2667_v54 = vld [vmem:[%s7078_s6 + $0x1f0] sm:$0xff] }
 0x28c   : > { %2499 = vmatpush.msra.mxu2 %v3865_v57  ;;  %2522 = vmatpush.msra.mxu0 %v3913_v43  ;;  %v2625_v57 = vld [vmem:[%s7078_s6 + $0xa0] sm:$0xff]  ;;  %v2626_v43 = vld [vmem:[%s7078_s6 + $0xa8] sm:$0xff] }
 0x28d   : > { %2454 = vmatpush.msra.mxu3 %v3861_v1  ;;  %2477 = vmatpush.msra.mxu1 %v3909_v44  ;;  %v2665_v1 = vld [vmem:[%s7078_s6 + $0x1e0] sm:$0xff]  ;;  %v2623_v44 = vld [vmem:[%s7078_s6 + $0x90] sm:$0xff] }
 0x28e   : > { %2500 = vmatpush.msra.mxu2 %v3862_v28  ;;  %2523 = vmatpush.msra.mxu0 %v3910_v23  ;;  %v2663_v28 = vld [vmem:[%s7078_s6 + $0x1d0] sm:$0xff]  ;;  %v2621_v23 = vld [vmem:[%s7078_s6 + $0x80] sm:$0xff] }
 0x28f   : > { %2455 = vmatpush.msra.mxu3 %v3858_v45  ;;  %2478 = vmatpush.msra.mxu1 %v3906_v58  ;;  %v2661_v45 = vld [vmem:[%s7078_s6 + $0x1c0] sm:$0xff]  ;;  %v2619_v58 = vld [vmem:[%s7078_s6 + $0x70] sm:$0xff] }
 0x290   : > { %2501 = vmatpush.msra.mxu2 %v3859_v56  ;;  %2524 = vmatpush.msra.mxu0 %v3907_v24  ;;  %v2659_v56 = vld [vmem:[%s7078_s6 + $0x1b0] sm:$0xff]  ;;  %v2617_v24 = vld [vmem:[%s7078_s6 + $0x60] sm:$0xff] }
 0x291   : > { %2456 = vmatpush.msra.mxu3 %v3855_v61  ;;  %2479 = vmatpush.msra.mxu1 %v3903_v3  ;;  %v2657_v61 = vld [vmem:[%s7078_s6 + $0x1a0] sm:$0xff]  ;;  %v2615_v3 = vld [vmem:[%s7078_s6 + $0x50] sm:$0xff] }
 0x292   : > { %2502 = vmatpush.msra.mxu2 %v3856_v22  ;;  %2525 = vmatpush.msra.mxu0 %v3904_v39  ;;  %v2613_v22 = vld [vmem:[%s7078_s6 + $0x40] sm:$0xff]  ;;  %v2614_v39 = vld [vmem:[%s7078_s6 + $0x48] sm:$0xff] }
 0x293   : > { %2457 = vmatmul.f32.vlgmr.msra.gmra.mxu3 %v5759_v60  ;;  %3939 = vmatmul.msk.f32.vlgmr.msra.gmra.mxu1 %vm2049_vm7, %v2434_v7 }
 0x294   : > { %2503 = vmatmul.f32.vlgmr.msra.gmra.mxu2 %v5759_v60  ;;  %3941 = vmatmul.msk.f32.vlgmr.msra.gmra.mxu0 %vm2049_vm7, %v2434_v7 }
 0x295   : > { %2533 = vmatpush.msrb.mxu1 %v3902_v2  ;;  %2560 = vmatpush.msrb.mxu3 %v3938_v62  ;;  %v2699_v2 = vld [vmem:[%s7078_s6 + $0x2f0] sm:$0xff]  ;;  %v2609_v62 = vld [vmem:[%s7078_s6 + $0x20] sm:$0xff] }
 0x296   : > { %2701 = vmatpush.msrb.mxu0 %v2635_v6  ;;  %2724 = vmatpush.msrb.mxu2 %v2667_v54  ;;  %v3999_v54 = vld [vmem:[%s7078_s6 + $0x4b0] sm:$0xff] }
 0x297   : > { %2534 = vmatpush.msrb.mxu1 %v3899_v30  ;;  %2561 = vmatpush.msrb.mxu3 %v3935_v31  ;;  %v2610_v30 = vld [vmem:[%s7078_s6 + $0x28] sm:$0xff]  ;;  %v2649_v31 = vld [vmem:[%s7078_s6 + $0x160] sm:$0xff] }
 0x298   : > { %2702 = vmatpush.msrb.mxu0 %v2633_v33  ;;  %2725 = vmatpush.msrb.mxu2 %v2665_v1  ;;  %v2662_v33 = vld [vmem:[%s7078_s6 + $0x1c8] sm:$0xff] }
 0x299   : > { %2535 = vmatpush.msrb.mxu1 %v3896_v21  ;;  %2562 = vmatpush.msrb.mxu3 %v3932_v25  ;;  %v2697_v21 = vld [vmem:[%s7078_s6 + $0x2e0] sm:$0xff]  ;;  %v2607_v25 = vld [vmem:[%s7078_s6 + $0x10] sm:$0xff]  ;;  %v2658_v1 = vld [vmem:[%s7078_s6 + $0x1a8] sm:$0xff] }
 0x29a   : > { %2703 = vmatpush.msrb.mxu0 %v2631_v49  ;;  %2726 = vmatpush.msrb.mxu2 %v2663_v28  ;;  %v2681_v28 = vld [vmem:[%s7078_s6 + $0x260] sm:$0xff] }
 0x29b   : > { %2536 = vmatpush.msrb.mxu1 %v3893_v46  ;;  %2563 = vmatpush.msrb.mxu3 %v3929_v35  ;;  %v2608_v35 = vld [vmem:[%s7078_s6 + $0x18] sm:$0xff] }
 0x29c   : > { %2460 = vmatmul.f32.gmra.mxu3 %v5747_v10  ;;  %3940 = vmatmul.msk.f32.gmra.mxu1 %vm2049_vm7, %v5749_v47 }
 0x29d   : > { %2506 = vmatmul.f32.gmra.mxu2 %v5747_v10  ;;  %3942 = vmatmul.msk.f32.gmra.mxu0 %vm2049_vm7, %v5749_v47 }
 0x29e   : > { %2537 = vmatpush.msrb.mxu1 %v3890_v34  ;;  %2564 = vmatpush.msrb.mxu3 %v3926_v50  ;;  %v2647_v34 = vld [vmem:[%s7078_s6 + $0x150] sm:$0xff] }
 0x29f   : > { %2704 = vmatpush.msrb.mxu0 %v2629_v36  ;;  %2727 = vmatpush.msrb.mxu2 %v2661_v45  ;;  %v2695_v50 = vld [vmem:[%s7078_s6 + $0x2d0] sm:$0xff]  ;;  %v2696_v45 = vld [vmem:[%s7078_s6 + $0x2d8] sm:$0xff] }
 0x2a0   : > { %2538 = vmatpush.msrb.mxu1 %v3887_v29  ;;  %2565 = vmatpush.msrb.mxu3 %v3923_v59 }
 0x2a1   : > { %2705 = vmatpush.msrb.mxu0 %v2627_v37  ;;  %2728 = vmatpush.msrb.mxu2 %v2659_v56  ;;  %v2685_v37 = vld [vmem:[%s7078_s6 + $0x280] sm:$0xff] }
 0x2a2   : > { %2539 = vmatpush.msrb.mxu1 %v3884_v19  ;;  %2566 = vmatpush.msrb.mxu3 %v3920_v51  ;;  %v2605_v51 = vld [vmem:[%s7078_s6] sm:$0xff] }
 0x2a3   : > { %2706 = vmatpush.msrb.mxu0 %v2625_v57  ;;  %2729 = vmatpush.msrb.mxu2 %v2657_v61  ;;  %v2700_v57 = vld [vmem:[%s7078_s6 + $0x2f8] sm:$0xff]  ;;  %v3993_v56 = vld [vmem:[%s7078_s6 + $0x480] sm:$0xff] }
 0x2a4   : > { %2540 = vmatpush.msrb.mxu1 %v3881_v52  ;;  %2567 = vmatpush.msrb.mxu3 %v3917_v0  ;;  %v2606_v52 = vld [vmem:[%s7078_s6 + $0x8] sm:$0xff]  ;;  %v2645_v0 = vld [vmem:[%s7078_s6 + $0x140] sm:$0xff] }
 0x2a5   : > { %2707 = vmatpush.msrb.mxu0 %v2623_v44  ;;  %v3997_v44 = vld [vmem:[%s7078_s6 + $0x4a0] sm:$0xff] }
 0x2a6   : > { %2541 = vmatpush.msrb.mxu1 %v3878_v55  ;;  %2568 = vmatpush.msrb.mxu3 %v3914_v26  ;;  %v2693_v55 = vld [vmem:[%s7078_s6 + $0x2c0] sm:$0xff]  ;;  %v2668_v26 = vld [vmem:[%s7078_s6 + $0x1f8] sm:$0xff] }
 0x2a7   : > { %2708 = vmatpush.msrb.mxu0 %v2621_v23  ;;  %v2656_v23 = vld [vmem:[%s7078_s6 + $0x198] sm:$0xff] }
 0x2a8   : > { %2542 = vmatpush.msrb.mxu1 %v3875_v27  ;;  %2569 = vmatpush.msrb.mxu3 %v3911_v40  ;;  %v4007_v27 = vld [vmem:[%s7078_s6 + $0x4f0] sm:$0xff] }
 0x2a9   : > { %2709 = vmatpush.msrb.mxu0 %v2619_v58  ;;  %v2643_v40 = vld [vmem:[%s7078_s6 + $0x130] sm:$0xff] }
 0x2aa   : > { %2543 = vmatpush.msrb.mxu1 %v3872_v16  ;;  %2570 = vmatpush.msrb.mxu3 %v3908_v17  ;;  %v2691_v16 = vld [vmem:[%s7078_s6 + $0x2b0] sm:$0xff]  ;;  %v2666_v17 = vld [vmem:[%s7078_s6 + $0x1e8] sm:$0xff] }
 0x2ab   : > { %2710 = vmatpush.msrb.mxu0 %v2617_v24  ;;  %v2679_v58 = vld [vmem:[%s7078_s6 + $0x250] sm:$0xff] }
 0x2ac   : > { %2544 = vmatpush.msrb.mxu1 %v3869_v12  ;;  %2571 = vmatpush.msrb.mxu3 %v3905_v42  ;;  %v4005_v12 = vld [vmem:[%s7078_s6 + $0x4e0] sm:$0xff] }
 0x2ad   : > { %3943 = vmatmul.msk.f32.vlgmr.msrb.gmra.mxu3 %vm2049_vm7, %v2434_v7  ;;  %2711 = vmatpush.msrb.mxu0 %v2615_v3  ;;  %v2651_v7 = vld [vmem:[%s7078_s6 + $0x170] sm:$0xff]  ;;  %v2641_v42 = vld [vmem:[%s7078_s6 + $0x120] sm:$0xff] }
 0x2ae   : > { %2545 = vmatpush.msrb.mxu1 %v3866_v48  ;;  %2747 = vmatpush.msra.mxu3 %v2699_v2  ;;  %v2689_v48 = vld [vmem:[%s7078_s6 + $0x2a0] sm:$0xff]  ;;  %v2690_v2 = vld [vmem:[%s7078_s6 + $0x2a8] sm:$0xff] }
 0x2af   : > { %2712 = vmatpush.msrb.mxu0 %v2613_v22  ;;  %v2652_v22 = vld [vmem:[%s7078_s6 + $0x178] sm:$0xff] }
 0x2b0   : > { %2546 = vmatpush.msrb.mxu1 %v3863_v8  ;;  %2748 = vmatpush.msra.mxu3 %v2697_v21  ;;  %v2664_v8 = vld [vmem:[%s7078_s6 + $0x1d8] sm:$0xff] }
 0x2b1   : > { %2713 = vmatpush.msrb.mxu0 %v2611_v5  ;;  %v2675_v5 = vld [vmem:[%s7078_s6 + $0x230] sm:$0xff]  ;;  %v2688_v21 = vld [vmem:[%s7078_s6 + $0x298] sm:$0xff] }
 0x2b2   : > { %2547 = vmatpush.msrb.mxu1 %v3860_v41  ;;  %2749 = vmatpush.msra.mxu3 %v2695_v50  ;;  %v4003_v41 = vld [vmem:[%s7078_s6 + $0x4d0] sm:$0xff] }
 0x2b3   : > { %2714 = vmatpush.msrb.mxu0 %v2609_v62  ;;  %v2673_v62 = vld [vmem:[%s7078_s6 + $0x220] sm:$0xff] }
 0x2b4   : > { %2548 = vmatpush.msrb.mxu1 %v3857_v18  ;;  %2750 = vmatpush.msra.mxu3 %v2693_v55  ;;  %v2639_v18 = vld [vmem:[%s7078_s6 + $0x110] sm:$0xff] }
 0x2b5   : > { %2549 = vmatmul.f32.vlgmr.msrb.gmra.mxu1 %v5759_v60  ;;  %3944 = vmatmul.msk.f32.gmra.mxu3 %vm2049_vm7, %v5749_v47  ;;  %v2655_v47 = vld [vmem:[%s7078_s6 + $0x190] sm:$0xff]  ;;  %v2612_v60 = vld [vmem:[%s7078_s6 + $0x38] sm:$0xff] }
 0x2b6   : > { %2770 = vmatpush.msra.mxu1 %v2636_v32  ;;  %2730 = vmatpush.msrb.mxu2 %v2655_v47  ;;  %v2687_v32 = vld [vmem:[%s7078_s6 + $0x290] sm:$0xff]  ;;  %v2677_v47 = vld [vmem:[%s7078_s6 + $0x240] sm:$0xff] }
 0x2b7   : > { %2715 = vmatpush.msrb.mxu0 %v2607_v25  ;;  %2751 = vmatpush.msra.mxu3 %v2691_v16  ;;  %v2684_v16 = vld [vmem:[%s7078_s6 + $0x278] sm:$0xff] }
 0x2b8   : > { %2771 = vmatpush.msra.mxu1 %v2634_v11  ;;  %2731 = vmatpush.msrb.mxu2 %v2653_v14  ;;  %v4001_v11 = vld [vmem:[%s7078_s6 + $0x4c0] sm:$0xff]  ;;  %v2692_v14 = vld [vmem:[%s7078_s6 + $0x2b8] sm:$0xff] }
 0x2b9   : > { %2716 = vmatpush.msrb.mxu0 %v2605_v51  ;;  %2752 = vmatpush.msra.mxu3 %v2689_v48  ;;  %v2682_v48 = vld [vmem:[%s7078_s6 + $0x268] sm:$0xff] }
 0x2ba   : > { %2772 = vmatpush.msra.mxu1 %v2632_v9  ;;  %2732 = vmatpush.msrb.mxu2 %v2651_v7  ;;  %v3989_v7 = vld [vmem:[%s7078_s6 + $0x460] sm:$0xff] }
 0x2bb   : > { %2793 = vmatpush.msra.mxu0 %v2668_v26  ;;  %2753 = vmatpush.msra.mxu3 %v2687_v32  ;;  %v2669_v26 = vld [vmem:[%s7078_s6 + $0x200] sm:$0xff]  ;;  %v2680_v32 = vld [vmem:[%s7078_s6 + $0x258] sm:$0xff] }
 0x2bc   : > { %2773 = vmatpush.msra.mxu1 %v2630_v53  ;;  %2733 = vmatpush.msrb.mxu2 %v2649_v31  ;;  %v2637_v53 = vld [vmem:[%s7078_s6 + $0x100] sm:$0xff]  ;;  %v3987_v31 = vld [vmem:[%s7078_s6 + $0x450] sm:$0xff] }
 0x2bd   : > { %2552 = vmatmul.f32.gmra.mxu1 %v5747_v10  ;;  %v2616_v10 = vld [vmem:[%s7078_s6 + $0x58] sm:$0xff]  ;;  %2794 = vmatpush.msra.mxu0 %v2666_v17  ;;  %v3975_v17 = vld [vmem:[%s7078_s6 + $0x3f0] sm:$0xff] }
 0x2be   : > { %2774 = vmatpush.msra.mxu1 %v2628_v63  ;;  %2734 = vmatpush.msrb.mxu2 %v2647_v34  ;;  %v2660_v63 = vld [vmem:[%s7078_s6 + $0x1b8] sm:$0xff]  ;;  %v2646_v34 = vld [vmem:[%s7078_s6 + $0x148] sm:$0xff] }
 0x2bf   : > { %2795 = vmatpush.msra.mxu0 %v2664_v8  ;;  %2754 = vmatpush.msra.mxu3 %v2685_v37  ;;  %v3973_v8 = vld [vmem:[%s7078_s6 + $0x3e0] sm:$0xff]  ;;  %v2678_v37 = vld [vmem:[%s7078_s6 + $0x248] sm:$0xff] }
 0x2c0   : > { %2775 = vmatpush.msra.mxu1 %v2626_v43  ;;  %2735 = vmatpush.msrb.mxu2 %v2645_v0  ;;  %v2683_v43 = vld [vmem:[%s7078_s6 + $0x270] sm:$0xff]  ;;  %v2686_v0 = vld [vmem:[%s7078_s6 + $0x288] sm:$0xff] }
 0x2c1   : > { %2796 = vmatpush.msra.mxu0 %v2662_v33  ;;  %2755 = vmatpush.msra.mxu3 %v2683_v43  ;;  %v3971_v33 = vld [vmem:[%s7078_s6 + $0x3d0] sm:$0xff] }
 0x2c2   : > { %2776 = vmatpush.msra.mxu1 %v2624_v4  ;;  %2736 = vmatpush.msrb.mxu2 %v2643_v40  ;;  %v2698_v4 = vld [vmem:[%s7078_s6 + $0x2e8] sm:$0xff]  ;;  %v3983_v40 = vld [vmem:[%s7078_s6 + $0x430] sm:$0xff] }
 0x2c3   : > { %2797 = vmatpush.msra.mxu0 %v2660_v63  ;;  %2756 = vmatpush.msra.mxu3 %v2681_v28  ;;  %v3969_v63 = vld [vmem:[%s7078_s6 + $0x3c0] sm:$0xff]  ;;  %v2674_v28 = vld [vmem:[%s7078_s6 + $0x228] sm:$0xff] }
 0x2c4   : > { %2777 = vmatpush.msra.mxu1 %v2622_v15  ;;  %2737 = vmatpush.msrb.mxu2 %v2641_v42  ;;  %v3995_v15 = vld [vmem:[%s7078_s6 + $0x490] sm:$0xff]  ;;  %v3981_v42 = vld [vmem:[%s7078_s6 + $0x420] sm:$0xff] }
 0x2c5   : > { %2798 = vmatpush.msra.mxu0 %v2658_v1  ;;  %2757 = vmatpush.msra.mxu3 %v2679_v58  ;;  %v2676_v1 = vld [vmem:[%s7078_s6 + $0x238] sm:$0xff]  ;;  %v2670_v58 = vld [vmem:[%s7078_s6 + $0x208] sm:$0xff] }
 0x2c6   : > { %2778 = vmatpush.msra.mxu1 %v2620_v38  ;;  %2738 = vmatpush.msrb.mxu2 %v2639_v18  ;;  %v2654_v38 = vld [vmem:[%s7078_s6 + $0x188] sm:$0xff]  ;;  %v3979_v18 = vld [vmem:[%s7078_s6 + $0x410] sm:$0xff] }
 0x2c7   : > { %2799 = vmatpush.msra.mxu0 %v2656_v23  ;;  %2758 = vmatpush.msra.mxu3 %v2677_v47  ;;  %v3965_v23 = vld [vmem:[%s7078_s6 + $0x3a0] sm:$0xff] }
 0x2c8   : > { %2779 = vmatpush.msra.mxu1 %v2618_v20  ;;  %2739 = vmatpush.msrb.mxu2 %v2637_v53  ;;  %v3977_v53 = vld [vmem:[%s7078_s6 + $0x400] sm:$0xff] }
 0x2c9   : > { %2800 = vmatpush.msra.mxu0 %v2654_v38  ;;  %2759 = vmatpush.msra.mxu3 %v2675_v5  ;;  %v3961_v38 = vld [vmem:[%s7078_s6 + $0x380] sm:$0xff]  ;;  %v3955_v5 = vld [vmem:[%s7078_s6 + $0x350] sm:$0xff] }
 0x2ca   : > { %2780 = vmatpush.msra.mxu1 %v2616_v10  ;;  %2816 = vmatpush.msra.mxu2 %v2700_v57  ;;  %v2694_v10 = vld [vmem:[%s7078_s6 + $0x2c8] sm:$0xff]  ;;  %v3957_v47 = vld [vmem:[%s7078_s6 + $0x360] sm:$0xff] }
 0x2cb   : > { %2801 = vmatpush.msra.mxu0 %v2652_v22  ;;  %2760 = vmatpush.msra.mxu3 %v2673_v62 }
 0x2cc   : > { %2781 = vmatpush.msra.mxu1 %v2614_v39  ;;  %v5985_v46 = vpop.f32.mrf.mxu1  ;;  %v5996_v29 = vpop.f32.mrf.mxu0  ;;  %2817 = vmatpush.msra.mxu2 %v2698_v4  ;;  %v3991_v39 = vld [vmem:[%s7078_s6 + $0x470] sm:$0xff] }
 0x2ce   : > { %2782 = vmatpush.msra.mxu1 %v2612_v60  ;;  %2818 = vmatpush.msra.mxu2 %v2696_v45  ;;  %v2650_v60 = vld [vmem:[%s7078_s6 + $0x168] sm:$0xff]  ;;  %v3963_v45 = vld [vmem:[%s7078_s6 + $0x390] sm:$0xff] }
 0x2cf   : > { %2802 = vmatpush.msra.mxu0 %v2650_v60  ;;  %v2095_v60 = vadd.f32 %v5985_v46, %v5996_v29  ;;  %v3951_v46 = vld [vmem:[%s7078_s6 + $0x330] sm:$0xff] }
 0x2d0   : > { %2783 = vmatpush.msra.mxu1 %v2610_v30  ;;  %2819 = vmatpush.msra.mxu2 %v2694_v10  ;;  %v2648_v30 = vld [vmem:[%s7078_s6 + $0x158] sm:$0xff] }
 0x2d1   : > { %2803 = vmatpush.msra.mxu0 %v2648_v30  ;;  %v6282_v30 = vld [vmem:[%s7077_s5] sm:$0x7] }
 0x2d2   : > { %2784 = vmatpush.msra.mxu1 %v2608_v35  ;;  %2820 = vmatpush.msra.mxu2 %v2692_v14  ;;  %v2671_v35 = vld [vmem:[%s7078_s6 + $0x210] sm:$0xff] }
 0x2d3   : > { %v5998_v59 = vpop.f32.mrf.mxu3  ;;  %v6000_v19 = vpop.f32.mrf.mxu2  ;;  %2761 = vmatpush.msra.mxu3 %v2671_v35  ;;  %2804 = vmatpush.msra.mxu0 %v2646_v34  ;;  %v2587_v34 = vperm.slane %v6282_v30, 0 }
 0x2d4   : > { %2785 = vmatpush.msra.mxu1 %v2606_v52  ;;  %2821 = vmatpush.msra.mxu2 %v2690_v2  ;;  %v3985_v52 = vld [vmem:[%s7078_s6 + $0x440] sm:$0xff]  ;;  %v2141_v62 = vadd.f32 %v5998_v59, %v6000_v19 }
 0x2d5   : > { %2762 = vmatpush.msra.mxu3 %v2669_v26 }
 0x2d6   : > { %2959 = vmatpush.msrb.mxu1 %v4007_v27  ;;  %v6047_v6 = vpop.f32.mrf.mxu1  ;;  %v6058_v49 = vpop.f32.mrf.mxu0  ;;  %2822 = vmatpush.msra.mxu2 %v2688_v21  ;;  %v2644_v27 = vld [vmem:[%s7078_s6 + $0x138] sm:$0xff] }
 0x2d7   : > { %2805 = vmatpush.msra.mxu0 %v2644_v27  ;;  %2936 = vmatpush.msrb.mxu3 %v3975_v17  ;;  %v2588_v27 = vperm.slane %v6282_v30, 1  ;;  %v2098_v17 = vadd.f32 %v6047_v6, %v6058_v49  ;;  %v4039_v6 = vld [vmem:[%s7078_s6 + $0x5f0] sm:$0xff] }
 0x2d8   : > { %2960 = vmatpush.msrb.mxu1 %v4005_v12  ;;  %2823 = vmatpush.msra.mxu2 %v2686_v0  ;;  %v2642_v12 = vld [vmem:[%s7078_s6 + $0x128] sm:$0xff] }
 0x2d9   : > { %2806 = vmatpush.msra.mxu0 %v2642_v12  ;;  %2937 = vmatpush.msrb.mxu3 %v3973_v8 }
 0x2da   : > { %2961 = vmatpush.msrb.mxu1 %v4003_v41  ;;  %2824 = vmatpush.msra.mxu2 %v2684_v16  ;;  %v2640_v41 = vld [vmem:[%s7078_s6 + $0x118] sm:$0xff] }
 0x2db   : > { %2807 = vmatpush.msra.mxu0 %v2640_v41  ;;  %2938 = vmatpush.msrb.mxu3 %v3971_v33 }
 0x2dc   : > { %2962 = vmatpush.msrb.mxu1 %v4001_v11  ;;  %2825 = vmatpush.msra.mxu2 %v2682_v48  ;;  %v2638_v11 = vld [vmem:[%s7078_s6 + $0x108] sm:$0xff] }
 0x2dd   : > { %v6060_v9 = vpop.f32.mrf.mxu3  ;;  %v6062_v36 = vpop.f32.mrf.mxu2  ;;  %2808 = vmatpush.msra.mxu0 %v2638_v11  ;;  %2939 = vmatpush.msrb.mxu3 %v3969_v63 }
 0x2de   : > { %2963 = vmatpush.msrb.mxu1 %v3999_v54  ;;  %2826 = vmatpush.msra.mxu2 %v2680_v32  ;;  %v2144_v41 = vadd.f32 %v6060_v9, %v6062_v36  ;;  %v4040_v32 = vld [vmem:[%s7078_s6 + $0x5f8] sm:$0xff]  ;;  %v4037_v9 = vld [vmem:[%s7078_s6 + $0x5e0] sm:$0xff] }
 0x2e0   : > { %2964 = vmatpush.msrb.mxu1 %v3997_v44  ;;  %v6112_v24 = vpop.f32.mrf.mxu1  ;;  %v6114_v20 = vpop.f32.mrf.mxu0  ;;  %2827 = vmatpush.msra.mxu2 %v2678_v37  ;;  %v3967_v44 = vld [vmem:[%s7078_s6 + $0x3b0] sm:$0xff] }
 0x2e1   : > { %2940 = vmatpush.msrb.mxu3 %v3967_v44 }
 0x2e2   : > { %2965 = vmatpush.msrb.mxu1 %v3995_v15  ;;  %2828 = vmatpush.msra.mxu2 %v2676_v1  ;;  %v2672_v15 = vld [vmem:[%s7078_s6 + $0x218] sm:$0xff]  ;;  %v3974_v1 = vld [vmem:[%s7078_s6 + $0x3e8] sm:$0xff] }
 0x2e3   : > { %2941 = vmatpush.msrb.mxu3 %v3965_v23 }
 0x2e4   : > { %2966 = vmatpush.msrb.mxu1 %v3993_v56  ;;  %2829 = vmatpush.msra.mxu2 %v2674_v28  ;;  %v3959_v56 = vld [vmem:[%s7078_s6 + $0x370] sm:$0xff] }
 0x2e5   : > { %2942 = vmatpush.msrb.mxu3 %v3963_v45  ;;  %v3972_v45 = vld [vmem:[%s7078_s6 + $0x3d8] sm:$0xff] }
 0x2e6   : > { %2967 = vmatpush.msrb.mxu1 %v3991_v39  ;;  %2830 = vmatpush.msra.mxu2 %v2672_v15  ;;  %v4036_v15 = vld [vmem:[%s7078_s6 + $0x5d8] sm:$0xff] }
 0x2e7   : > { %v6116_v61 = vpop.f32.mrf.mxu3  ;;  %v6118_v3 = vpop.f32.mrf.mxu2  ;;  %2943 = vmatpush.msrb.mxu3 %v3961_v38  ;;  %v4033_v38 = vld [vmem:[%s7078_s6 + $0x5c0] sm:$0xff] }
 0x2e8   : > { %2968 = vmatpush.msrb.mxu1 %v3989_v7  ;;  %2831 = vmatpush.msra.mxu2 %v2670_v58  ;;  %v3953_v7 = vld [vmem:[%s7078_s6 + $0x340] sm:$0xff]  ;;  %v2216_v2 = vadd.f32 %v6118_v3, %v2095_v60  ;;  %v4031_v60 = vld [vmem:[%s7078_s6 + $0x5b0] sm:$0xff] }
 0x2e9   : > { %2944 = vmatpush.msrb.mxu3 %v3959_v56  ;;  %v3949_v3 = vld [vmem:[%s7078_s6 + $0x320] sm:$0xff] }
 0x2ea   : > { %2969 = vmatpush.msrb.mxu1 %v3987_v31  ;;  %v6167_v50 = vpop.f32.mrf.mxu0  ;;  %v2239_v59 = vadd.f32 %v6116_v61, %v2216_v2  ;;  %v3945_v61 = vld [vmem:[%s7078_s6 + $0x300] sm:$0xff]  ;;  %v4032_v2 = vld [vmem:[%s7078_s6 + $0x5b8] sm:$0xff] }
 0x2eb   : > { %v6159_v25 = vpop.f32.mrf.mxu1  ;;  %2945 = vmatpush.msrb.mxu3 %v3957_v47  ;;  %v3970_v47 = vld [vmem:[%s7078_s6 + $0x3c8] sm:$0xff] }
 0x2ec   : > { %2970 = vmatpush.msrb.mxu1 %v3985_v52 }
 0x2ed   : > { %2946 = vmatpush.msrb.mxu3 %v3955_v5 }
 0x2ee   : > { %2971 = vmatpush.msrb.mxu1 %v3983_v40  ;;  %v3947_v40 = vld [vmem:[%s7078_s6 + $0x310] sm:$0xff] }
 0x2ef   : > { %2947 = vmatpush.msrb.mxu3 %v3953_v7 }
 0x2f0   : > { %2972 = vmatpush.msrb.mxu1 %v3981_v42 }
 0x2f1   : > { %2948 = vmatpush.msrb.mxu3 %v3951_v46  ;;  %v4029_v46 = vld [vmem:[%s7078_s6 + $0x5a0] sm:$0xff] }
 0x2f2   : > { %v6169_v51 = vpop.f32.mrf.mxu3  ;;  %v6177_v55 = vpop.f32.mrf.mxu2  ;;  %2973 = vmatpush.msrb.mxu1 %v3979_v18 }
 0x2f3   : > { %2949 = vmatpush.msrb.mxu3 %v3949_v3  ;;  %v2219_v48 = vadd.f32 %v6177_v55, %v2098_v17  ;;  %v3976_v55 = vld [vmem:[%s7078_s6 + $0x3f8] sm:$0xff] }
 0x2f4   : > { %2974 = vmatpush.msrb.mxu1 %v3977_v53  ;;  %v3964_v3 = vld [vmem:[%s7078_s6 + $0x398] sm:$0xff] }
 0x2f5   : > { %2950 = vmatpush.msrb.mxu3 %v3947_v40  ;;  %v2242_v36 = vadd.f32 %v6169_v51, %v2219_v48  ;;  %v4035_v51 = vld [vmem:[%s7078_s6 + $0x5d0] sm:$0xff]  ;;  %v4021_v40 = vld [vmem:[%s7078_s6 + $0x560] sm:$0xff]  ;;  %v4020_v48 = vld [vmem:[%s7078_s6 + $0x558] sm:$0xff] }
 0x2f6   : > { %v2261_v54 = vpop.f32.mrf.mxu1 }
 0x2f7   : > { %v6230_v57 = vpop.f32.mrf.mxu0  ;;  %v2262_v31 = vadd.f32 %v2261_v54, %v2141_v62  ;;  %2951 = vmatpush.msrb.mxu3 %v3945_v61  ;;  %v3968_v62 = vld [vmem:[%s7078_s6 + $0x3b8] sm:$0xff] }
 0x2fc   : > { %v2284_v43 = vpop.f32.mrf.mxu3 }
 0x2fd   : > { %v6238_v4 = vpop.f32.mrf.mxu2  ;;  %v2285_v0 = vadd.f32 %v2284_v43, %v2262_v31  ;;  %v4038_v43 = vld [vmem:[%s7078_s6 + $0x5e8] sm:$0xff] }
 0x2fe   : > { %v3966_v31 = vld [vmem:[%s7078_s6 + $0x3a8] sm:$0xff] }
 0x300   : > { %v2264_v10 = vpop.f32.mrf.mxu1 }
 0x301   : > { %v6264_v22 = vpop.f32.mrf.mxu0  ;;  %v2265_v33 = vadd.f32 %v2264_v10, %v2144_v41  ;;  %v4034_v10 = vld [vmem:[%s7078_s6 + $0x5c8] sm:$0xff]  ;;  %v4017_v41 = vld [vmem:[%s7078_s6 + $0x540] sm:$0xff] }
 0x306   : > { %v2287_v39 = vpop.f32.mrf.mxu3 }
 0x307   : > { %v6266_v14 = vpop.f32.mrf.mxu2  ;;  %v2288_v44 = vadd.f32 %v2287_v39, %v2265_v33  ;;  %v4016_v33 = vld [vmem:[%s7078_s6 + $0x538] sm:$0xff] }
 0x310   : > { %v2481_v29 = vpop.f32.mrf.mxu1 }
 0x311   : > { %v2527_v21 = vpop.f32.mrf.mxu0 }
 0x316   : > { %v2458_v35 = vpop.f32.mrf.mxu3 }
 0x317   : > { %v2482_v19 = vadd.f32 %v2481_v29, %v2458_v35  ;;  %v2504_v52 = vpop.f32.mrf.mxu2  ;;  %v4030_v29 = vld [vmem:[%s7078_s6 + $0x5a8] sm:$0xff]  ;;  %v4028_v35 = vld [vmem:[%s7078_s6 + $0x598] sm:$0xff] }
 0x318   : > { %v2528_v26 = vadd.f32 %v2527_v21, %v2504_v52  ;;  %v4027_v21 = vld [vmem:[%s7078_s6 + $0x590] sm:$0xff]  ;;  %v2187_v52 = vadd.f32 %v6112_v24, %v6114_v20  ;;  %v4022_v24 = vld [vmem:[%s7078_s6 + $0x568] sm:$0xff]  ;;  %v3960_v20 = vld [vmem:[%s7078_s6 + $0x378] sm:$0xff] }
 0x319   : > { %v2579_v16 = vadd.f32 %v2482_v19, %v2239_v59  ;;  %v2484_v11 = vpop.f32.mrf.mxu1  ;;  %v4025_v59 = vld [vmem:[%s7078_s6 + $0x580] sm:$0xff]  ;;  %v4026_v19 = vld [vmem:[%s7078_s6 + $0x588] sm:$0xff] }
 0x31a   : > { %v2580_v12 = vadd.f32 %v2528_v26, %v2285_v0  ;;  %v2530_v37 = vpop.f32.mrf.mxu0  ;;  %v4024_v0 = vld [vmem:[%s7078_s6 + $0x578] sm:$0xff]  ;;  %v3962_v26 = vld [vmem:[%s7078_s6 + $0x388] sm:$0xff] }
 0x31b   : > { %v2593_v42 = vadd.f32 %v2587_v34, %v2579_v16  ;;  %v2308_v16 = vadd.f32 %v6230_v57, %v2187_v52  ;;  %v3159_v52 = vld [vmem:[%s7079_s7 + $0x70] sm:$0xff] }
 0x31c   : > { %v2594_v8 = vadd.f32 %v2588_v27, %v2580_v12  ;;  %v4019_v12 = vld [vmem:[%s7078_s6 + $0x550] sm:$0xff] }
 0x31d   : > { %v6304_v18 = vmax.f32 %v2593_v42, 0.0  ;;  %v2331_v57 = vadd.f32 %v6238_v4, %v2308_v16  ;;  %v2589_v42 = vperm.slane %v6282_v30, 2  ;;  %v4018_v4 = vld [vmem:[%s7078_s6 + $0x548] sm:$0xff]  ;;  %v4015_v30 = vld [vmem:[%s7078_s6 + $0x530] sm:$0xff]  ;;  %v3156_v16 = vld [vmem:[%s7079_s7 + $0x58] sm:$0xff] }
 0x31e   : > { %v6309_v49 = vmax.f32 %v2594_v8, 0.0  ;;  %v3958_v8 = vld [vmem:[%s7078_s6 + $0x368] sm:$0xff] }
 0x31f   : > { %v2461_v53 = vpop.f32.mrf.mxu3  ;;  %2717 = vmatmul.f32.vlgmr.msrb.gmra.mxu0 %v6304_v18  ;;  %2786 = vmatmul.f32.vlgmr.msra.gmra.mxu1 %v6304_v18 }
 0x320   : > { %v2485_v63 = vadd.f32 %v2484_v11, %v2461_v53  ;;  %v2507_v54 = vpop.f32.mrf.mxu2  ;;  %2740 = vmatmul.f32.vlgmr.msrb.gmra.mxu2 %v6309_v49  ;;  %2982 = vmatpush.msrb.mxu0 %v4039_v6  ;;  %v3956_v11 = vld [vmem:[%s7078_s6 + $0x358] sm:$0xff] }
 0x321   : > { %v2531_v28 = vadd.f32 %v2530_v37, %v2507_v54  ;;  %3051 = vmatpush.msra.mxu1 %v4040_v32  ;;  %3005 = vmatpush.msrb.mxu2 %v3976_v55  ;;  %v2190_v32 = vadd.f32 %v6159_v25, %v6167_v50  ;;  %v4008_v25 = vld [vmem:[%s7078_s6 + $0x4f8] sm:$0xff]  ;;  %v4013_v50 = vld [vmem:[%s7078_s6 + $0x520] sm:$0xff] }
 0x322   : > { %v2582_v23 = vadd.f32 %v2485_v63, %v2242_v36  ;;  %2983 = vmatpush.msrb.mxu0 %v4037_v9  ;;  %v4014_v63 = vld [vmem:[%s7078_s6 + $0x528] sm:$0xff] }
 0x323   : > { %v2583_v58 = vadd.f32 %v2531_v28, %v2288_v44  ;;  %3052 = vmatpush.msra.mxu1 %v4038_v43  ;;  %3006 = vmatpush.msrb.mxu2 %v3974_v1  ;;  %v2311_v53 = vadd.f32 %v6264_v22, %v2190_v32  ;;  %v3954_v22 = vld [vmem:[%s7078_s6 + $0x348] sm:$0xff]  ;;  %v4011_v44 = vld [vmem:[%s7078_s6 + $0x510] sm:$0xff]  ;;  %v4012_v28 = vld [vmem:[%s7078_s6 + $0x518] sm:$0xff] }
 0x324   : > { %v2596_v56 = vadd.f32 %v2587_v34, %v2582_v23  ;;  %2984 = vmatpush.msrb.mxu0 %v4035_v51  ;;  %v4023_v34 = vld [vmem:[%s7078_s6 + $0x570] sm:$0xff]  ;;  %v4006_v1 = vld [vmem:[%s7078_s6 + $0x4e8] sm:$0xff]  ;;  %v4004_v23 = vld [vmem:[%s7078_s6 + $0x4d8] sm:$0xff] }
 0x325   : > { %v2597_v39 = vadd.f32 %v2588_v27, %v2583_v58  ;;  %3053 = vmatpush.msra.mxu1 %v4036_v15  ;;  %3007 = vmatpush.msrb.mxu2 %v3972_v45  ;;  %v2334_v54 = vadd.f32 %v6266_v14, %v2311_v53  ;;  %v3952_v14 = vld [vmem:[%s7078_s6 + $0x338] sm:$0xff]  ;;  %v4009_v15 = vld [vmem:[%s7078_s6 + $0x500] sm:$0xff]  ;;  %v4010_v45 = vld [vmem:[%s7078_s6 + $0x508] sm:$0xff] }
 0x326   : > { %v6348_v5 = vmax.f32 %v2596_v56, 0.0  ;;  %2985 = vmatpush.msrb.mxu0 %v4033_v38  ;;  %v4002_v38 = vld [vmem:[%s7078_s6 + $0x4c8] sm:$0xff]  ;;  %v3152_v32 = vld [vmem:[%s7079_s7 + $0x38] sm:$0xff]  ;;  %v3151_v53 = vld [vmem:[%s7079_s7 + $0x30] sm:$0xff] }
 0x327   : > { %v6353_v7 = vmax.f32 %v2597_v39, 0.0  ;;  %3054 = vmatpush.msra.mxu1 %v4034_v10  ;;  %3008 = vmatpush.msrb.mxu2 %v3970_v47  ;;  %v4000_v10 = vld [vmem:[%s7078_s6 + $0x4b8] sm:$0xff]  ;;  %v3950_v47 = vld [vmem:[%s7078_s6 + $0x328] sm:$0xff] }
 0x328   : > { %2720 = vmatmul.f32.gmra.mxu0 %v6348_v5  ;;  %2789 = vmatmul.f32.gmra.mxu1 %v6348_v5  ;;  %v3998_v39 = vld [vmem:[%s7078_s6 + $0x4a8] sm:$0xff] }
 0x329   : > { %2743 = vmatmul.f32.gmra.mxu2 %v6353_v7  ;;  %2986 = vmatpush.msrb.mxu0 %v4031_v60  ;;  %v3948_v60 = vld [vmem:[%s7078_s6 + $0x318] sm:$0xff] }
 0x32a   : > { %3055 = vmatpush.msra.mxu1 %v4032_v2  ;;  %3009 = vmatpush.msrb.mxu2 %v3968_v62  ;;  %v3996_v2 = vld [vmem:[%s7078_s6 + $0x498] sm:$0xff]  ;;  %v3946_v62 = vld [vmem:[%s7078_s6 + $0x308] sm:$0xff] }
 0x32b   : > { %2987 = vmatpush.msrb.mxu0 %v4029_v46  ;;  %v3994_v46 = vld [vmem:[%s7078_s6 + $0x488] sm:$0xff] }
 0x32c   : > { %3056 = vmatpush.msra.mxu1 %v4030_v29  ;;  %3010 = vmatpush.msrb.mxu2 %v3966_v31  ;;  %v3992_v29 = vld [vmem:[%s7078_s6 + $0x478] sm:$0xff]  ;;  %v3990_v31 = vld [vmem:[%s7078_s6 + $0x468] sm:$0xff] }
 0x32d   : > { %2988 = vmatpush.msrb.mxu0 %v4027_v21  ;;  %v3988_v21 = vld [vmem:[%s7078_s6 + $0x458] sm:$0xff] }
 0x32e   : > { %3057 = vmatpush.msra.mxu1 %v4028_v35  ;;  %3011 = vmatpush.msrb.mxu2 %v3964_v3  ;;  %v3986_v35 = vld [vmem:[%s7078_s6 + $0x448] sm:$0xff]  ;;  %v3984_v3 = vld [vmem:[%s7078_s6 + $0x438] sm:$0xff] }
 0x32f   : > { %2989 = vmatpush.msrb.mxu0 %v4025_v59  ;;  %v3980_v59 = vld [vmem:[%s7078_s6 + $0x418] sm:$0xff] }
 0x330   : > { %v2573_v27 = vpop.f32.mrf.mxu3  ;;  %3058 = vmatpush.msra.mxu1 %v4026_v19  ;;  %2809 = vmatmul.f32.vlgmr.msra.gmra.mxu0 %v6309_v49  ;;  %v3978_v19 = vld [vmem:[%s7078_s6 + $0x408] sm:$0xff] }
 0x331   : > { %2975 = vmatmul.f32.vlgmr.msrb.gmra.mxu1 %v6309_v49  ;;  %2990 = vmatpush.msrb.mxu0 %v4023_v34  ;;  %v3168_v34 = vld [vmem:[%s7079_s7 + $0xb8] sm:$0xff] }
 0x332   : > { %v2550_v17 = vpop.f32.mrf.mxu1  ;;  %3059 = vmatpush.msra.mxu1 %v4024_v0  ;;  %3012 = vmatpush.msrb.mxu2 %v3962_v26  ;;  %v3166_v26 = vld [vmem:[%s7079_s7 + $0xa8] sm:$0xff] }
 0x333   : > { %v2574_v61 = vadd.f32 %v2573_v27, %v2550_v17  ;;  %2991 = vmatpush.msrb.mxu0 %v4021_v40  ;;  %v3157_v27 = vld [vmem:[%s7079_s7 + $0x60] sm:$0xff]  ;;  %v3163_v17 = vld [vmem:[%s7079_s7 + $0x90] sm:$0xff] }
 0x334   : > { %3060 = vmatpush.msra.mxu1 %v4022_v24  ;;  %3013 = vmatpush.msrb.mxu2 %v3960_v20  ;;  %v3165_v40 = vld [vmem:[%s7079_s7 + $0xa0] sm:$0xff]  ;;  %v3164_v24 = vld [vmem:[%s7079_s7 + $0x98] sm:$0xff]  ;;  %v3155_v20 = vld [vmem:[%s7079_s7 + $0x50] sm:$0xff] }
 0x335   : > { %v2581_v6 = vadd.f32 %v2574_v61, %v2331_v57  ;;  %2992 = vmatpush.msrb.mxu0 %v4019_v12  ;;  %v3154_v57 = vld [vmem:[%s7079_s7 + $0x48] sm:$0xff] }
 0x336   : > { %3061 = vmatpush.msra.mxu1 %v4020_v48  ;;  %3014 = vmatpush.msrb.mxu2 %v3958_v8  ;;  %v3162_v61 = vld [vmem:[%s7079_s7 + $0x88] sm:$0xff]  ;;  %v3161_v48 = vld [vmem:[%s7079_s7 + $0x80] sm:$0xff]  ;;  %v4065_v8 = vld [vmem:[%s7079_s7 + $0x178] sm:$0xff] }
 0x337   : > { %v2595_v55 = vadd.f32 %v2589_v42, %v2581_v6  ;;  %2993 = vmatpush.msrb.mxu0 %v4017_v41 }
 0x338   : > { %3062 = vmatpush.msra.mxu1 %v4018_v4  ;;  %2812 = vmatmul.f32.gmra.mxu0 %v6353_v7  ;;  %v2576_v36 = vpop.f32.mrf.mxu3  ;;  %v4082_v4 = vld [vmem:[%s7079_s7 + $0x1f8] sm:$0xff] }
 0x339   : > { %v2601_v9 = vmax.f32 %v2595_v55, 0.0  ;;  %2978 = vmatmul.f32.gmra.mxu1 %v6353_v7  ;;  %2994 = vmatpush.msrb.mxu0 %v4015_v30  ;;  %v4057_v30 = vld [vmem:[%s7079_s7 + $0x138] sm:$0xff]  ;;  %v4064_v55 = vld [vmem:[%s7079_s7 + $0x170] sm:$0xff] }
 0x33a   : > { %v2553_v37 = vpop.f32.mrf.mxu1  ;;  %3063 = vmatpush.msra.mxu1 %v4016_v33  ;;  %3015 = vmatpush.msrb.mxu2 %v3956_v11  ;;  %v4081_v33 = vld [vmem:[%s7079_s7 + $0x1f0] sm:$0xff] }
 0x33b   : > { %v2577_v43 = vadd.f32 %v2576_v36, %v2553_v37  ;;  %2763 = vmatmul.f32.vlgmr.msra.gmra.mxu3 %v2601_v9  ;;  %2832 = vmatmul.f32.vlgmr.msra.gmra.mxu2 %v2601_v9  ;;  %v4056_v11 = vld [vmem:[%s7079_s7 + $0x130] sm:$0xff]  ;;  %v3150_v36 = vld [vmem:[%s7079_s7 + $0x28] sm:$0xff]  ;;  %v4062_v37 = vld [vmem:[%s7079_s7 + $0x160] sm:$0xff] }
 0x33c   : > { %3028 = vmatpush.msra.mxu3 %v4008_v25  ;;  %2995 = vmatpush.msrb.mxu0 %v4013_v50  ;;  %v4080_v25 = vld [vmem:[%s7079_s7 + $0x1e8] sm:$0xff] }
 0x33d   : > { %v2584_v51 = vadd.f32 %v2577_v43, %v2334_v54  ;;  %3064 = vmatpush.msra.mxu1 %v4014_v63  ;;  %3016 = vmatpush.msrb.mxu2 %v3954_v22  ;;  %v4055_v50 = vld [vmem:[%s7079_s7 + $0x128] sm:$0xff]  ;;  %v4079_v63 = vld [vmem:[%s7079_s7 + $0x1e0] sm:$0xff] }
 0x33e   : > { %3029 = vmatpush.msra.mxu3 %v4006_v1  ;;  %2996 = vmatpush.msrb.mxu0 %v4011_v44  ;;  %v4054_v54 = vld [vmem:[%s7079_s7 + $0x120] sm:$0xff] }
 0x33f   : > { %v2598_v58 = vadd.f32 %v2589_v42, %v2584_v51  ;;  %3065 = vmatpush.msra.mxu1 %v4012_v28  ;;  %3017 = vmatpush.msrb.mxu2 %v3952_v14  ;;  %v3153_v42 = vld [vmem:[%s7079_s7 + $0x40] sm:$0xff]  ;;  %v4061_v14 = vld [vmem:[%s7079_s7 + $0x158] sm:$0xff] }
 0x340   : > { %3030 = vmatpush.msra.mxu3 %v4004_v23  ;;  %2997 = vmatpush.msrb.mxu0 %v4009_v15  ;;  %v3149_v28 = vld [vmem:[%s7079_s7 + $0x20] sm:$0xff]  ;;  %v4078_v51 = vld [vmem:[%s7079_s7 + $0x1d8] sm:$0xff] }
 0x341   : > { %v2604_v56 = vmax.f32 %v2598_v58, 0.0  ;;  %3066 = vmatpush.msra.mxu1 %v4010_v45  ;;  %2998 = vmatmul.f32.vlgmr.msrb.gmra.mxu0 %v2601_v9  ;;  %v4053_v23 = vld [vmem:[%s7079_s7 + $0x118] sm:$0xff]  ;;  %v4060_v45 = vld [vmem:[%s7079_s7 + $0x150] sm:$0xff] }
 0x342   : > { %3031 = vmatpush.msra.mxu3 %v4002_v38  ;;  %3067 = vmatmul.f32.vlgmr.msra.gmra.mxu1 %v2601_v9  ;;  %v4063_v9 = vld [vmem:[%s7079_s7 + $0x168] sm:$0xff]  ;;  %v3148_v15 = vld [vmem:[%s7079_s7 + $0x18] sm:$0xff]  ;;  %v4077_v58 = vld [vmem:[%s7079_s7 + $0x1d0] sm:$0xff] }
 0x343   : > { %2766 = vmatmul.f32.gmra.mxu3 %v2604_v56  ;;  %2835 = vmatmul.f32.gmra.mxu2 %v2604_v56  ;;  %v4052_v38 = vld [vmem:[%s7079_s7 + $0x110] sm:$0xff] }
 0x344   : > { %3032 = vmatpush.msra.mxu3 %v4000_v10  ;;  %3018 = vmatpush.msrb.mxu2 %v3950_v47  ;;  %v3147_v47 = vld [vmem:[%s7079_s7 + $0x10] sm:$0xff] }
 0x345   : > { %3321 = vmatpush.msrb.mxu1 %v4082_v4  ;;  %v4103_v4 = vld [vmem:[%s7079_s7 + $0x298] sm:$0xff] }
 0x346   : > { %3033 = vmatpush.msra.mxu3 %v3998_v39  ;;  %3019 = vmatpush.msrb.mxu2 %v3948_v60  ;;  %v4059_v39 = vld [vmem:[%s7079_s7 + $0x148] sm:$0xff] }
 0x347   : > { %3322 = vmatpush.msrb.mxu1 %v4081_v33  ;;  %v4076_v60 = vld [vmem:[%s7079_s7 + $0x1c8] sm:$0xff] }
 0x348   : > { %3034 = vmatpush.msra.mxu3 %v3996_v2  ;;  %3020 = vmatpush.msrb.mxu2 %v3946_v62  ;;  %v4051_v2 = vld [vmem:[%s7079_s7 + $0x108] sm:$0xff] }
 0x349   : > { %3001 = vmatmul.f32.gmra.mxu0 %v2604_v56  ;;  %3323 = vmatpush.msrb.mxu1 %v4080_v25 }
 0x34a   : > { %3035 = vmatpush.msra.mxu3 %v3994_v46  ;;  %3070 = vmatmul.f32.gmra.mxu1 %v2604_v56  ;;  %v3146_v46 = vld [vmem:[%s7079_s7 + $0x8] sm:$0xff] }
 0x34b   : > { %2952 = vmatmul.f32.vlgmr.msrb.gmra.mxu3 %v6304_v18  ;;  %3021 = vmatmul.f32.vlgmr.msrb.gmra.mxu2 %v6304_v18  ;;  %v3982_v18 = vld [vmem:[%s7078_s6 + $0x428] sm:$0xff] }
 0x34c   : > { %3036 = vmatpush.msra.mxu3 %v3992_v29  ;;  %3203 = vmatpush.msra.mxu2 %v3168_v34  ;;  %v4058_v29 = vld [vmem:[%s7079_s7 + $0x140] sm:$0xff]  ;;  %v4115_v34 = vld [vmem:[%s7079_s7 + $0x2f8] sm:$0xff] }
 0x34d   : > { %3324 = vmatpush.msrb.mxu1 %v4079_v63  ;;  %v4101_v63 = vld [vmem:[%s7079_s7 + $0x288] sm:$0xff] }
 0x34e   : > { %3037 = vmatpush.msra.mxu3 %v3990_v31  ;;  %v4075_v31 = vld [vmem:[%s7079_s7 + $0x1c0] sm:$0xff] }
 0x34f   : > { %3325 = vmatpush.msrb.mxu1 %v4078_v51  ;;  %v4100_v51 = vld [vmem:[%s7079_s7 + $0x280] sm:$0xff] }
 0x350   : > { %3038 = vmatpush.msra.mxu3 %v3988_v21  ;;  %v4050_v21 = vld [vmem:[%s7079_s7 + $0x100] sm:$0xff] }
 0x351   : > { %3326 = vmatpush.msrb.mxu1 %v4077_v58  ;;  %v4090_v58 = vld [vmem:[%s7079_s7 + $0x238] sm:$0xff] }
 0x352   : > { %3039 = vmatpush.msra.mxu3 %v3986_v35  ;;  %v4107_v35 = vld [vmem:[%s7079_s7 + $0x2b8] sm:$0xff] }
 0x353   : > { %2955 = vmatmul.f32.gmra.mxu3 %v6348_v5  ;;  %3024 = vmatmul.f32.gmra.mxu2 %v6348_v5  ;;  %v3160_v5 = vld [vmem:[%s7079_s7 + $0x78] sm:$0xff] }
 0x354   : > { %3040 = vmatpush.msra.mxu3 %v3984_v3  ;;  %3175 = vmatpush.msra.mxu0 %v3160_v5  ;;  %v4106_v5 = vld [vmem:[%s7079_s7 + $0x2b0] sm:$0xff] }
 0x355   : > { %3327 = vmatpush.msrb.mxu1 %v4076_v60  ;;  %v4089_v60 = vld [vmem:[%s7079_s7 + $0x230] sm:$0xff] }
 0x356   : > { %3041 = vmatpush.msra.mxu3 %v3982_v18  ;;  %3176 = vmatpush.msra.mxu0 %v3159_v52  ;;  %v3145_v18 = vld [vmem:[%s7079_s7] sm:$0xff]  ;;  %v4073_v52 = vld [vmem:[%s7079_s7 + $0x1b0] sm:$0xff] }
 0x357   : > { %3328 = vmatpush.msrb.mxu1 %v4075_v31  ;;  %v4088_v31 = vld [vmem:[%s7079_s7 + $0x228] sm:$0xff] }
 0x358   : > { %3042 = vmatpush.msra.mxu3 %v3980_v59  ;;  %v4074_v59 = vld [vmem:[%s7079_s7 + $0x1b8] sm:$0xff] }
 0x359   : > { %3329 = vmatpush.msrb.mxu1 %v4074_v59  ;;  %v4096_v59 = vld [vmem:[%s7079_s7 + $0x260] sm:$0xff] }
 0x35a   : > { %3043 = vmatpush.msra.mxu3 %v3978_v19  ;;  %v4049_v19 = vld [vmem:[%s7079_s7 + $0xf8] sm:$0xff] }
 0x35b   : > { %3044 = vmatmul.f32.vlgmr.msra.gmra.mxu3 %v6309_v49  ;;  %v3167_v49 = vld [vmem:[%s7079_s7 + $0xb0] sm:$0xff]  ;;  %3330 = vmatpush.msrb.mxu1 %v4073_v52 }
 0x35c   : > { %3204 = vmatpush.msra.mxu2 %v3167_v49  ;;  %3276 = vmatpush.msrb.mxu3 %v4065_v8 }
 0x35e   : > { %3205 = vmatpush.msra.mxu2 %v3166_v26  ;;  %3277 = vmatpush.msrb.mxu3 %v4064_v55  ;;  %v4105_v26 = vld [vmem:[%s7079_s7 + $0x2a8] sm:$0xff]  ;;  %v4070_v55 = vld [vmem:[%s7079_s7 + $0x198] sm:$0xff] }
 0x360   : > { %3206 = vmatpush.msra.mxu2 %v3165_v40  ;;  %3278 = vmatpush.msrb.mxu3 %v4063_v9  ;;  %v4111_v9 = vld [vmem:[%s7079_s7 + $0x2d8] sm:$0xff] }
 0x362   : > { %3207 = vmatpush.msra.mxu2 %v3164_v24  ;;  %3279 = vmatpush.msrb.mxu3 %v4062_v37  ;;  %v4072_v24 = vld [vmem:[%s7079_s7 + $0x1a8] sm:$0xff]  ;;  %v4044_v37 = vld [vmem:[%s7079_s7 + $0xd0] sm:$0xff] }
 0x363   : > { %3047 = vmatmul.f32.gmra.mxu3 %v6353_v7  ;;  %v3158_v7 = vld [vmem:[%s7079_s7 + $0x68] sm:$0xff]  ;;  %3331 = vmatpush.msrb.mxu1 %v4072_v24 }
 0x364   : > { %3177 = vmatpush.msra.mxu0 %v3158_v7  ;;  %3208 = vmatpush.msra.mxu2 %v3163_v17  ;;  %v4048_v7 = vld [vmem:[%s7079_s7 + $0xf0] sm:$0xff]  ;;  %v4047_v17 = vld [vmem:[%s7079_s7 + $0xe8] sm:$0xff] }
 0x365   : > { %3280 = vmatpush.msrb.mxu3 %v4061_v14  ;;  %v4043_v14 = vld [vmem:[%s7079_s7 + $0xc8] sm:$0xff] }
 0x366   : > { %3178 = vmatpush.msra.mxu0 %v3157_v27  ;;  %3209 = vmatpush.msra.mxu2 %v3162_v61  ;;  %v4114_v27 = vld [vmem:[%s7079_s7 + $0x2f0] sm:$0xff] }
 0x367   : > { %3281 = vmatpush.msrb.mxu3 %v4060_v45  ;;  %v4042_v45 = vld [vmem:[%s7079_s7 + $0xc0] sm:$0xff] }
 0x368   : > { %3179 = vmatpush.msra.mxu0 %v3156_v16  ;;  %3210 = vmatpush.msra.mxu2 %v3161_v48  ;;  %v4071_v48 = vld [vmem:[%s7079_s7 + $0x1a0] sm:$0xff] }
 0x369   : > { %3282 = vmatpush.msrb.mxu3 %v4059_v39  ;;  %3332 = vmatpush.msrb.mxu1 %v4071_v48 }
 0x36a   : > { %3180 = vmatpush.msra.mxu0 %v3155_v20  ;;  %3248 = vmatpush.msrb.mxu2 %v4057_v30  ;;  %v4112_v30 = vld [vmem:[%s7079_s7 + $0x2e0] sm:$0xff] }
 0x36b   : > { %3283 = vmatpush.msrb.mxu3 %v4058_v29  ;;  %3333 = vmatpush.msrb.mxu1 %v4070_v55 }
 0x36c   : > { %3181 = vmatpush.msra.mxu0 %v3154_v57  ;;  %3249 = vmatpush.msrb.mxu2 %v4056_v11  ;;  %v4104_v57 = vld [vmem:[%s7079_s7 + $0x2a0] sm:$0xff]  ;;  %v4045_v11 = vld [vmem:[%s7079_s7 + $0xd8] sm:$0xff] }
 0x36d   : > { %3394 = vmatpush.msra.mxu3 %v4107_v35 }
 0x36e   : > { %3182 = vmatpush.msra.mxu0 %v3153_v42  ;;  %3250 = vmatpush.msrb.mxu2 %v4055_v50  ;;  %v4069_v50 = vld [vmem:[%s7079_s7 + $0x190] sm:$0xff] }
 0x36f   : > { %3395 = vmatpush.msra.mxu3 %v4106_v5  ;;  %3334 = vmatpush.msrb.mxu1 %v4069_v50  ;;  %v4132_v50 = vld [vmem:[%s7079_s7 + $0x378] sm:$0xff] }
 0x370   : > { %3183 = vmatpush.msra.mxu0 %v3152_v32  ;;  %3251 = vmatpush.msrb.mxu2 %v4054_v54  ;;  %v4110_v54 = vld [vmem:[%s7079_s7 + $0x2d0] sm:$0xff] }
 0x371   : > { %3396 = vmatpush.msra.mxu3 %v4105_v26 }
 0x372   : > { %3184 = vmatpush.msra.mxu0 %v3151_v53  ;;  %3252 = vmatpush.msrb.mxu2 %v4053_v23  ;;  %v4102_v53 = vld [vmem:[%s7079_s7 + $0x290] sm:$0xff]  ;;  %v4109_v23 = vld [vmem:[%s7079_s7 + $0x2c8] sm:$0xff] }
 0x373   : > { %3397 = vmatpush.msra.mxu3 %v4104_v57  ;;  %v4093_v57 = vld [vmem:[%s7079_s7 + $0x248] sm:$0xff] }
 0x374   : > { %3185 = vmatpush.msra.mxu0 %v3150_v36  ;;  %3253 = vmatpush.msrb.mxu2 %v4052_v38  ;;  %v4099_v38 = vld [vmem:[%s7079_s7 + $0x278] sm:$0xff] }
 0x375   : > { %3398 = vmatpush.msra.mxu3 %v4103_v4 }
 0x376   : > { %3186 = vmatpush.msra.mxu0 %v3149_v28  ;;  %3254 = vmatpush.msrb.mxu2 %v4051_v2  ;;  %v4068_v28 = vld [vmem:[%s7079_s7 + $0x188] sm:$0xff]  ;;  %v4098_v2 = vld [vmem:[%s7079_s7 + $0x270] sm:$0xff] }
 0x377   : > { %3399 = vmatpush.msra.mxu3 %v4102_v53  ;;  %3335 = vmatpush.msrb.mxu1 %v4068_v28  ;;  %v4156_v28 = vld [vmem:[%s7079_s7 + $0x430] sm:$0xff] }
 0x378   : > { %3187 = vmatpush.msra.mxu0 %v3148_v15  ;;  %3255 = vmatpush.msrb.mxu2 %v4050_v21  ;;  %v4067_v15 = vld [vmem:[%s7079_s7 + $0x180] sm:$0xff]  ;;  %v4097_v21 = vld [vmem:[%s7079_s7 + $0x268] sm:$0xff] }
 0x379   : > { %3400 = vmatpush.msra.mxu3 %v4101_v63  ;;  %3336 = vmatpush.msrb.mxu1 %v4067_v15  ;;  %v4157_v63 = vld [vmem:[%s7079_s7 + $0x438] sm:$0xff] }
 0x37a   : > { %3188 = vmatpush.msra.mxu0 %v3147_v47  ;;  %3256 = vmatpush.msrb.mxu2 %v4049_v19  ;;  %v4108_v47 = vld [vmem:[%s7079_s7 + $0x2c0] sm:$0xff] }
 0x37b   : > { %3401 = vmatpush.msra.mxu3 %v4100_v51  ;;  %3349 = vmatpush.msra.mxu1 %v4090_v58  ;;  %v4155_v51 = vld [vmem:[%s7079_s7 + $0x428] sm:$0xff]  ;;  %v4129_v58 = vld [vmem:[%s7079_s7 + $0x360] sm:$0xff] }
 0x37c   : > { %3189 = vmatpush.msra.mxu0 %v3146_v46  ;;  %3257 = vmatpush.msrb.mxu2 %v4048_v7  ;;  %v4094_v7 = vld [vmem:[%s7079_s7 + $0x250] sm:$0xff] }
 0x37d   : > { %3402 = vmatpush.msra.mxu3 %v4099_v38  ;;  %3350 = vmatpush.msra.mxu1 %v4089_v60  ;;  %v4154_v38 = vld [vmem:[%s7079_s7 + $0x420] sm:$0xff]  ;;  %v4128_v60 = vld [vmem:[%s7079_s7 + $0x358] sm:$0xff] }
 0x37e   : > { %3190 = vmatpush.msra.mxu0 %v3145_v18  ;;  %3258 = vmatpush.msrb.mxu2 %v4047_v17  ;;  %v4087_v18 = vld [vmem:[%s7079_s7 + $0x220] sm:$0xff]  ;;  %v4084_v17 = vld [vmem:[%s7079_s7 + $0x208] sm:$0xff] }
 0x37f   : > { %3403 = vmatpush.msra.mxu3 %v4098_v2  ;;  %3351 = vmatpush.msra.mxu1 %v4088_v31  ;;  %v4153_v2 = vld [vmem:[%s7079_s7 + $0x418] sm:$0xff]  ;;  %v4163_v31 = vld [vmem:[%s7079_s7 + $0x468] sm:$0xff] }
 0x380   : > { %3422 = vmatpush.msrb.mxu0 %v4115_v34 }
 0x381   : > { %3404 = vmatpush.msra.mxu3 %v4097_v21  ;;  %3352 = vmatpush.msra.mxu1 %v4087_v18  ;;  %v4126_v21 = vld [vmem:[%s7079_s7 + $0x348] sm:$0xff] }
 0x382   : > { %3423 = vmatpush.msrb.mxu0 %v4114_v27 }
 0x383   : > { %3405 = vmatpush.msra.mxu3 %v4096_v59  ;;  %v4125_v59 = vld [vmem:[%s7079_s7 + $0x340] sm:$0xff] }
 0x39c   : > { %v6539_v0 = vpop.f32.mrf.mxu0  ;;  %v6585_v41 = vpop.f32.mrf.mxu1 }
 0x3a3   : > { %v6587_v6 = vpop.f32.mrf.mxu2 }
 0x3a4   : > { %v2742_v40 = vadd.f32 %v6587_v6, %v6539_v0  ;;  %v4113_v0 = vld [vmem:[%s7079_s7 + $0x2e8] sm:$0xff]  ;;  %v4046_v6 = vld [vmem:[%s7079_s7 + $0xe0] sm:$0xff] }
 0x3a5   : > { %v6568_v12 = vpop.f32.mrf.mxu0  ;;  %v6635_v1 = vpop.f32.mrf.mxu1  ;;  %3424 = vmatpush.msrb.mxu0 %v4113_v0  ;;  %3259 = vmatpush.msrb.mxu2 %v4046_v6 }
 0x3a7   : > { %3425 = vmatpush.msrb.mxu0 %v4112_v30  ;;  %3260 = vmatpush.msrb.mxu2 %v4045_v11 }
 0x3a9   : > { %3426 = vmatpush.msrb.mxu0 %v4111_v9  ;;  %3261 = vmatpush.msrb.mxu2 %v4044_v37 }
 0x3ab   : > { %3427 = vmatpush.msrb.mxu0 %v4110_v54  ;;  %3262 = vmatpush.msrb.mxu2 %v4043_v14  ;;  %v4131_v54 = vld [vmem:[%s7079_s7 + $0x370] sm:$0xff]  ;;  %v4130_v14 = vld [vmem:[%s7079_s7 + $0x368] sm:$0xff] }
 0x3ac   : > { %v6637_v44 = vpop.f32.mrf.mxu2 }
 0x3ad   : > { %v6628_v22 = vpop.f32.mrf.mxu0  ;;  %3428 = vmatpush.msrb.mxu0 %v4109_v23  ;;  %3263 = vmatpush.msrb.mxu2 %v4042_v45  ;;  %v2745_v26 = vadd.f32 %v6637_v44, %v6568_v12 }
 0x3ae   : > { %v2976_v3 = vpop.f32.mrf.mxu1  ;;  %v2811_v35 = vadd.f32 %v6628_v22, %v6585_v41  ;;  %v4086_v41 = vld [vmem:[%s7079_s7 + $0x218] sm:$0xff] }
 0x3af   : > { %3429 = vmatpush.msrb.mxu0 %v4108_v47  ;;  %v4095_v22 = vld [vmem:[%s7079_s7 + $0x258] sm:$0xff]  ;;  %3353 = vmatpush.msra.mxu1 %v4086_v41 }
 0x3b0   : > { %3406 = vmatpush.msra.mxu3 %v4095_v22  ;;  %v4165_v47 = vld [vmem:[%s7079_s7 + $0x478] sm:$0xff] }
 0x3b1   : > { %v4124_v22 = vld [vmem:[%s7079_s7 + $0x338] sm:$0xff] }
 0x3b2   : > { %3407 = vmatpush.msra.mxu3 %v4094_v7  ;;  %v4123_v7 = vld [vmem:[%s7079_s7 + $0x330] sm:$0xff] }
 0x3b4   : > { %3408 = vmatpush.msra.mxu3 %v4093_v57  ;;  %v4121_v57 = vld [vmem:[%s7079_s7 + $0x320] sm:$0xff] }
 0x3b5   : > { %v6663_v56 = vpop.f32.mrf.mxu0 }
 0x3b6   : > { %v2979_v33 = vpop.f32.mrf.mxu1 }
 0x3be   : > { %v6633_v43 = vpop.f32.mrf.mxu3  ;;  %v6679_v62 = vpop.f32.mrf.mxu2 }
 0x3bf   : > { %v2999_v20 = vpop.f32.mrf.mxu0  ;;  %v2765_v61 = vadd.f32 %v6633_v43, %v2742_v40  ;;  %v3068_v46 = vpop.f32.mrf.mxu1  ;;  %v2834_v19 = vadd.f32 %v6679_v62, %v2811_v35  ;;  %v4085_v62 = vld [vmem:[%s7079_s7 + $0x210] sm:$0xff]  ;;  %v4151_v35 = vld [vmem:[%s7079_s7 + $0x408] sm:$0xff] }
 0x3c0   : > { %3354 = vmatpush.msra.mxu1 %v4085_v62  ;;  %v4149_v62 = vld [vmem:[%s7079_s7 + $0x3f8] sm:$0xff] }
 0x3c2   : > { %3355 = vmatpush.msra.mxu1 %v4084_v17  ;;  %v4147_v17 = vld [vmem:[%s7079_s7 + $0x3e8] sm:$0xff] }
 0x3c6   : > { %v6665_v10 = vpop.f32.mrf.mxu3  ;;  %v6741_v8 = vpop.f32.mrf.mxu2 }
 0x3c7   : > { %v2768_v0 = vadd.f32 %v6665_v10, %v2745_v26  ;;  %v4160_v26 = vld [vmem:[%s7079_s7 + $0x450] sm:$0xff]  ;;  %v4143_v10 = vld [vmem:[%s7079_s7 + $0x3c8] sm:$0xff] }
 0x3ce   : > { %v2953_v49 = vpop.f32.mrf.mxu3  ;;  %v3022_v39 = vpop.f32.mrf.mxu2 }
 0x3cf   : > { %v2977_v16 = vadd.f32 %v2976_v3, %v2953_v49  ;;  %v3002_v49 = vpop.f32.mrf.mxu0 }
 0x3d1   : > { %v3000_v42 = vadd.f32 %v2999_v20, %v2977_v16  ;;  %v2814_v16 = vadd.f32 %v6663_v56, %v6635_v1  ;;  %v4083_v1 = vld [vmem:[%s7079_s7 + $0x200] sm:$0xff] }
 0x3d2   : > { %3356 = vmatpush.msra.mxu1 %v4083_v1 }
 0x3d3   : > { %v3074_v32 = vmax.f32 %v2765_v61, %v3000_v42  ;;  %v2837_v56 = vadd.f32 %v6741_v8, %v2814_v16  ;;  %v3071_v61 = vpop.f32.mrf.mxu1  ;;  %v4092_v42 = vld [vmem:[%s7079_s7 + $0x240] sm:$0xff]  ;;  %v4122_v16 = vld [vmem:[%s7079_s7 + $0x328] sm:$0xff] }
 0x3d4   : > { %3409 = vmatpush.msra.mxu3 %v4092_v42  ;;  %v4120_v42 = vld [vmem:[%s7079_s7 + $0x318] sm:$0xff] }
 0x3d5   : > { %v3080_v25 = vrot.slane %v3074_v32, 1 }
 0x3d6   : > { %v2956_v36 = vpop.f32.mrf.mxu3  ;;  %v3025_v24 = vpop.f32.mrf.mxu2 }
 0x3d7   : > { %v6776_v43 = vmax.f32 %v3074_v32, %v3080_v25  ;;  %v2980_v5 = vadd.f32 %v2979_v33, %v2956_v36 }
 0x3d9   : > { %3095 = vst [vmem:[#allocation1] sm:$0xff] %v6776_v43  ;;  %v3003_v27 = vadd.f32 %v3002_v49, %v2980_v5  ;;  %v4140_v5 = vld [vmem:[%s7079_s7 + $0x3b8] sm:$0xff]  ;;  %v4139_v49 = vld [vmem:[%s7079_s7 + $0x3b0] sm:$0xff] }
 0x3db   : > { %v3076_v48 = vmax.f32 %v2768_v0, %v3003_v27  ;;  %v4138_v27 = vld [vmem:[%s7079_s7 + $0x3a8] sm:$0xff] }
 0x3dd   : > { %v3121_v32 = vrot.slane %v3076_v48, 1 }
 0x3de   : > { %v3045_v29 = vpop.f32.mrf.mxu3 }
 0x3df   : > { %v3046_v3 = vadd.f32 %v3045_v29, %v3022_v39  ;;  %v6868_v13 = vmax.f32 %v3076_v48, %v3121_v32  ;;  %v4152_v29 = vld [vmem:[%s7079_s7 + $0x410] sm:$0xff]  ;;  %v4134_v32 = vld [vmem:[%s7079_s7 + $0x388] sm:$0xff] }
 0x3e0   : > { %v4135_v48 = vld [vmem:[%s7079_s7 + $0x390] sm:$0xff] }
 0x3e1   : > { %v3069_v34 = vadd.f32 %v3068_v46, %v3046_v3  ;;  %v4164_v46 = vld [vmem:[%s7079_s7 + $0x470] sm:$0xff]  ;;  %v4162_v3 = vld [vmem:[%s7079_s7 + $0x460] sm:$0xff] }
 0x3e3   : > { %v3075_v52 = vmax.f32 %v2834_v19, %v3069_v34  ;;  %v4150_v34 = vld [vmem:[%s7079_s7 + $0x400] sm:$0xff] }
 0x3e5   : > { %v3081_v40 = vrot.slane %v3075_v52, 1 }
 0x3e6   : > { %v3048_v20 = vpop.f32.mrf.mxu3 }
 0x3e7   : > { %v3085_v12 = vmax.f32 %v3075_v52, %v3081_v40  ;;  %v3049_v44 = vadd.f32 %v3048_v20, %v3025_v24  ;;  %v4161_v52 = vld [vmem:[%s7079_s7 + $0x458] sm:$0xff]  ;;  %v4148_v40 = vld [vmem:[%s7079_s7 + $0x3f0] sm:$0xff]  ;;  %v4159_v24 = vld [vmem:[%s7079_s7 + $0x448] sm:$0xff] }
 0x3e8   : > { %v4137_v20 = vld [vmem:[%s7079_s7 + $0x3a0] sm:$0xff] }
 0x3e9   : > { %v3088_v6 = vrot.slane %v3085_v12, 7  ;;  %3096 = vst [vmem:[#allocation1 + $0x9] sm:$0xff] %v3085_v12  ;;  %v3072_v4 = vadd.f32 %v3071_v61, %v3049_v44  ;;  %v4146_v44 = vld [vmem:[%s7079_s7 + $0x3e0] sm:$0xff] }
 0x3eb   : > { %v3089_v8 = vsel %vm1723_vm5, %v6776_v43, %v3088_v6  ;;  %v3077_v30 = vmax.f32 %v2837_v56, %v3072_v4  ;;  %v4145_v6 = vld [vmem:[%s7079_s7 + $0x3d8] sm:$0xff]  ;;  %v4158_v4 = vld [vmem:[%s7079_s7 + $0x440] sm:$0xff] }
 0x3ec   : > { %3093 = vst.msk [vmem:[#allocation3] ss:$8 sm:$0x3] %vm6858_vm8, %v3089_v8 }
 0x3ed   : > { %v3122_v55 = vrot.slane %v3077_v30, 1 }
 0x3ef   : > { %v6866_v33 = vmax.f32 %v3077_v30, %v3122_v55  ;;  %v4119_v30 = vld [vmem:[%s7079_s7 + $0x310] sm:$0xff] }
 0x3f0   : > { %v3098_v11 = vld [vmem:[#allocation1 + $0x2] ss:$9 sm:$0xff] }
 0x3f1   : > { %3101 = vst.msk [vmem:[#allocation3 + $0x1] ss:$8 sm:$0x3] %vm6858_vm8, %v3098_v11  ;;  %v3129_v53 = vrot.slane %v6866_v33, 7  ;;  %v4144_v55 = vld [vmem:[%s7079_s7 + $0x3d0] sm:$0xff]  ;;  %v4118_v11 = vld [vmem:[%s7079_s7 + $0x308] sm:$0xff] }
 0x3f2   : > { %3103 = vst [vmem:[#allocation1] sm:$0xff] %v6776_v43 }
 0x3f3   : > { %3104 = vst [vmem:[#allocation1 + $0x9] sm:$0xff] %v3085_v12  ;;  %v3130_v9 = vsel %vm1723_vm5, %v6868_v13, %v3129_v53  ;;  %v3144_v25 = vld [vmem:[#allocation3] ss:$8 sm:$0x3] }
 0x3f4   : > { %3133 = vst.msk [vmem:[#allocation3 + $0x4] ss:$8 sm:$0x3] %vm6858_vm8, %v3130_v9  ;;  %v3170_v36 = vperm.slane %v3144_v25, 0  ;;  %v3171_v37 = vperm.slane %v3144_v25, 1  ;;  %v4117_v9 = vld [vmem:[%s7079_s7 + $0x300] sm:$0xff] }
 0x3f5   : > { %v4142_v25 = vld [vmem:[%s7079_s7 + $0x3c0] sm:$0xff] }
 0x3f6   : > { %3191 = vmatmul.f32.vlgmr.msra.gmra.mxu0 %v3170_v36  ;;  %4041 = vmatmul.msk.f32.vlgmr.msra.gmra.mxu2 %vm1114_vm4, %v3171_v37 }
 0x3f7   : > { %3467 = vmatpush.msra.mxu2 %v4132_v50  ;;  %3540 = vmatpush.msra.mxu0 %v4157_v63 }
 0x3f8   : > { %v3216_v23 = vld [vmem:[#allocation3 + $0x1] ss:$8 sm:$0x3] }
 0x3f9   : > { %3468 = vmatpush.msra.mxu2 %v4131_v54  ;;  %3541 = vmatpush.msra.mxu0 %v4156_v28  ;;  %v3244_v15 = vperm.slane %v3216_v23, 1  ;;  %v3243_v39 = vperm.slane %v3216_v23, 0 }
 0x3fa   : > { %v3106_v45 = vld [vmem:[#allocation1 + $0x4] ss:$9 sm:$0xff] }
 0x3fb   : > { %3109 = vst.msk [vmem:[#allocation3 + $0x2] ss:$8 sm:$0x3] %vm6858_vm8, %v3106_v45  ;;  %3469 = vmatpush.msra.mxu2 %v4130_v14  ;;  %3542 = vmatpush.msra.mxu0 %v4155_v51 }
 0x3fc   : > { %3111 = vst [vmem:[#allocation1] sm:$0xff] %v6776_v43  ;;  %4066 = vmatmul.msk.f32.vlgmr.msrb.gmra.mxu3 %vm1114_vm4, %v3244_v15  ;;  %v4127_v43 = vld [vmem:[%s7079_s7 + $0x350] sm:$0xff] }
 0x3fd   : > { %3112 = vst [vmem:[#allocation1 + $0x9] sm:$0xff] %v3085_v12  ;;  %3470 = vmatpush.msra.mxu2 %v4129_v58  ;;  %3543 = vmatpush.msra.mxu0 %v4154_v38  ;;  %v4136_v12 = vld [vmem:[%s7079_s7 + $0x398] sm:$0xff]  ;;  %v3143_v58 = vld [vmem:[%s7080_s8] sm:$0x1] }
 0x3fe   : > { %3264 = vmatmul.f32.vlgmr.msrb.gmra.mxu2 %v3243_v39  ;;  %3568 = vmatpush.msrb.mxu3 %v4165_v47 }
 0x3ff   : > { %3471 = vmatpush.msra.mxu2 %v4128_v60  ;;  %3544 = vmatpush.msra.mxu0 %v4153_v2 }
 0x400   : > { %3569 = vmatpush.msrb.mxu3 %v4164_v46 }
 0x401   : > { %3472 = vmatpush.msra.mxu2 %v4127_v43  ;;  %3545 = vmatpush.msra.mxu0 %v4152_v29 }
 0x402   : > { %v3289_v18 = vld [vmem:[#allocation3 + $0x2] ss:$8 sm:$0x3]  ;;  %3570 = vmatpush.msrb.mxu3 %v4163_v31 }
 0x403   : > { %3473 = vmatpush.msra.mxu2 %v4126_v21  ;;  %3546 = vmatpush.msra.mxu0 %v4151_v35  ;;  %v3316_v19 = vperm.slane %v3289_v18, 0  ;;  %v3317_v0 = vperm.slane %v3289_v18, 1 }
 0x404   : > { %v3114_v41 = vld [vmem:[#allocation1 + $0x6] ss:$9 sm:$0xff]  ;;  %3571 = vmatpush.msrb.mxu3 %v4162_v3 }
 0x405   : > { %3117 = vst.msk [vmem:[#allocation3 + $0x3] ss:$8 sm:$0x3] %vm6858_vm8, %v3114_v41  ;;  %3337 = vmatmul.f32.vlgmr.msrb.gmra.mxu1 %v3316_v19  ;;  %3474 = vmatpush.msra.mxu2 %v4125_v59 }
 0x406   : > { %3135 = vst [vmem:[#allocation1] sm:$0xff] %v6868_v13  ;;  %3495 = vmatpush.msrb.mxu1 %v4140_v5  ;;  %3547 = vmatpush.msra.mxu0 %v4150_v34  ;;  %v4133_v13 = vld [vmem:[%s7079_s7 + $0x380] sm:$0xff] }
 0x407   : > { %3136 = vst [vmem:[#allocation1 + $0x9] sm:$0xff] %v6866_v33  ;;  %3475 = vmatpush.msra.mxu2 %v4124_v22  ;;  %3572 = vmatpush.msrb.mxu3 %v4161_v52  ;;  %v3435_v33 = vld [vmem:[#allocation3 + $0x4] ss:$8 sm:$0x3] }
 0x408   : > { %3496 = vmatpush.msrb.mxu1 %v4139_v49  ;;  %3548 = vmatpush.msra.mxu0 %v4149_v62  ;;  %v3463_v53 = vperm.slane %v3435_v33, 1  ;;  %v3462_v50 = vperm.slane %v3435_v33, 0 }
 0x409   : > { %3476 = vmatpush.msra.mxu2 %v4123_v7  ;;  %3573 = vmatpush.msrb.mxu3 %v4160_v26 }
 0x40a   : > { %3497 = vmatpush.msrb.mxu1 %v4138_v27  ;;  %3549 = vmatpush.msra.mxu0 %v4148_v40 }
 0x40b   : > { %3477 = vmatpush.msra.mxu2 %v4122_v16  ;;  %3574 = vmatpush.msrb.mxu3 %v4159_v24 }
 0x40c   : > { %3498 = vmatpush.msrb.mxu1 %v4137_v20  ;;  %3550 = vmatpush.msra.mxu0 %v4147_v17  ;;  %v3362_v1 = vld [vmem:[#allocation3 + $0x3] ss:$8 sm:$0x3] }
 0x40d   : > { %4091 = vmatmul.msk.f32.vlgmr.msra.gmra.mxu1 %vm1114_vm4, %v3317_v0  ;;  %v3389_v56 = vperm.slane %v3362_v1, 0  ;;  %v3390_v61 = vperm.slane %v3362_v1, 1  ;;  %3478 = vmatpush.msra.mxu2 %v4121_v57 }
 0x40e   : > { %3499 = vmatpush.msrb.mxu1 %v4136_v12  ;;  %3551 = vmatpush.msra.mxu0 %v4146_v44  ;;  %v3138_v8 = vld [vmem:[#allocation1 + $0x2] ss:$9 sm:$0xff] }
 0x40f   : > { %3410 = vmatmul.f32.vlgmr.msra.gmra.mxu3 %v3389_v56  ;;  %4116 = vmatmul.msk.f32.vlgmr.msrb.gmra.mxu0 %vm1114_vm4, %v3390_v61  ;;  %3141 = vst.msk [vmem:[#allocation3 + $0x5] ss:$8 sm:$0x3] %vm6858_vm8, %v3138_v8 }
 0x410   : > { %3479 = vmatpush.msra.mxu2 %v4120_v42  ;;  %3500 = vmatpush.msrb.mxu1 %v4135_v48 }
 0x411   : > { %3552 = vmatpush.msra.mxu0 %v4145_v6  ;;  %3575 = vmatpush.msrb.mxu3 %v4158_v4 }
 0x412   : > { %3480 = vmatpush.msra.mxu2 %v4119_v30  ;;  %3501 = vmatpush.msrb.mxu1 %v4134_v32 }
 0x413   : > { %3553 = vmatpush.msra.mxu0 %v4144_v55 }
 0x414   : > { %3481 = vmatpush.msra.mxu2 %v4118_v11  ;;  %3502 = vmatpush.msrb.mxu1 %v4133_v13 }
 0x415   : > { %3554 = vmatpush.msra.mxu0 %v4143_v10  ;;  %4141 = vmatmul.msk.f32.vlgmr.msrb.gmra.mxu1 %vm1114_vm4, %v3463_v53 }
 0x416   : > { %v3508_v36 = vld [vmem:[#allocation3 + $0x5] ss:$8 sm:$0x3]  ;;  %3482 = vmatpush.msra.mxu2 %v4117_v9 }
 0x417   : > { %v3536_v37 = vperm.slane %v3508_v36, 1  ;;  %3555 = vmatpush.msra.mxu0 %v4142_v25  ;;  %3483 = vmatmul.f32.vlgmr.msra.gmra.mxu2 %v3462_v50  ;;  %v3535_v63 = vperm.slane %v3508_v36, 0 }
 0x419   : > { %4166 = vmatmul.msk.f32.vlgmr.msrb.gmra.mxu3 %vm1114_vm4, %v3536_v37  ;;  %3556 = vmatmul.f32.vlgmr.msra.gmra.mxu0 %v3535_v63 }
 0x473   : > { %v3192_v51 = vpop.f32.mrf.mxu0 }
 0x479   : > { %v3212_v54 = vpop.f32.mrf.mxu2 }
 0x47a   : > { %v3213_v45 = vadd.f32 %v3212_v54, %v3192_v51 }
 0x47c   : > { %v3215_v60 = vadd.f32 %v3213_v45, %v3143_v58 }
 0x47f   : > { %v3285_v14 = vpop.f32.mrf.mxu3 }
 0x481   : > { %v3265_v23 = vpop.f32.mrf.mxu2 }
 0x482   : > { %v3338_v28 = vpop.f32.mrf.mxu1  ;;  %v3286_v47 = vadd.f32 %v3285_v14, %v3265_v23 }
 0x484   : > { %v3288_v46 = vadd.f32 %v3286_v47, %v3215_v60 }
 0x48a   : > { %v3358_v15 = vpop.f32.mrf.mxu1 }
 0x48b   : > { %v3359_v2 = vadd.f32 %v3358_v15, %v3338_v28 }
 0x48c   : > { %v3431_v39 = vpop.f32.mrf.mxu0 }
 0x48d   : > { %v3361_v29 = vadd.f32 %v3359_v2, %v3288_v46 }
 0x492   : > { %v3411_v38 = vpop.f32.mrf.mxu3  ;;  %v3504_v31 = vpop.f32.mrf.mxu1 }
 0x493   : > { %v3432_v43 = vadd.f32 %v3431_v39, %v3411_v38 }
 0x495   : > { %v3434_v35 = vadd.f32 %v3432_v43, %v3361_v29 }
 0x496   : > { %v3557_v18 = vpop.f32.mrf.mxu0 }
 0x49a   : > { %v3484_v21 = vpop.f32.mrf.mxu2 }
 0x49b   : > { %v3505_v3 = vadd.f32 %v3504_v31, %v3484_v21 }
 0x49c   : > { %v3577_v59 = vpop.f32.mrf.mxu3 }
 0x49d   : > { %v3578_v19 = vadd.f32 %v3577_v59, %v3557_v18  ;;  %v3507_v5 = vadd.f32 %v3505_v3, %v3434_v35 }
 0x49f   : > { %v3580_v34 = vadd.f32 %v3578_v19, %v3507_v5 }
 0x4a1   : > { %3582 = vst.msk [vmem:[%s358_s14] sm:$0x1] %vm3581_vm9, %v3580_v34 }
 0x4a2   : > { %4321 = shalt.err (!%p4318_p8)
}
 0x4a3   : > { %4178 = dma.vmem_to_hbm [thread:$0]  (%p4460_p5), %s3595_s16, 16, %s3597_s17, %s3584_s22  }
 0x4a4 PF: > { %p4195_p9 = scmp.ge.s32.totalorder %s4364_s12, 2  ;;  %s3608_s26 = sand.u32 1, %s4352_s30  }
 0x4a5   : > { %s3609_s28 = scalar_lea.sflag [#allocation6], %s3608_s26 }
 0x4a6   : > { %p4188_p10 = pnand %p4195_p9, %p4464_p6 }
 0x4a8   : > { %p4189_p11 = pneg %p4188_p10 }
 0x4aa   : > { %4347 = dma.done.wait (%p4189_p11), %s3609_s28, 16  }
 0x4ab   : > { %4349 = vsyncadd (%p4189_p11), %s3609_s28, 4294967280  ;;  %p21_p12 = scmp.ge.s32.totalorder %s4447_s15, 4   ;;  %s7091_s30 = smov %s4356_s10 }
 0x4ac   : > { %s7092_s10 = smov %s4360_s11  ;;  %s7093_s11 = smov %s4458_s18 }
 0x4ad   : > { %s7094_s12 = smov %s4447_s15  ;;  %23 = sbr.rel (!%p21_p12) target bundleno = 7 (0x7), region = 143 }
 0x4b2   :  { %3614 = vsyncpa [#allocation5], 1 }
 0x4b3   :  { %3616 = vsyncpa [#allocation5 + $0x1], 1 }
 0x4b4   :  { %3617 = vsyncpa [#allocation8], 1 }
 0x4b5   :  { %3618 = vsyncpa [#allocation6], 1 }
 0x4b6   :  { %3620 = vsyncpa [#allocation6 + $0x1], 1 }

</bundles_post_ra>
